<compile_context>
chip_gen: v7x
topology: tpu7x:2x2x1
jax: 0.10.0
libtpu: 0.0.40
codegen_flags: <defaults>
</compile_context>

<pallas_src>
import jax
import jax.numpy as jnp
from jax import lax
from jax.experimental import pallas as pl
from jax.experimental.pallas import tpu as pltpu

LANE = 128                      # vreg lane width -> hidden dims padded to this
SUBLANE = 8                     # vreg sublanes   -> batch padded to this
MXU_DTYPE = jnp.bfloat16        # matmul operand dtype (accumulation stays f32)
ACT_DTYPE = jnp.bfloat16        # inter-layer activation streaming dtype
VMEM_LIMIT = 32 * 1024 * 1024   # explicit scoped-VMEM budget (safe on v5e/v6e/v7x)


def _round_up(n, m):
    return ((n + m - 1) // m) * m


def _time_chunk(T, bp, hp4, budget_bytes=8 * 1024 * 1024):
    """Largest divisor of T whose hoisted-projection scratch fits the budget."""
    cap = max(1, budget_bytes // (bp * hp4 * 4))
    cap = int(min(cap, 256, T))
    while T % cap:
        cap -= 1
    return cap


# ----------------------------------------------------------------------------
# Shared recurrence: gates_x (= x@W_ih + b) is precomputed for the whole chunk;
# the serial loop only contains h@W_hh plus gate math.  h/c live in the carry.
# ----------------------------------------------------------------------------
def _run_recurrence(gx_ref, w_hh_ref, h_sc, c_sc, out_ref=None):
    bp, hp = h_sc.shape
    tc = gx_ref.shape[0] // bp

    def step(t, carry):
        h, c = carry
        r0 = pl.multiple_of(t * bp, bp)                       # sublane-aligned row offset
        gates = gx_ref[pl.ds(r0, bp), :] + jnp.dot(
            h.astype(w_hh_ref.dtype), w_hh_ref[...],
            preferred_element_type=jnp.float32)               # (bp, 4*hp), f32
        i = jax.nn.sigmoid(gates[:, 0 * hp:1 * hp])           # lane-aligned slices
        f = jax.nn.sigmoid(gates[:, 1 * hp:2 * hp])
        g = jnp.tanh(gates[:, 2 * hp:3 * hp])
        o = jax.nn.sigmoid(gates[:, 3 * hp:4 * hp])
        c = f * c + i * g
        h = o * jnp.tanh(c)
        if out_ref is not None:                               # raw h; h_activ deferred
            out_ref[pl.ds(r0, bp), :] = h.astype(out_ref.dtype)
        return (h, c)

    h, c = lax.fori_loop(0, tc, step, (h_sc[...], c_sc[...]),
                         unroll=(tc if tc <= 16 else 8))
    h_sc[...] = h                                             # persist across T chunks
    c_sc[...] = c
    return h


# ----------------------------------------------------------------------------
# Kernel 1: intermediate LSTM layer over one time chunk, fused tanh h_activ.
#   x_ref    : (Tc*Bp, D_in)   ACT_DTYPE
#   w_ih_ref : (D_in, 4*Hp)    MXU_DTYPE
#   w_hh_ref : (Hp,   4*Hp)    MXU_DTYPE
#   b_ref    : (1,    4*Hp)    f32   (b_ih + b_hh)
#   out_ref  : (Tc*Bp, Hp)     ACT_DTYPE  = tanh(h_t)
# ----------------------------------------------------------------------------
def lstm_seq_kernel(x_ref, w_ih_ref, w_hh_ref, b_ref, out_ref, h_sc, c_sc, gx_sc):
    @pl.when(pl.program_id(0) == 0)
    def _():
        h_sc[...] = jnp.zeros_like(h_sc)
        c_sc[...] = jnp.zeros_like(c_sc)

    # Hoisted input projection: one big MXU matmul for the whole chunk, bias folded in.
    gx_sc[...] = (
        jnp.dot(x_ref[...], w_ih_ref[...], preferred_element_type=jnp.float32)
        + b_ref[...]
    )

    _run_recurrence(gx_sc, w_hh_ref, h_sc, c_sc, out_ref=out_ref)

    # Deferred h_activ (Tanh): one lane-dense pass over the whole chunk.
    out_ref[...] = jnp.tanh(out_ref[...].astype(jnp.float32)).astype(out_ref.dtype)


# ----------------------------------------------------------------------------
# Kernel 2: LAST LSTM layer + fused head.  Output sequence is never stored;
# only h_{T-1} feeds sigmoid(tanh(h) @ W_out + b_out), written at the last chunk.
# ----------------------------------------------------------------------------
def lstm_last_kernel(x_ref, w_ih_ref, w_hh_ref, b_ref, w_out_ref, b_out_ref,
                     out_ref, h_sc, c_sc, gx_sc):
    @pl.when(pl.program_id(0) == 0)
    def _():
        h_sc[...] = jnp.zeros_like(h_sc)
        c_sc[...] = jnp.zeros_like(c_sc)

    gx_sc[...] = (
        jnp.dot(x_ref[...], w_ih_ref[...], preferred_element_type=jnp.float32)
        + b_ref[...]
    )

    h = _run_recurrence(gx_sc, w_hh_ref, h_sc, c_sc, out_ref=None)

    @pl.when(pl.program_id(0) == pl.num_programs(0) - 1)
    def _():
        y = jnp.dot(jnp.tanh(h), w_out_ref[...],
                    preferred_element_type=jnp.float32) + b_out_ref[...]
        out_ref[...] = jax.nn.sigmoid(y)                      # fused out_activ


# ----------------------------------------------------------------------------
# Kernel 3: standalone head (only used when h_dims is empty).
# ----------------------------------------------------------------------------
def head_kernel(x_ref, w_ref, b_ref, o_ref):
    y = jnp.dot(x_ref[...], w_ref[...], preferred_element_type=jnp.float32) + b_ref[...]
    o_ref[...] = jax.nn.sigmoid(y)


def head_only(x, w, b):
    vmem = pl.BlockSpec(memory_space=pltpu.MemorySpace.VMEM)
    return pl.pallas_call(
        head_kernel,
        out_shape=jax.ShapeDtypeStruct((x.shape[0], w.shape[1]), jnp.float32),
        in_specs=[vmem, vmem, vmem],
        out_specs=vmem,
    )(x, w, b)


# ----------------------------------------------------------------------------
# Layer wrappers (grid over time chunks, "arbitrary" -> sequential recurrence).
# ----------------------------------------------------------------------------
def lstm_layer_seq(x, w_ih, w_hh, b, *, bp):
    rows, d_in = x.shape
    T = rows // bp
    hp4 = w_ih.shape[1]
    hp = hp4 // 4
    tc = _time_chunk(T, bp, hp4)
    nt = T // tc

    cost = pl.CostEstimate(
        flops=int(2 * T * bp * (d_in + hp) * hp4),
        transcendentals=int(6 * T * bp * hp),
        bytes_accessed=int(rows * d_in * x.dtype.itemsize
                           + rows * hp * x.dtype.itemsize
                           + (w_ih.size + w_hh.size) * w_ih.dtype.itemsize
                           + b.size * 4),
    )

    return pl.pallas_call(
        lstm_seq_kernel,
        out_shape=jax.ShapeDtypeStruct((rows, hp), ACT_DTYPE),
        grid_spec=pltpu.PrefetchScalarGridSpec(
            num_scalar_prefetch=0,
            grid=(nt,),
            in_specs=[
                pl.BlockSpec((tc * bp, d_in), lambda t: (t, 0)),
                pl.BlockSpec((d_in, hp4), lambda t: (0, 0)),
                pl.BlockSpec((hp, hp4), lambda t: (0, 0)),
                pl.BlockSpec((1, hp4), lambda t: (0, 0)),
            ],
            out_specs=pl.BlockSpec((tc * bp, hp), lambda t: (t, 0)),
            scratch_shapes=[
                pltpu.VMEM((bp, hp), jnp.float32),        # h carry across chunks
                pltpu.VMEM((bp, hp), jnp.float32),        # c carry across chunks
                pltpu.VMEM((tc * bp, hp4), jnp.float32),  # hoisted x@W_ih + b
            ]),
        compiler_params=pltpu.CompilerParams(
            dimension_semantics=("arbitrary",),
            vmem_limit_bytes=VMEM_LIMIT),
        cost_estimate=cost,
    )(x, w_ih, w_hh, b)


def lstm_layer_last(x, w_ih, w_hh, b, w_out, b_out, *, bp):
    rows, d_in = x.shape
    T = rows // bp
    hp4 = w_ih.shape[1]
    hp = hp4 // 4
    od = w_out.shape[1]
    tc = _time_chunk(T, bp, hp4)
    nt = T // tc

    cost = pl.CostEstimate(
        flops=int(2 * T * bp * (d_in + hp) * hp4 + 2 * bp * hp * od),
        transcendentals=int(6 * T * bp * hp),
        bytes_accessed=int(rows * d_in * x.dtype.itemsize
                           + bp * od * 4
                           + (w_ih.size + w_hh.size) * w_ih.dtype.itemsize
                           + (w_out.size + b.size + b_out.size) * 4),
    )

    return pl.pallas_call(
        lstm_last_kernel,
        out_shape=jax.ShapeDtypeStruct((bp, od), jnp.float32),
        grid_spec=pltpu.PrefetchScalarGridSpec(
            num_scalar_prefetch=0,
            grid=(nt,),
            in_specs=[
                pl.BlockSpec((tc * bp, d_in), lambda t: (t, 0)),
                pl.BlockSpec((d_in, hp4), lambda t: (0, 0)),
                pl.BlockSpec((hp, hp4), lambda t: (0, 0)),
                pl.BlockSpec((1, hp4), lambda t: (0, 0)),
                pl.BlockSpec((hp, od), lambda t: (0, 0)),
                pl.BlockSpec((1, od), lambda t: (0, 0)),
            ],
            out_specs=pl.BlockSpec((bp, od), lambda t: (0, 0)),
            scratch_shapes=[
                pltpu.VMEM((bp, hp), jnp.float32),
                pltpu.VMEM((bp, hp), jnp.float32),
                pltpu.VMEM((tc * bp, hp4), jnp.float32),
            ]),
        compiler_params=pltpu.CompilerParams(
            dimension_semantics=("arbitrary",),
            vmem_limit_bytes=VMEM_LIMIT),
        cost_estimate=cost,
    )(x, w_ih, w_hh, b, w_out, b_out)


# ----------------------------------------------------------------------------
# Parameters: PyTorch-shaped init, then pad hidden dims to LANE multiples,
# transpose to (in, 4*Hp) kernel layout, fuse biases, cast matmul weights.
# Gate order matches PyTorch: [i, f, g, o].
# ----------------------------------------------------------------------------
def init_params(key, input_dim, out_dim, h_dims):
    layer_dims = [input_dim] + list(h_dims) + [out_dim]
    n_lstm = len(layer_dims) - 2
    params = {"lstm": []}
    d_in_p = input_dim
    for idx in range(n_lstm):
        d_in, h = layer_dims[idx], layer_dims[idx + 1]
        hp = _round_up(h, LANE)
        k = 1.0 / float(h) ** 0.5
        key, k1, k2, k3, k4 = jax.random.split(key, 5)
        w_ih = jax.random.uniform(k1, (4 * h, d_in), jnp.float32, -k, k)   # PyTorch layout
        w_hh = jax.random.uniform(k2, (4 * h, h), jnp.float32, -k, k)
        b_ih = jax.random.uniform(k3, (4 * h,), jnp.float32, -k, k)
        b_hh = jax.random.uniform(k4, (4 * h,), jnp.float32, -k, k)

        w_ih_k = jnp.zeros((d_in_p, 4 * hp), jnp.float32)
        w_hh_k = jnp.zeros((hp, 4 * hp), jnp.float32)
        b_k = jnp.zeros((1, 4 * hp), jnp.float32)
        b_sum = b_ih + b_hh
        for g in range(4):
            w_ih_k = w_ih_k.at[:d_in, g * hp:g * hp + h].set(w_ih[g * h:(g + 1) * h, :].T)
            w_hh_k = w_hh_k.at[:h, g * hp:g * hp + h].set(w_hh[g * h:(g + 1) * h, :].T)
            b_k = b_k.at[0, g * hp:g * hp + h].set(b_sum[g * h:(g + 1) * h])
        params["lstm"].append(
            (w_ih_k.astype(MXU_DTYPE), w_hh_k.astype(MXU_DTYPE), b_k))
        d_in_p = hp

    h_last = layer_dims[-2]
    k = 1.0 / float(h_last) ** 0.5
    key, k1, k2 = jax.random.split(key, 3)
    w_out = jax.random.uniform(k1, (out_dim, h_last), jnp.float32, -k, k)  # PyTorch layout
    b_out = jax.random.uniform(k2, (out_dim,), jnp.float32, -k, k)
    w_out_k = jnp.zeros((d_in_p, out_dim), jnp.float32).at[:h_last, :].set(w_out.T)
    params["head"] = (w_out_k, b_out.reshape(1, out_dim))
    return params


# ----------------------------------------------------------------------------
# Forward pass glue (matches the PyTorch module's forward).
# ----------------------------------------------------------------------------
def lstm_forward(x_btd, params):
    B, T, D = x_btd.shape
    w_out, b_out = params["head"]
    if not params["lstm"]:
        return head_only(x_btd[:, -1, :].astype(jnp.float32), w_out, b_out)

    bp = _round_up(B, SUBLANE)
    # time-major, batch padded to a full sublane group, flattened to 2-D rows
    x = jnp.transpose(x_btd, (1, 0, 2))                 # (T, B, D)
    x = jnp.pad(x, ((0, 0), (0, bp - B), (0, 0)))       # (T, Bp, D)
    x = x.reshape(T * bp, D).astype(ACT_DTYPE)          # (T*Bp, D)

    for (w_ih, w_hh, b) in params["lstm"][:-1]:
        x = lstm_layer_seq(x, w_ih, w_hh, b, bp=bp)     # (T*Bp, Hp), tanh applied
    w_ih, w_hh, b = params["lstm"][-1]
    out = lstm_layer_last(x, w_ih, w_hh, b, w_out, b_out, bp=bp)  # (Bp, out_dim)
    return out[:B]


if __name__ == "__main__":
    B, T = 2, 8
    input_dim, out_dim, h_dims = 16, 1, [32, 32]

    key = jax.random.PRNGKey(0)
    key, kx = jax.random.split(key)
    x = jax.random.normal(kx, (B, T, input_dim), jnp.float32)

    params = init_params(key, input_dim, out_dim, h_dims)

    out = jax.jit(lambda x: lstm_forward(x, params))(x)
    jax.block_until_ready(out)
    assert out.shape == (B, out_dim), out.shape
    assert bool(jnp.all(jnp.isfinite(out)))
    print("KERNEL_OK")
</pallas_src>

<mosaic_0001>
module attributes {stable_mosaic.version = 11 : i64} {
  func.func @lstm_seq_kernel(%arg0: i32, %arg1: memref<64x16xbf16, #tpu.memory_space<vmem>>, %arg2: memref<16x512xbf16, #tpu.memory_space<vmem>>, %arg3: memref<128x512xbf16, #tpu.memory_space<vmem>>, %arg4: memref<1x512xf32, #tpu.memory_space<vmem>>, %arg5: memref<64x128xbf16, #tpu.memory_space<vmem>>, %arg6: memref<8x128xf32, #tpu.memory_space<vmem>>, %arg7: memref<8x128xf32, #tpu.memory_space<vmem>>, %arg8: memref<64x512xf32, #tpu.memory_space<vmem>>) attributes {dimension_semantics = [#tpu.dimension_semantics<arbitrary>], iteration_bounds = array<i64: 1>, scalar_prefetch = 0 : i64, scratch_operands = 3 : i64, tpu.core_type = #tpu.core_type<tc>, window_params = [{transform_indices = @transform_0, window_bounds = array<i64: 64, 16>}, {pipeline_mode = #tpu.pipeline_mode<synchronous>, transform_indices = @transform_1, window_bounds = array<i64: 16, 512>}, {pipeline_mode = #tpu.pipeline_mode<synchronous>, transform_indices = @transform_2, window_bounds = array<i64: 128, 512>}, {pipeline_mode = #tpu.pipeline_mode<synchronous>, transform_indices = @transform_3, window_bounds = array<i64: 1, 512>}, {transform_indices = @transform_4, window_bounds = array<i64: 64, 128>}]} {
    %c0_i32 = arith.constant 0 : i32
    %0 = arith.cmpi eq, %arg0, %c0_i32 : i32
    %1 = arith.extui %0 : i1 to i32
    %c0_i32_0 = arith.constant 0 : i32
    %2 = arith.cmpi ne, %1, %c0_i32_0 : i32
    scf.if %2 {
      %cst_93 = arith.constant 0.000000e+00 : f32
      %307 = vector.broadcast %cst_93 : f32 to vector<8x128xf32>
      %c0_94 = arith.constant 0 : index
      %c0_95 = arith.constant 0 : index
      %308 = vector.load %arg6[%c0_94, %c0_95] : memref<8x128xf32, #tpu.memory_space<vmem>>, vector<8x128xf32>
      tpu.vector_store %arg6[%c0_94, %c0_95], %307 {strides = array<i32>} : memref<8x128xf32, #tpu.memory_space<vmem>>, vector<8x128xf32>,
      %cst_96 = arith.constant 0.000000e+00 : f32
      %309 = vector.broadcast %cst_96 : f32 to vector<8x128xf32>
      %c0_97 = arith.constant 0 : index
      %c0_98 = arith.constant 0 : index
      %310 = vector.load %arg7[%c0_97, %c0_98] : memref<8x128xf32, #tpu.memory_space<vmem>>, vector<8x128xf32>
      tpu.vector_store %arg7[%c0_97, %c0_98], %309 {strides = array<i32>} : memref<8x128xf32, #tpu.memory_space<vmem>>, vector<8x128xf32>,
    } else {
    }
    %c0 = arith.constant 0 : index
    %c0_1 = arith.constant 0 : index
    %3 = vector.load %arg1[%c0, %c0_1] : memref<64x16xbf16, #tpu.memory_space<vmem>>, vector<64x16xbf16>
    %c0_2 = arith.constant 0 : index
    %c0_3 = arith.constant 0 : index
    %4 = vector.load %arg2[%c0_2, %c0_3] : memref<16x512xbf16, #tpu.memory_space<vmem>>, vector<16x512xbf16>
    %cst = arith.constant dense<0.000000e+00> : vector<64x512xf32>
    %5 = tpu.matmul %3, %4, %cst {dimension_numbers = #tpu.dot_dimension_numbers<[1], [0], [0], [1], [0, 0, 1, 1], [], []>} : vector<64x16xbf16>, vector<16x512xbf16>, vector<64x512xf32> -> vector<64x512xf32>
    %c0_4 = arith.constant 0 : index
    %c0_5 = arith.constant 0 : index
    %6 = vector.load %arg4[%c0_4, %c0_5] : memref<1x512xf32, #tpu.memory_space<vmem>>, vector<1x512xf32>
    %7 = vector.broadcast %6 : vector<1x512xf32> to vector<64x512xf32>
    %8 = arith.addf %5, %7 : vector<64x512xf32>
    %c0_6 = arith.constant 0 : index
    %c0_7 = arith.constant 0 : index
    %9 = vector.load %arg8[%c0_6, %c0_7] : memref<64x512xf32, #tpu.memory_space<vmem>>, vector<64x512xf32>
    tpu.vector_store %arg8[%c0_6, %c0_7], %8 {strides = array<i32>} : memref<64x512xf32, #tpu.memory_space<vmem>>, vector<64x512xf32>,
    %c0_8 = arith.constant 0 : index
    %c0_9 = arith.constant 0 : index
    %10 = vector.load %arg6[%c0_8, %c0_9] : memref<8x128xf32, #tpu.memory_space<vmem>>, vector<8x128xf32>
    %c0_10 = arith.constant 0 : index
    %c0_11 = arith.constant 0 : index
    %11 = vector.load %arg7[%c0_10, %c0_11] : memref<8x128xf32, #tpu.memory_space<vmem>>, vector<8x128xf32>
    %c0_i32_12 = arith.constant 0 : i32
    %c8_i32 = arith.constant 8 : i32
    %12 = arith.muli %c0_i32_12, %c8_i32 : i32
    %13 = tpu.assume_multiple %12, 8 : i32
    %14 = arith.index_cast %13 : i32 to index
    %c0_13 = arith.constant 0 : index
    %15 = vector.load %arg8[%14, %c0_13] : memref<64x512xf32, #tpu.memory_space<vmem>>, vector<8x512xf32>
    %16 = arith.truncf %10 : vector<8x128xf32> to vector<8x128xbf16>
    %c0_14 = arith.constant 0 : index
    %c0_15 = arith.constant 0 : index
    %17 = vector.load %arg3[%c0_14, %c0_15] : memref<128x512xbf16, #tpu.memory_space<vmem>>, vector<128x512xbf16>
    %cst_16 = arith.constant dense<0.000000e+00> : vector<8x512xf32>
    %18 = tpu.matmul %16, %17, %cst_16 {dimension_numbers = #tpu.dot_dimension_numbers<[1], [0], [0], [1], [0, 0, 1, 1], [], []>} : vector<8x128xbf16>, vector<128x512xbf16>, vector<8x512xf32> -> vector<8x512xf32>
    %19 = arith.addf %15, %18 : vector<8x512xf32>
    %20 = vector.extract_strided_slice %19 {offsets = [0, 0], sizes = [8, 128], strides = [1, 1]} : vector<8x512xf32> to vector<8x128xf32>
    %21 = arith.negf %20 : vector<8x128xf32>
    %22 = math.exp %21 : vector<8x128xf32>
    %cst_17 = arith.constant 1.000000e+00 : f32
    %23 = vector.broadcast %cst_17 : f32 to vector<8x128xf32>
    %24 = arith.addf %23, %22 : vector<8x128xf32>
    %25 = arith.divf %23, %24 : vector<8x128xf32>
    %26 = vector.extract_strided_slice %19 {offsets = [0, 128], sizes = [8, 128], strides = [1, 1]} : vector<8x512xf32> to vector<8x128xf32>
    %27 = arith.negf %26 : vector<8x128xf32>
    %28 = math.exp %27 : vector<8x128xf32>
    %cst_18 = arith.constant 1.000000e+00 : f32
    %29 = vector.broadcast %cst_18 : f32 to vector<8x128xf32>
    %30 = arith.addf %29, %28 : vector<8x128xf32>
    %31 = arith.divf %29, %30 : vector<8x128xf32>
    %32 = vector.extract_strided_slice %19 {offsets = [0, 256], sizes = [8, 128], strides = [1, 1]} : vector<8x512xf32> to vector<8x128xf32>
    %33 = math.tanh %32 : vector<8x128xf32>
    %34 = vector.extract_strided_slice %19 {offsets = [0, 384], sizes = [8, 128], strides = [1, 1]} : vector<8x512xf32> to vector<8x128xf32>
    %35 = arith.negf %34 : vector<8x128xf32>
    %36 = math.exp %35 : vector<8x128xf32>
    %cst_19 = arith.constant 1.000000e+00 : f32
    %37 = vector.broadcast %cst_19 : f32 to vector<8x128xf32>
    %38 = arith.addf %37, %36 : vector<8x128xf32>
    %39 = arith.divf %37, %38 : vector<8x128xf32>
    %40 = arith.mulf %31, %11 : vector<8x128xf32>
    %41 = arith.mulf %25, %33 : vector<8x128xf32>
    %42 = arith.addf %40, %41 : vector<8x128xf32>
    %43 = math.tanh %42 : vector<8x128xf32>
    %44 = arith.mulf %39, %43 : vector<8x128xf32>
    %45 = arith.truncf %44 : vector<8x128xf32> to vector<8x128xbf16>
    %46 = arith.index_cast %13 : i32 to index
    %c0_20 = arith.constant 0 : index
    %47 = vector.load %arg5[%46, %c0_20] : memref<64x128xbf16, #tpu.memory_space<vmem>>, vector<8x128xbf16>
    tpu.vector_store %arg5[%46, %c0_20], %45 {strides = array<i32>} : memref<64x128xbf16, #tpu.memory_space<vmem>>, vector<8x128xbf16>,
    %c1_i32 = arith.constant 1 : i32
    %c8_i32_21 = arith.constant 8 : i32
    %48 = arith.muli %c1_i32, %c8_i32_21 : i32
    %49 = tpu.assume_multiple %48, 8 : i32
    %50 = arith.index_cast %49 : i32 to index
    %c0_22 = arith.constant 0 : index
    %51 = vector.load %arg8[%50, %c0_22] : memref<64x512xf32, #tpu.memory_space<vmem>>, vector<8x512xf32>
    %52 = arith.truncf %44 : vector<8x128xf32> to vector<8x128xbf16>
    %c0_23 = arith.constant 0 : index
    %c0_24 = arith.constant 0 : index
    %53 = vector.load %arg3[%c0_23, %c0_24] : memref<128x512xbf16, #tpu.memory_space<vmem>>, vector<128x512xbf16>
    %cst_25 = arith.constant dense<0.000000e+00> : vector<8x512xf32>
    %54 = tpu.matmul %52, %53, %cst_25 {dimension_numbers = #tpu.dot_dimension_numbers<[1], [0], [0], [1], [0, 0, 1, 1], [], []>} : vector<8x128xbf16>, vector<128x512xbf16>, vector<8x512xf32> -> vector<8x512xf32>
    %55 = arith.addf %51, %54 : vector<8x512xf32>
    %56 = vector.extract_strided_slice %55 {offsets = [0, 0], sizes = [8, 128], strides = [1, 1]} : vector<8x512xf32> to vector<8x128xf32>
    %57 = arith.negf %56 : vector<8x128xf32>
    %58 = math.exp %57 : vector<8x128xf32>
    %cst_26 = arith.constant 1.000000e+00 : f32
    %59 = vector.broadcast %cst_26 : f32 to vector<8x128xf32>
    %60 = arith.addf %59, %58 : vector<8x128xf32>
    %61 = arith.divf %59, %60 : vector<8x128xf32>
    %62 = vector.extract_strided_slice %55 {offsets = [0, 128], sizes = [8, 128], strides = [1, 1]} : vector<8x512xf32> to vector<8x128xf32>
    %63 = arith.negf %62 : vector<8x128xf32>
    %64 = math.exp %63 : vector<8x128xf32>
    %cst_27 = arith.constant 1.000000e+00 : f32
    %65 = vector.broadcast %cst_27 : f32 to vector<8x128xf32>
    %66 = arith.addf %65, %64 : vector<8x128xf32>
    %67 = arith.divf %65, %66 : vector<8x128xf32>
    %68 = vector.extract_strided_slice %55 {offsets = [0, 256], sizes = [8, 128], strides = [1, 1]} : vector<8x512xf32> to vector<8x128xf32>
    %69 = math.tanh %68 : vector<8x128xf32>
    %70 = vector.extract_strided_slice %55 {offsets = [0, 384], sizes = [8, 128], strides = [1, 1]} : vector<8x512xf32> to vector<8x128xf32>
    %71 = arith.negf %70 : vector<8x128xf32>
    %72 = math.exp %71 : vector<8x128xf32>
    %cst_28 = arith.constant 1.000000e+00 : f32
    %73 = vector.broadcast %cst_28 : f32 to vector<8x128xf32>
    %74 = arith.addf %73, %72 : vector<8x128xf32>
    %75 = arith.divf %73, %74 : vector<8x128xf32>
    %76 = arith.mulf %67, %42 : vector<8x128xf32>
    %77 = arith.mulf %61, %69 : vector<8x128xf32>
    %78 = arith.addf %76, %77 : vector<8x128xf32>
    %79 = math.tanh %78 : vector<8x128xf32>
    %80 = arith.mulf %75, %79 : vector<8x128xf32>
    %81 = arith.truncf %80 : vector<8x128xf32> to vector<8x128xbf16>
    %82 = arith.index_cast %49 : i32 to index
    %c0_29 = arith.constant 0 : index
    %83 = vector.load %arg5[%82, %c0_29] : memref<64x128xbf16, #tpu.memory_space<vmem>>, vector<8x128xbf16>
    tpu.vector_store %arg5[%82, %c0_29], %81 {strides = array<i32>} : memref<64x128xbf16, #tpu.memory_space<vmem>>, vector<8x128xbf16>,
    %c2_i32 = arith.constant 2 : i32
    %c8_i32_30 = arith.constant 8 : i32
    %84 = arith.muli %c2_i32, %c8_i32_30 : i32
    %85 = tpu.assume_multiple %84, 8 : i32
    %86 = arith.index_cast %85 : i32 to index
    %c0_31 = arith.constant 0 : index
    %87 = vector.load %arg8[%86, %c0_31] : memref<64x512xf32, #tpu.memory_space<vmem>>, vector<8x512xf32>
    %88 = arith.truncf %80 : vector<8x128xf32> to vector<8x128xbf16>
    %c0_32 = arith.constant 0 : index
    %c0_33 = arith.constant 0 : index
    %89 = vector.load %arg3[%c0_32, %c0_33] : memref<128x512xbf16, #tpu.memory_space<vmem>>, vector<128x512xbf16>
    %cst_34 = arith.constant dense<0.000000e+00> : vector<8x512xf32>
    %90 = tpu.matmul %88, %89, %cst_34 {dimension_numbers = #tpu.dot_dimension_numbers<[1], [0], [0], [1], [0, 0, 1, 1], [], []>} : vector<8x128xbf16>, vector<128x512xbf16>, vector<8x512xf32> -> vector<8x512xf32>
    %91 = arith.addf %87, %90 : vector<8x512xf32>
    %92 = vector.extract_strided_slice %91 {offsets = [0, 0], sizes = [8, 128], strides = [1, 1]} : vector<8x512xf32> to vector<8x128xf32>
    %93 = arith.negf %92 : vector<8x128xf32>
    %94 = math.exp %93 : vector<8x128xf32>
    %cst_35 = arith.constant 1.000000e+00 : f32
    %95 = vector.broadcast %cst_35 : f32 to vector<8x128xf32>
    %96 = arith.addf %95, %94 : vector<8x128xf32>
    %97 = arith.divf %95, %96 : vector<8x128xf32>
    %98 = vector.extract_strided_slice %91 {offsets = [0, 128], sizes = [8, 128], strides = [1, 1]} : vector<8x512xf32> to vector<8x128xf32>
    %99 = arith.negf %98 : vector<8x128xf32>
    %100 = math.exp %99 : vector<8x128xf32>
    %cst_36 = arith.constant 1.000000e+00 : f32
    %101 = vector.broadcast %cst_36 : f32 to vector<8x128xf32>
    %102 = arith.addf %101, %100 : vector<8x128xf32>
    %103 = arith.divf %101, %102 : vector<8x128xf32>
    %104 = vector.extract_strided_slice %91 {offsets = [0, 256], sizes = [8, 128], strides = [1, 1]} : vector<8x512xf32> to vector<8x128xf32>
    %105 = math.tanh %104 : vector<8x128xf32>
    %106 = vector.extract_strided_slice %91 {offsets = [0, 384], sizes = [8, 128], strides = [1, 1]} : vector<8x512xf32> to vector<8x128xf32>
    %107 = arith.negf %106 : vector<8x128xf32>
    %108 = math.exp %107 : vector<8x128xf32>
    %cst_37 = arith.constant 1.000000e+00 : f32
    %109 = vector.broadcast %cst_37 : f32 to vector<8x128xf32>
    %110 = arith.addf %109, %108 : vector<8x128xf32>
    %111 = arith.divf %109, %110 : vector<8x128xf32>
    %112 = arith.mulf %103, %78 : vector<8x128xf32>
    %113 = arith.mulf %97, %105 : vector<8x128xf32>
    %114 = arith.addf %112, %113 : vector<8x128xf32>
    %115 = math.tanh %114 : vector<8x128xf32>
    %116 = arith.mulf %111, %115 : vector<8x128xf32>
    %117 = arith.truncf %116 : vector<8x128xf32> to vector<8x128xbf16>
    %118 = arith.index_cast %85 : i32 to index
    %c0_38 = arith.constant 0 : index
    %119 = vector.load %arg5[%118, %c0_38] : memref<64x128xbf16, #tpu.memory_space<vmem>>, vector<8x128xbf16>
    tpu.vector_store %arg5[%118, %c0_38], %117 {strides = array<i32>} : memref<64x128xbf16, #tpu.memory_space<vmem>>, vector<8x128xbf16>,
    %c3_i32 = arith.constant 3 : i32
    %c8_i32_39 = arith.constant 8 : i32
    %120 = arith.muli %c3_i32, %c8_i32_39 : i32
    %121 = tpu.assume_multiple %120, 8 : i32
    %122 = arith.index_cast %121 : i32 to index
    %c0_40 = arith.constant 0 : index
    %123 = vector.load %arg8[%122, %c0_40] : memref<64x512xf32, #tpu.memory_space<vmem>>, vector<8x512xf32>
    %124 = arith.truncf %116 : vector<8x128xf32> to vector<8x128xbf16>
    %c0_41 = arith.constant 0 : index
    %c0_42 = arith.constant 0 : index
    %125 = vector.load %arg3[%c0_41, %c0_42] : memref<128x512xbf16, #tpu.memory_space<vmem>>, vector<128x512xbf16>
    %cst_43 = arith.constant dense<0.000000e+00> : vector<8x512xf32>
    %126 = tpu.matmul %124, %125, %cst_43 {dimension_numbers = #tpu.dot_dimension_numbers<[1], [0], [0], [1], [0, 0, 1, 1], [], []>} : vector<8x128xbf16>, vector<128x512xbf16>, vector<8x512xf32> -> vector<8x512xf32>
    %127 = arith.addf %123, %126 : vector<8x512xf32>
    %128 = vector.extract_strided_slice %127 {offsets = [0, 0], sizes = [8, 128], strides = [1, 1]} : vector<8x512xf32> to vector<8x128xf32>
    %129 = arith.negf %128 : vector<8x128xf32>
    %130 = math.exp %129 : vector<8x128xf32>
    %cst_44 = arith.constant 1.000000e+00 : f32
    %131 = vector.broadcast %cst_44 : f32 to vector<8x128xf32>
    %132 = arith.addf %131, %130 : vector<8x128xf32>
    %133 = arith.divf %131, %132 : vector<8x128xf32>
    %134 = vector.extract_strided_slice %127 {offsets = [0, 128], sizes = [8, 128], strides = [1, 1]} : vector<8x512xf32> to vector<8x128xf32>
    %135 = arith.negf %134 : vector<8x128xf32>
    %136 = math.exp %135 : vector<8x128xf32>
    %cst_45 = arith.constant 1.000000e+00 : f32
    %137 = vector.broadcast %cst_45 : f32 to vector<8x128xf32>
    %138 = arith.addf %137, %136 : vector<8x128xf32>
    %139 = arith.divf %137, %138 : vector<8x128xf32>
    %140 = vector.extract_strided_slice %127 {offsets = [0, 256], sizes = [8, 128], strides = [1, 1]} : vector<8x512xf32> to vector<8x128xf32>
    %141 = math.tanh %140 : vector<8x128xf32>
    %142 = vector.extract_strided_slice %127 {offsets = [0, 384], sizes = [8, 128], strides = [1, 1]} : vector<8x512xf32> to vector<8x128xf32>
    %143 = arith.negf %142 : vector<8x128xf32>
    %144 = math.exp %143 : vector<8x128xf32>
    %cst_46 = arith.constant 1.000000e+00 : f32
    %145 = vector.broadcast %cst_46 : f32 to vector<8x128xf32>
    %146 = arith.addf %145, %144 : vector<8x128xf32>
    %147 = arith.divf %145, %146 : vector<8x128xf32>
    %148 = arith.mulf %139, %114 : vector<8x128xf32>
    %149 = arith.mulf %133, %141 : vector<8x128xf32>
    %150 = arith.addf %148, %149 : vector<8x128xf32>
    %151 = math.tanh %150 : vector<8x128xf32>
    %152 = arith.mulf %147, %151 : vector<8x128xf32>
    %153 = arith.truncf %152 : vector<8x128xf32> to vector<8x128xbf16>
    %154 = arith.index_cast %121 : i32 to index
    %c0_47 = arith.constant 0 : index
    %155 = vector.load %arg5[%154, %c0_47] : memref<64x128xbf16, #tpu.memory_space<vmem>>, vector<8x128xbf16>
    tpu.vector_store %arg5[%154, %c0_47], %153 {strides = array<i32>} : memref<64x128xbf16, #tpu.memory_space<vmem>>, vector<8x128xbf16>,
    %c4_i32 = arith.constant 4 : i32
    %c8_i32_48 = arith.constant 8 : i32
    %156 = arith.muli %c4_i32, %c8_i32_48 : i32
    %157 = tpu.assume_multiple %156, 8 : i32
    %158 = arith.index_cast %157 : i32 to index
    %c0_49 = arith.constant 0 : index
    %159 = vector.load %arg8[%158, %c0_49] : memref<64x512xf32, #tpu.memory_space<vmem>>, vector<8x512xf32>
    %160 = arith.truncf %152 : vector<8x128xf32> to vector<8x128xbf16>
    %c0_50 = arith.constant 0 : index
    %c0_51 = arith.constant 0 : index
    %161 = vector.load %arg3[%c0_50, %c0_51] : memref<128x512xbf16, #tpu.memory_space<vmem>>, vector<128x512xbf16>
    %cst_52 = arith.constant dense<0.000000e+00> : vector<8x512xf32>
    %162 = tpu.matmul %160, %161, %cst_52 {dimension_numbers = #tpu.dot_dimension_numbers<[1], [0], [0], [1], [0, 0, 1, 1], [], []>} : vector<8x128xbf16>, vector<128x512xbf16>, vector<8x512xf32> -> vector<8x512xf32>
    %163 = arith.addf %159, %162 : vector<8x512xf32>
    %164 = vector.extract_strided_slice %163 {offsets = [0, 0], sizes = [8, 128], strides = [1, 1]} : vector<8x512xf32> to vector<8x128xf32>
    %165 = arith.negf %164 : vector<8x128xf32>
    %166 = math.exp %165 : vector<8x128xf32>
    %cst_53 = arith.constant 1.000000e+00 : f32
    %167 = vector.broadcast %cst_53 : f32 to vector<8x128xf32>
    %168 = arith.addf %167, %166 : vector<8x128xf32>
    %169 = arith.divf %167, %168 : vector<8x128xf32>
    %170 = vector.extract_strided_slice %163 {offsets = [0, 128], sizes = [8, 128], strides = [1, 1]} : vector<8x512xf32> to vector<8x128xf32>
    %171 = arith.negf %170 : vector<8x128xf32>
    %172 = math.exp %171 : vector<8x128xf32>
    %cst_54 = arith.constant 1.000000e+00 : f32
    %173 = vector.broadcast %cst_54 : f32 to vector<8x128xf32>
    %174 = arith.addf %173, %172 : vector<8x128xf32>
    %175 = arith.divf %173, %174 : vector<8x128xf32>
    %176 = vector.extract_strided_slice %163 {offsets = [0, 256], sizes = [8, 128], strides = [1, 1]} : vector<8x512xf32> to vector<8x128xf32>
    %177 = math.tanh %176 : vector<8x128xf32>
    %178 = vector.extract_strided_slice %163 {offsets = [0, 384], sizes = [8, 128], strides = [1, 1]} : vector<8x512xf32> to vector<8x128xf32>
    %179 = arith.negf %178 : vector<8x128xf32>
    %180 = math.exp %179 : vector<8x128xf32>
    %cst_55 = arith.constant 1.000000e+00 : f32
    %181 = vector.broadcast %cst_55 : f32 to vector<8x128xf32>
    %182 = arith.addf %181, %180 : vector<8x128xf32>
    %183 = arith.divf %181, %182 : vector<8x128xf32>
    %184 = arith.mulf %175, %150 : vector<8x128xf32>
    %185 = arith.mulf %169, %177 : vector<8x128xf32>
    %186 = arith.addf %184, %185 : vector<8x128xf32>
    %187 = math.tanh %186 : vector<8x128xf32>
    %188 = arith.mulf %183, %187 : vector<8x128xf32>
    %189 = arith.truncf %188 : vector<8x128xf32> to vector<8x128xbf16>
    %190 = arith.index_cast %157 : i32 to index
    %c0_56 = arith.constant 0 : index
    %191 = vector.load %arg5[%190, %c0_56] : memref<64x128xbf16, #tpu.memory_space<vmem>>, vector<8x128xbf16>
    tpu.vector_store %arg5[%190, %c0_56], %189 {strides = array<i32>} : memref<64x128xbf16, #tpu.memory_space<vmem>>, vector<8x128xbf16>,
    %c5_i32 = arith.constant 5 : i32
    %c8_i32_57 = arith.constant 8 : i32
    %192 = arith.muli %c5_i32, %c8_i32_57 : i32
    %193 = tpu.assume_multiple %192, 8 : i32
    %194 = arith.index_cast %193 : i32 to index
    %c0_58 = arith.constant 0 : index
    %195 = vector.load %arg8[%194, %c0_58] : memref<64x512xf32, #tpu.memory_space<vmem>>, vector<8x512xf32>
    %196 = arith.truncf %188 : vector<8x128xf32> to vector<8x128xbf16>
    %c0_59 = arith.constant 0 : index
    %c0_60 = arith.constant 0 : index
    %197 = vector.load %arg3[%c0_59, %c0_60] : memref<128x512xbf16, #tpu.memory_space<vmem>>, vector<128x512xbf16>
    %cst_61 = arith.constant dense<0.000000e+00> : vector<8x512xf32>
    %198 = tpu.matmul %196, %197, %cst_61 {dimension_numbers = #tpu.dot_dimension_numbers<[1], [0], [0], [1], [0, 0, 1, 1], [], []>} : vector<8x128xbf16>, vector<128x512xbf16>, vector<8x512xf32> -> vector<8x512xf32>
    %199 = arith.addf %195, %198 : vector<8x512xf32>
    %200 = vector.extract_strided_slice %199 {offsets = [0, 0], sizes = [8, 128], strides = [1, 1]} : vector<8x512xf32> to vector<8x128xf32>
    %201 = arith.negf %200 : vector<8x128xf32>
    %202 = math.exp %201 : vector<8x128xf32>
    %cst_62 = arith.constant 1.000000e+00 : f32
    %203 = vector.broadcast %cst_62 : f32 to vector<8x128xf32>
    %204 = arith.addf %203, %202 : vector<8x128xf32>
    %205 = arith.divf %203, %204 : vector<8x128xf32>
    %206 = vector.extract_strided_slice %199 {offsets = [0, 128], sizes = [8, 128], strides = [1, 1]} : vector<8x512xf32> to vector<8x128xf32>
    %207 = arith.negf %206 : vector<8x128xf32>
    %208 = math.exp %207 : vector<8x128xf32>
    %cst_63 = arith.constant 1.000000e+00 : f32
    %209 = vector.broadcast %cst_63 : f32 to vector<8x128xf32>
    %210 = arith.addf %209, %208 : vector<8x128xf32>
    %211 = arith.divf %209, %210 : vector<8x128xf32>
    %212 = vector.extract_strided_slice %199 {offsets = [0, 256], sizes = [8, 128], strides = [1, 1]} : vector<8x512xf32> to vector<8x128xf32>
    %213 = math.tanh %212 : vector<8x128xf32>
    %214 = vector.extract_strided_slice %199 {offsets = [0, 384], sizes = [8, 128], strides = [1, 1]} : vector<8x512xf32> to vector<8x128xf32>
    %215 = arith.negf %214 : vector<8x128xf32>
    %216 = math.exp %215 : vector<8x128xf32>
    %cst_64 = arith.constant 1.000000e+00 : f32
    %217 = vector.broadcast %cst_64 : f32 to vector<8x128xf32>
    %218 = arith.addf %217, %216 : vector<8x128xf32>
    %219 = arith.divf %217, %218 : vector<8x128xf32>
    %220 = arith.mulf %211, %186 : vector<8x128xf32>
    %221 = arith.mulf %205, %213 : vector<8x128xf32>
    %222 = arith.addf %220, %221 : vector<8x128xf32>
    %223 = math.tanh %222 : vector<8x128xf32>
    %224 = arith.mulf %219, %223 : vector<8x128xf32>
    %225 = arith.truncf %224 : vector<8x128xf32> to vector<8x128xbf16>
    %226 = arith.index_cast %193 : i32 to index
    %c0_65 = arith.constant 0 : index
    %227 = vector.load %arg5[%226, %c0_65] : memref<64x128xbf16, #tpu.memory_space<vmem>>, vector<8x128xbf16>
    tpu.vector_store %arg5[%226, %c0_65], %225 {strides = array<i32>} : memref<64x128xbf16, #tpu.memory_space<vmem>>, vector<8x128xbf16>,
    %c6_i32 = arith.constant 6 : i32
    %c8_i32_66 = arith.constant 8 : i32
    %228 = arith.muli %c6_i32, %c8_i32_66 : i32
    %229 = tpu.assume_multiple %228, 8 : i32
    %230 = arith.index_cast %229 : i32 to index
    %c0_67 = arith.constant 0 : index
    %231 = vector.load %arg8[%230, %c0_67] : memref<64x512xf32, #tpu.memory_space<vmem>>, vector<8x512xf32>
    %232 = arith.truncf %224 : vector<8x128xf32> to vector<8x128xbf16>
    %c0_68 = arith.constant 0 : index
    %c0_69 = arith.constant 0 : index
    %233 = vector.load %arg3[%c0_68, %c0_69] : memref<128x512xbf16, #tpu.memory_space<vmem>>, vector<128x512xbf16>
    %cst_70 = arith.constant dense<0.000000e+00> : vector<8x512xf32>
    %234 = tpu.matmul %232, %233, %cst_70 {dimension_numbers = #tpu.dot_dimension_numbers<[1], [0], [0], [1], [0, 0, 1, 1], [], []>} : vector<8x128xbf16>, vector<128x512xbf16>, vector<8x512xf32> -> vector<8x512xf32>
    %235 = arith.addf %231, %234 : vector<8x512xf32>
    %236 = vector.extract_strided_slice %235 {offsets = [0, 0], sizes = [8, 128], strides = [1, 1]} : vector<8x512xf32> to vector<8x128xf32>
    %237 = arith.negf %236 : vector<8x128xf32>
    %238 = math.exp %237 : vector<8x128xf32>
    %cst_71 = arith.constant 1.000000e+00 : f32
    %239 = vector.broadcast %cst_71 : f32 to vector<8x128xf32>
    %240 = arith.addf %239, %238 : vector<8x128xf32>
    %241 = arith.divf %239, %240 : vector<8x128xf32>
    %242 = vector.extract_strided_slice %235 {offsets = [0, 128], sizes = [8, 128], strides = [1, 1]} : vector<8x512xf32> to vector<8x128xf32>
    %243 = arith.negf %242 : vector<8x128xf32>
    %244 = math.exp %243 : vector<8x128xf32>
    %cst_72 = arith.constant 1.000000e+00 : f32
    %245 = vector.broadcast %cst_72 : f32 to vector<8x128xf32>
    %246 = arith.addf %245, %244 : vector<8x128xf32>
    %247 = arith.divf %245, %246 : vector<8x128xf32>
    %248 = vector.extract_strided_slice %235 {offsets = [0, 256], sizes = [8, 128], strides = [1, 1]} : vector<8x512xf32> to vector<8x128xf32>
    %249 = math.tanh %248 : vector<8x128xf32>
    %250 = vector.extract_strided_slice %235 {offsets = [0, 384], sizes = [8, 128], strides = [1, 1]} : vector<8x512xf32> to vector<8x128xf32>
    %251 = arith.negf %250 : vector<8x128xf32>
    %252 = math.exp %251 : vector<8x128xf32>
    %cst_73 = arith.constant 1.000000e+00 : f32
    %253 = vector.broadcast %cst_73 : f32 to vector<8x128xf32>
    %254 = arith.addf %253, %252 : vector<8x128xf32>
    %255 = arith.divf %253, %254 : vector<8x128xf32>
    %256 = arith.mulf %247, %222 : vector<8x128xf32>
    %257 = arith.mulf %241, %249 : vector<8x128xf32>
    %258 = arith.addf %256, %257 : vector<8x128xf32>
    %259 = math.tanh %258 : vector<8x128xf32>
    %260 = arith.mulf %255, %259 : vector<8x128xf32>
    %261 = arith.truncf %260 : vector<8x128xf32> to vector<8x128xbf16>
    %262 = arith.index_cast %229 : i32 to index
    %c0_74 = arith.constant 0 : index
    %263 = vector.load %arg5[%262, %c0_74] : memref<64x128xbf16, #tpu.memory_space<vmem>>, vector<8x128xbf16>
    tpu.vector_store %arg5[%262, %c0_74], %261 {strides = array<i32>} : memref<64x128xbf16, #tpu.memory_space<vmem>>, vector<8x128xbf16>,
    %c7_i32 = arith.constant 7 : i32
    %c8_i32_75 = arith.constant 8 : i32
    %264 = arith.muli %c7_i32, %c8_i32_75 : i32
    %265 = tpu.assume_multiple %264, 8 : i32
    %266 = arith.index_cast %265 : i32 to index
    %c0_76 = arith.constant 0 : index
    %267 = vector.load %arg8[%266, %c0_76] : memref<64x512xf32, #tpu.memory_space<vmem>>, vector<8x512xf32>
    %268 = arith.truncf %260 : vector<8x128xf32> to vector<8x128xbf16>
    %c0_77 = arith.constant 0 : index
    %c0_78 = arith.constant 0 : index
    %269 = vector.load %arg3[%c0_77, %c0_78] : memref<128x512xbf16, #tpu.memory_space<vmem>>, vector<128x512xbf16>
    %cst_79 = arith.constant dense<0.000000e+00> : vector<8x512xf32>
    %270 = tpu.matmul %268, %269, %cst_79 {dimension_numbers = #tpu.dot_dimension_numbers<[1], [0], [0], [1], [0, 0, 1, 1], [], []>} : vector<8x128xbf16>, vector<128x512xbf16>, vector<8x512xf32> -> vector<8x512xf32>
    %271 = arith.addf %267, %270 : vector<8x512xf32>
    %272 = vector.extract_strided_slice %271 {offsets = [0, 0], sizes = [8, 128], strides = [1, 1]} : vector<8x512xf32> to vector<8x128xf32>
    %273 = arith.negf %272 : vector<8x128xf32>
    %274 = math.exp %273 : vector<8x128xf32>
    %cst_80 = arith.constant 1.000000e+00 : f32
    %275 = vector.broadcast %cst_80 : f32 to vector<8x128xf32>
    %276 = arith.addf %275, %274 : vector<8x128xf32>
    %277 = arith.divf %275, %276 : vector<8x128xf32>
    %278 = vector.extract_strided_slice %271 {offsets = [0, 128], sizes = [8, 128], strides = [1, 1]} : vector<8x512xf32> to vector<8x128xf32>
    %279 = arith.negf %278 : vector<8x128xf32>
    %280 = math.exp %279 : vector<8x128xf32>
    %cst_81 = arith.constant 1.000000e+00 : f32
    %281 = vector.broadcast %cst_81 : f32 to vector<8x128xf32>
    %282 = arith.addf %281, %280 : vector<8x128xf32>
    %283 = arith.divf %281, %282 : vector<8x128xf32>
    %284 = vector.extract_strided_slice %271 {offsets = [0, 256], sizes = [8, 128], strides = [1, 1]} : vector<8x512xf32> to vector<8x128xf32>
    %285 = math.tanh %284 : vector<8x128xf32>
    %286 = vector.extract_strided_slice %271 {offsets = [0, 384], sizes = [8, 128], strides = [1, 1]} : vector<8x512xf32> to vector<8x128xf32>
    %287 = arith.negf %286 : vector<8x128xf32>
    %288 = math.exp %287 : vector<8x128xf32>
    %cst_82 = arith.constant 1.000000e+00 : f32
    %289 = vector.broadcast %cst_82 : f32 to vector<8x128xf32>
    %290 = arith.addf %289, %288 : vector<8x128xf32>
    %291 = arith.divf %289, %290 : vector<8x128xf32>
    %292 = arith.mulf %283, %258 : vector<8x128xf32>
    %293 = arith.mulf %277, %285 : vector<8x128xf32>
    %294 = arith.addf %292, %293 : vector<8x128xf32>
    %295 = math.tanh %294 : vector<8x128xf32>
    %296 = arith.mulf %291, %295 : vector<8x128xf32>
    %297 = arith.truncf %296 : vector<8x128xf32> to vector<8x128xbf16>
    %298 = arith.index_cast %265 : i32 to index
    %c0_83 = arith.constant 0 : index
    %299 = vector.load %arg5[%298, %c0_83] : memref<64x128xbf16, #tpu.memory_space<vmem>>, vector<8x128xbf16>
    tpu.vector_store %arg5[%298, %c0_83], %297 {strides = array<i32>} : memref<64x128xbf16, #tpu.memory_space<vmem>>, vector<8x128xbf16>,
    %c8_i32_84 = arith.constant 8 : i32
    %c0_85 = arith.constant 0 : index
    %c0_86 = arith.constant 0 : index
    %300 = vector.load %arg6[%c0_85, %c0_86] : memref<8x128xf32, #tpu.memory_space<vmem>>, vector<8x128xf32>
    tpu.vector_store %arg6[%c0_85, %c0_86], %296 {strides = array<i32>} : memref<8x128xf32, #tpu.memory_space<vmem>>, vector<8x128xf32>,
    %c0_87 = arith.constant 0 : index
    %c0_88 = arith.constant 0 : index
    %301 = vector.load %arg7[%c0_87, %c0_88] : memref<8x128xf32, #tpu.memory_space<vmem>>, vector<8x128xf32>
    tpu.vector_store %arg7[%c0_87, %c0_88], %294 {strides = array<i32>} : memref<8x128xf32, #tpu.memory_space<vmem>>, vector<8x128xf32>,
    %c0_89 = arith.constant 0 : index
    %c0_90 = arith.constant 0 : index
    %302 = vector.load %arg5[%c0_89, %c0_90] : memref<64x128xbf16, #tpu.memory_space<vmem>>, vector<64x128xbf16>
    %303 = arith.extf %302 : vector<64x128xbf16> to vector<64x128xf32>
    %304 = math.tanh %303 : vector<64x128xf32>
    %305 = arith.truncf %304 : vector<64x128xf32> to vector<64x128xbf16>
    %c0_91 = arith.constant 0 : index
    %c0_92 = arith.constant 0 : index
    %306 = vector.load %arg5[%c0_91, %c0_92] : memref<64x128xbf16, #tpu.memory_space<vmem>>, vector<64x128xbf16>
    tpu.vector_store %arg5[%c0_91, %c0_92], %305 {strides = array<i32>} : memref<64x128xbf16, #tpu.memory_space<vmem>>, vector<64x128xbf16>,
    return
  }
  func.func @transform_0(%arg0: i32) -> (i32, i32) {
    %c0_i32 = arith.constant 0 : i32
    %c0_i32_0 = arith.constant 0 : i32
    return %arg0, %c0_i32 : i32, i32
  }
  func.func @transform_1(%arg0: i32) -> (i32, i32) {
    %c0_i32 = arith.constant 0 : i32
    %c0_i32_0 = arith.constant 0 : i32
    %c0_i32_1 = arith.constant 0 : i32
    return %c0_i32, %c0_i32_0 : i32, i32
  }
  func.func @transform_2(%arg0: i32) -> (i32, i32) {
    %c0_i32 = arith.constant 0 : i32
    %c0_i32_0 = arith.constant 0 : i32
    %c0_i32_1 = arith.constant 0 : i32
    return %c0_i32, %c0_i32_0 : i32, i32
  }
  func.func @transform_3(%arg0: i32) -> (i32, i32) {
    %c0_i32 = arith.constant 0 : i32
    %c0_i32_0 = arith.constant 0 : i32
    %c0_i32_1 = arith.constant 0 : i32
    return %c0_i32, %c0_i32_0 : i32, i32
  }
  func.func @transform_4(%arg0: i32) -> (i32, i32) {
    %c0_i32 = arith.constant 0 : i32
    %c0_i32_0 = arith.constant 0 : i32
    return %arg0, %c0_i32 : i32, i32
  }
}

module attributes {stable_mosaic.version = 11 : i64} {
  func.func @lstm_last_kernel(%arg0: i32, %arg1: memref<64x128xbf16, #tpu.memory_space<vmem>>, %arg2: memref<128x512xbf16, #tpu.memory_space<vmem>>, %arg3: memref<128x512xbf16, #tpu.memory_space<vmem>>, %arg4: memref<1x512xf32, #tpu.memory_space<vmem>>, %arg5: memref<128x1xf32, #tpu.memory_space<vmem>>, %arg6: memref<1x1xf32, #tpu.memory_space<vmem>>, %arg7: memref<8x1xf32, #tpu.memory_space<vmem>>, %arg8: memref<8x128xf32, #tpu.memory_space<vmem>>, %arg9: memref<8x128xf32, #tpu.memory_space<vmem>>, %arg10: memref<64x512xf32, #tpu.memory_space<vmem>>) attributes {dimension_semantics = [#tpu.dimension_semantics<arbitrary>], iteration_bounds = array<i64: 1>, scalar_prefetch = 0 : i64, scratch_operands = 3 : i64, tpu.core_type = #tpu.core_type<tc>, window_params = [{transform_indices = @transform_0, window_bounds = array<i64: 64, 128>}, {pipeline_mode = #tpu.pipeline_mode<synchronous>, transform_indices = @transform_1, window_bounds = array<i64: 128, 512>}, {pipeline_mode = #tpu.pipeline_mode<synchronous>, transform_indices = @transform_2, window_bounds = array<i64: 128, 512>}, {pipeline_mode = #tpu.pipeline_mode<synchronous>, transform_indices = @transform_3, window_bounds = array<i64: 1, 512>}, {pipeline_mode = #tpu.pipeline_mode<synchronous>, transform_indices = @transform_4, window_bounds = array<i64: 128, 1>}, {pipeline_mode = #tpu.pipeline_mode<synchronous>, transform_indices = @transform_5, window_bounds = array<i64: 1, 1>}, {pipeline_mode = #tpu.pipeline_mode<synchronous>, transform_indices = @transform_6, window_bounds = array<i64: 8, 1>}]} {
    %c0_i32 = arith.constant 0 : i32
    %0 = arith.cmpi eq, %arg0, %c0_i32 : i32
    %1 = arith.extui %0 : i1 to i32
    %c0_i32_0 = arith.constant 0 : i32
    %2 = arith.cmpi ne, %1, %c0_i32_0 : i32
    scf.if %2 {
      %cst_83 = arith.constant 0.000000e+00 : f32
      %281 = vector.broadcast %cst_83 : f32 to vector<8x128xf32>
      %c0_84 = arith.constant 0 : index
      %c0_85 = arith.constant 0 : index
      %282 = vector.load %arg8[%c0_84, %c0_85] : memref<8x128xf32, #tpu.memory_space<vmem>>, vector<8x128xf32>
      tpu.vector_store %arg8[%c0_84, %c0_85], %281 {strides = array<i32>} : memref<8x128xf32, #tpu.memory_space<vmem>>, vector<8x128xf32>,
      %cst_86 = arith.constant 0.000000e+00 : f32
      %283 = vector.broadcast %cst_86 : f32 to vector<8x128xf32>
      %c0_87 = arith.constant 0 : index
      %c0_88 = arith.constant 0 : index
      %284 = vector.load %arg9[%c0_87, %c0_88] : memref<8x128xf32, #tpu.memory_space<vmem>>, vector<8x128xf32>
      tpu.vector_store %arg9[%c0_87, %c0_88], %283 {strides = array<i32>} : memref<8x128xf32, #tpu.memory_space<vmem>>, vector<8x128xf32>,
    } else {
    }
    %c0 = arith.constant 0 : index
    %c0_1 = arith.constant 0 : index
    %3 = vector.load %arg1[%c0, %c0_1] : memref<64x128xbf16, #tpu.memory_space<vmem>>, vector<64x128xbf16>
    %c0_2 = arith.constant 0 : index
    %c0_3 = arith.constant 0 : index
    %4 = vector.load %arg2[%c0_2, %c0_3] : memref<128x512xbf16, #tpu.memory_space<vmem>>, vector<128x512xbf16>
    %cst = arith.constant dense<0.000000e+00> : vector<64x512xf32>
    %5 = tpu.matmul %3, %4, %cst {dimension_numbers = #tpu.dot_dimension_numbers<[1], [0], [0], [1], [0, 0, 1, 1], [], []>} : vector<64x128xbf16>, vector<128x512xbf16>, vector<64x512xf32> -> vector<64x512xf32>
    %c0_4 = arith.constant 0 : index
    %c0_5 = arith.constant 0 : index
    %6 = vector.load %arg4[%c0_4, %c0_5] : memref<1x512xf32, #tpu.memory_space<vmem>>, vector<1x512xf32>
    %7 = vector.broadcast %6 : vector<1x512xf32> to vector<64x512xf32>
    %8 = arith.addf %5, %7 : vector<64x512xf32>
    %c0_6 = arith.constant 0 : index
    %c0_7 = arith.constant 0 : index
    %9 = vector.load %arg10[%c0_6, %c0_7] : memref<64x512xf32, #tpu.memory_space<vmem>>, vector<64x512xf32>
    tpu.vector_store %arg10[%c0_6, %c0_7], %8 {strides = array<i32>} : memref<64x512xf32, #tpu.memory_space<vmem>>, vector<64x512xf32>,
    %c0_8 = arith.constant 0 : index
    %c0_9 = arith.constant 0 : index
    %10 = vector.load %arg8[%c0_8, %c0_9] : memref<8x128xf32, #tpu.memory_space<vmem>>, vector<8x128xf32>
    %c0_10 = arith.constant 0 : index
    %c0_11 = arith.constant 0 : index
    %11 = vector.load %arg9[%c0_10, %c0_11] : memref<8x128xf32, #tpu.memory_space<vmem>>, vector<8x128xf32>
    %c0_i32_12 = arith.constant 0 : i32
    %c8_i32 = arith.constant 8 : i32
    %12 = arith.muli %c0_i32_12, %c8_i32 : i32
    %13 = tpu.assume_multiple %12, 8 : i32
    %14 = arith.index_cast %13 : i32 to index
    %c0_13 = arith.constant 0 : index
    %15 = vector.load %arg10[%14, %c0_13] : memref<64x512xf32, #tpu.memory_space<vmem>>, vector<8x512xf32>
    %16 = arith.truncf %10 : vector<8x128xf32> to vector<8x128xbf16>
    %c0_14 = arith.constant 0 : index
    %c0_15 = arith.constant 0 : index
    %17 = vector.load %arg3[%c0_14, %c0_15] : memref<128x512xbf16, #tpu.memory_space<vmem>>, vector<128x512xbf16>
    %cst_16 = arith.constant dense<0.000000e+00> : vector<8x512xf32>
    %18 = tpu.matmul %16, %17, %cst_16 {dimension_numbers = #tpu.dot_dimension_numbers<[1], [0], [0], [1], [0, 0, 1, 1], [], []>} : vector<8x128xbf16>, vector<128x512xbf16>, vector<8x512xf32> -> vector<8x512xf32>
    %19 = arith.addf %15, %18 : vector<8x512xf32>
    %20 = vector.extract_strided_slice %19 {offsets = [0, 0], sizes = [8, 128], strides = [1, 1]} : vector<8x512xf32> to vector<8x128xf32>
    %21 = arith.negf %20 : vector<8x128xf32>
    %22 = math.exp %21 : vector<8x128xf32>
    %cst_17 = arith.constant 1.000000e+00 : f32
    %23 = vector.broadcast %cst_17 : f32 to vector<8x128xf32>
    %24 = arith.addf %23, %22 : vector<8x128xf32>
    %25 = arith.divf %23, %24 : vector<8x128xf32>
    %26 = vector.extract_strided_slice %19 {offsets = [0, 128], sizes = [8, 128], strides = [1, 1]} : vector<8x512xf32> to vector<8x128xf32>
    %27 = arith.negf %26 : vector<8x128xf32>
    %28 = math.exp %27 : vector<8x128xf32>
    %cst_18 = arith.constant 1.000000e+00 : f32
    %29 = vector.broadcast %cst_18 : f32 to vector<8x128xf32>
    %30 = arith.addf %29, %28 : vector<8x128xf32>
    %31 = arith.divf %29, %30 : vector<8x128xf32>
    %32 = vector.extract_strided_slice %19 {offsets = [0, 256], sizes = [8, 128], strides = [1, 1]} : vector<8x512xf32> to vector<8x128xf32>
    %33 = math.tanh %32 : vector<8x128xf32>
    %34 = vector.extract_strided_slice %19 {offsets = [0, 384], sizes = [8, 128], strides = [1, 1]} : vector<8x512xf32> to vector<8x128xf32>
    %35 = arith.negf %34 : vector<8x128xf32>
    %36 = math.exp %35 : vector<8x128xf32>
    %cst_19 = arith.constant 1.000000e+00 : f32
    %37 = vector.broadcast %cst_19 : f32 to vector<8x128xf32>
    %38 = arith.addf %37, %36 : vector<8x128xf32>
    %39 = arith.divf %37, %38 : vector<8x128xf32>
    %40 = arith.mulf %31, %11 : vector<8x128xf32>
    %41 = arith.mulf %25, %33 : vector<8x128xf32>
    %42 = arith.addf %40, %41 : vector<8x128xf32>
    %43 = math.tanh %42 : vector<8x128xf32>
    %44 = arith.mulf %39, %43 : vector<8x128xf32>
    %c1_i32 = arith.constant 1 : i32
    %c8_i32_20 = arith.constant 8 : i32
    %45 = arith.muli %c1_i32, %c8_i32_20 : i32
    %46 = tpu.assume_multiple %45, 8 : i32
    %47 = arith.index_cast %46 : i32 to index
    %c0_21 = arith.constant 0 : index
    %48 = vector.load %arg10[%47, %c0_21] : memref<64x512xf32, #tpu.memory_space<vmem>>, vector<8x512xf32>
    %49 = arith.truncf %44 : vector<8x128xf32> to vector<8x128xbf16>
    %c0_22 = arith.constant 0 : index
    %c0_23 = arith.constant 0 : index
    %50 = vector.load %arg3[%c0_22, %c0_23] : memref<128x512xbf16, #tpu.memory_space<vmem>>, vector<128x512xbf16>
    %cst_24 = arith.constant dense<0.000000e+00> : vector<8x512xf32>
    %51 = tpu.matmul %49, %50, %cst_24 {dimension_numbers = #tpu.dot_dimension_numbers<[1], [0], [0], [1], [0, 0, 1, 1], [], []>} : vector<8x128xbf16>, vector<128x512xbf16>, vector<8x512xf32> -> vector<8x512xf32>
    %52 = arith.addf %48, %51 : vector<8x512xf32>
    %53 = vector.extract_strided_slice %52 {offsets = [0, 0], sizes = [8, 128], strides = [1, 1]} : vector<8x512xf32> to vector<8x128xf32>
    %54 = arith.negf %53 : vector<8x128xf32>
    %55 = math.exp %54 : vector<8x128xf32>
    %cst_25 = arith.constant 1.000000e+00 : f32
    %56 = vector.broadcast %cst_25 : f32 to vector<8x128xf32>
    %57 = arith.addf %56, %55 : vector<8x128xf32>
    %58 = arith.divf %56, %57 : vector<8x128xf32>
    %59 = vector.extract_strided_slice %52 {offsets = [0, 128], sizes = [8, 128], strides = [1, 1]} : vector<8x512xf32> to vector<8x128xf32>
    %60 = arith.negf %59 : vector<8x128xf32>
    %61 = math.exp %60 : vector<8x128xf32>
    %cst_26 = arith.constant 1.000000e+00 : f32
    %62 = vector.broadcast %cst_26 : f32 to vector<8x128xf32>
    %63 = arith.addf %62, %61 : vector<8x128xf32>
    %64 = arith.divf %62, %63 : vector<8x128xf32>
    %65 = vector.extract_strided_slice %52 {offsets = [0, 256], sizes = [8, 128], strides = [1, 1]} : vector<8x512xf32> to vector<8x128xf32>
    %66 = math.tanh %65 : vector<8x128xf32>
    %67 = vector.extract_strided_slice %52 {offsets = [0, 384], sizes = [8, 128], strides = [1, 1]} : vector<8x512xf32> to vector<8x128xf32>
    %68 = arith.negf %67 : vector<8x128xf32>
    %69 = math.exp %68 : vector<8x128xf32>
    %cst_27 = arith.constant 1.000000e+00 : f32
    %70 = vector.broadcast %cst_27 : f32 to vector<8x128xf32>
    %71 = arith.addf %70, %69 : vector<8x128xf32>
    %72 = arith.divf %70, %71 : vector<8x128xf32>
    %73 = arith.mulf %64, %42 : vector<8x128xf32>
    %74 = arith.mulf %58, %66 : vector<8x128xf32>
    %75 = arith.addf %73, %74 : vector<8x128xf32>
    %76 = math.tanh %75 : vector<8x128xf32>
    %77 = arith.mulf %72, %76 : vector<8x128xf32>
    %c2_i32 = arith.constant 2 : i32
    %c8_i32_28 = arith.constant 8 : i32
    %78 = arith.muli %c2_i32, %c8_i32_28 : i32
    %79 = tpu.assume_multiple %78, 8 : i32
    %80 = arith.index_cast %79 : i32 to index
    %c0_29 = arith.constant 0 : index
    %81 = vector.load %arg10[%80, %c0_29] : memref<64x512xf32, #tpu.memory_space<vmem>>, vector<8x512xf32>
    %82 = arith.truncf %77 : vector<8x128xf32> to vector<8x128xbf16>
    %c0_30 = arith.constant 0 : index
    %c0_31 = arith.constant 0 : index
    %83 = vector.load %arg3[%c0_30, %c0_31] : memref<128x512xbf16, #tpu.memory_space<vmem>>, vector<128x512xbf16>
    %cst_32 = arith.constant dense<0.000000e+00> : vector<8x512xf32>
    %84 = tpu.matmul %82, %83, %cst_32 {dimension_numbers = #tpu.dot_dimension_numbers<[1], [0], [0], [1], [0, 0, 1, 1], [], []>} : vector<8x128xbf16>, vector<128x512xbf16>, vector<8x512xf32> -> vector<8x512xf32>
    %85 = arith.addf %81, %84 : vector<8x512xf32>
    %86 = vector.extract_strided_slice %85 {offsets = [0, 0], sizes = [8, 128], strides = [1, 1]} : vector<8x512xf32> to vector<8x128xf32>
    %87 = arith.negf %86 : vector<8x128xf32>
    %88 = math.exp %87 : vector<8x128xf32>
    %cst_33 = arith.constant 1.000000e+00 : f32
    %89 = vector.broadcast %cst_33 : f32 to vector<8x128xf32>
    %90 = arith.addf %89, %88 : vector<8x128xf32>
    %91 = arith.divf %89, %90 : vector<8x128xf32>
    %92 = vector.extract_strided_slice %85 {offsets = [0, 128], sizes = [8, 128], strides = [1, 1]} : vector<8x512xf32> to vector<8x128xf32>
    %93 = arith.negf %92 : vector<8x128xf32>
    %94 = math.exp %93 : vector<8x128xf32>
    %cst_34 = arith.constant 1.000000e+00 : f32
    %95 = vector.broadcast %cst_34 : f32 to vector<8x128xf32>
    %96 = arith.addf %95, %94 : vector<8x128xf32>
    %97 = arith.divf %95, %96 : vector<8x128xf32>
    %98 = vector.extract_strided_slice %85 {offsets = [0, 256], sizes = [8, 128], strides = [1, 1]} : vector<8x512xf32> to vector<8x128xf32>
    %99 = math.tanh %98 : vector<8x128xf32>
    %100 = vector.extract_strided_slice %85 {offsets = [0, 384], sizes = [8, 128], strides = [1, 1]} : vector<8x512xf32> to vector<8x128xf32>
    %101 = arith.negf %100 : vector<8x128xf32>
    %102 = math.exp %101 : vector<8x128xf32>
    %cst_35 = arith.constant 1.000000e+00 : f32
    %103 = vector.broadcast %cst_35 : f32 to vector<8x128xf32>
    %104 = arith.addf %103, %102 : vector<8x128xf32>
    %105 = arith.divf %103, %104 : vector<8x128xf32>
    %106 = arith.mulf %97, %75 : vector<8x128xf32>
    %107 = arith.mulf %91, %99 : vector<8x128xf32>
    %108 = arith.addf %106, %107 : vector<8x128xf32>
    %109 = math.tanh %108 : vector<8x128xf32>
    %110 = arith.mulf %105, %109 : vector<8x128xf32>
    %c3_i32 = arith.constant 3 : i32
    %c8_i32_36 = arith.constant 8 : i32
    %111 = arith.muli %c3_i32, %c8_i32_36 : i32
    %112 = tpu.assume_multiple %111, 8 : i32
    %113 = arith.index_cast %112 : i32 to index
    %c0_37 = arith.constant 0 : index
    %114 = vector.load %arg10[%113, %c0_37] : memref<64x512xf32, #tpu.memory_space<vmem>>, vector<8x512xf32>
    %115 = arith.truncf %110 : vector<8x128xf32> to vector<8x128xbf16>
    %c0_38 = arith.constant 0 : index
    %c0_39 = arith.constant 0 : index
    %116 = vector.load %arg3[%c0_38, %c0_39] : memref<128x512xbf16, #tpu.memory_space<vmem>>, vector<128x512xbf16>
    %cst_40 = arith.constant dense<0.000000e+00> : vector<8x512xf32>
    %117 = tpu.matmul %115, %116, %cst_40 {dimension_numbers = #tpu.dot_dimension_numbers<[1], [0], [0], [1], [0, 0, 1, 1], [], []>} : vector<8x128xbf16>, vector<128x512xbf16>, vector<8x512xf32> -> vector<8x512xf32>
    %118 = arith.addf %114, %117 : vector<8x512xf32>
    %119 = vector.extract_strided_slice %118 {offsets = [0, 0], sizes = [8, 128], strides = [1, 1]} : vector<8x512xf32> to vector<8x128xf32>
    %120 = arith.negf %119 : vector<8x128xf32>
    %121 = math.exp %120 : vector<8x128xf32>
    %cst_41 = arith.constant 1.000000e+00 : f32
    %122 = vector.broadcast %cst_41 : f32 to vector<8x128xf32>
    %123 = arith.addf %122, %121 : vector<8x128xf32>
    %124 = arith.divf %122, %123 : vector<8x128xf32>
    %125 = vector.extract_strided_slice %118 {offsets = [0, 128], sizes = [8, 128], strides = [1, 1]} : vector<8x512xf32> to vector<8x128xf32>
    %126 = arith.negf %125 : vector<8x128xf32>
    %127 = math.exp %126 : vector<8x128xf32>
    %cst_42 = arith.constant 1.000000e+00 : f32
    %128 = vector.broadcast %cst_42 : f32 to vector<8x128xf32>
    %129 = arith.addf %128, %127 : vector<8x128xf32>
    %130 = arith.divf %128, %129 : vector<8x128xf32>
    %131 = vector.extract_strided_slice %118 {offsets = [0, 256], sizes = [8, 128], strides = [1, 1]} : vector<8x512xf32> to vector<8x128xf32>
    %132 = math.tanh %131 : vector<8x128xf32>
    %133 = vector.extract_strided_slice %118 {offsets = [0, 384], sizes = [8, 128], strides = [1, 1]} : vector<8x512xf32> to vector<8x128xf32>
    %134 = arith.negf %133 : vector<8x128xf32>
    %135 = math.exp %134 : vector<8x128xf32>
    %cst_43 = arith.constant 1.000000e+00 : f32
    %136 = vector.broadcast %cst_43 : f32 to vector<8x128xf32>
    %137 = arith.addf %136, %135 : vector<8x128xf32>
    %138 = arith.divf %136, %137 : vector<8x128xf32>
    %139 = arith.mulf %130, %108 : vector<8x128xf32>
    %140 = arith.mulf %124, %132 : vector<8x128xf32>
    %141 = arith.addf %139, %140 : vector<8x128xf32>
    %142 = math.tanh %141 : vector<8x128xf32>
    %143 = arith.mulf %138, %142 : vector<8x128xf32>
    %c4_i32 = arith.constant 4 : i32
    %c8_i32_44 = arith.constant 8 : i32
    %144 = arith.muli %c4_i32, %c8_i32_44 : i32
    %145 = tpu.assume_multiple %144, 8 : i32
    %146 = arith.index_cast %145 : i32 to index
    %c0_45 = arith.constant 0 : index
    %147 = vector.load %arg10[%146, %c0_45] : memref<64x512xf32, #tpu.memory_space<vmem>>, vector<8x512xf32>
    %148 = arith.truncf %143 : vector<8x128xf32> to vector<8x128xbf16>
    %c0_46 = arith.constant 0 : index
    %c0_47 = arith.constant 0 : index
    %149 = vector.load %arg3[%c0_46, %c0_47] : memref<128x512xbf16, #tpu.memory_space<vmem>>, vector<128x512xbf16>
    %cst_48 = arith.constant dense<0.000000e+00> : vector<8x512xf32>
    %150 = tpu.matmul %148, %149, %cst_48 {dimension_numbers = #tpu.dot_dimension_numbers<[1], [0], [0], [1], [0, 0, 1, 1], [], []>} : vector<8x128xbf16>, vector<128x512xbf16>, vector<8x512xf32> -> vector<8x512xf32>
    %151 = arith.addf %147, %150 : vector<8x512xf32>
    %152 = vector.extract_strided_slice %151 {offsets = [0, 0], sizes = [8, 128], strides = [1, 1]} : vector<8x512xf32> to vector<8x128xf32>
    %153 = arith.negf %152 : vector<8x128xf32>
    %154 = math.exp %153 : vector<8x128xf32>
    %cst_49 = arith.constant 1.000000e+00 : f32
    %155 = vector.broadcast %cst_49 : f32 to vector<8x128xf32>
    %156 = arith.addf %155, %154 : vector<8x128xf32>
    %157 = arith.divf %155, %156 : vector<8x128xf32>
    %158 = vector.extract_strided_slice %151 {offsets = [0, 128], sizes = [8, 128], strides = [1, 1]} : vector<8x512xf32> to vector<8x128xf32>
    %159 = arith.negf %158 : vector<8x128xf32>
    %160 = math.exp %159 : vector<8x128xf32>
    %cst_50 = arith.constant 1.000000e+00 : f32
    %161 = vector.broadcast %cst_50 : f32 to vector<8x128xf32>
    %162 = arith.addf %161, %160 : vector<8x128xf32>
    %163 = arith.divf %161, %162 : vector<8x128xf32>
    %164 = vector.extract_strided_slice %151 {offsets = [0, 256], sizes = [8, 128], strides = [1, 1]} : vector<8x512xf32> to vector<8x128xf32>
    %165 = math.tanh %164 : vector<8x128xf32>
    %166 = vector.extract_strided_slice %151 {offsets = [0, 384], sizes = [8, 128], strides = [1, 1]} : vector<8x512xf32> to vector<8x128xf32>
    %167 = arith.negf %166 : vector<8x128xf32>
    %168 = math.exp %167 : vector<8x128xf32>
    %cst_51 = arith.constant 1.000000e+00 : f32
    %169 = vector.broadcast %cst_51 : f32 to vector<8x128xf32>
    %170 = arith.addf %169, %168 : vector<8x128xf32>
    %171 = arith.divf %169, %170 : vector<8x128xf32>
    %172 = arith.mulf %163, %141 : vector<8x128xf32>
    %173 = arith.mulf %157, %165 : vector<8x128xf32>
    %174 = arith.addf %172, %173 : vector<8x128xf32>
    %175 = math.tanh %174 : vector<8x128xf32>
    %176 = arith.mulf %171, %175 : vector<8x128xf32>
    %c5_i32 = arith.constant 5 : i32
    %c8_i32_52 = arith.constant 8 : i32
    %177 = arith.muli %c5_i32, %c8_i32_52 : i32
    %178 = tpu.assume_multiple %177, 8 : i32
    %179 = arith.index_cast %178 : i32 to index
    %c0_53 = arith.constant 0 : index
    %180 = vector.load %arg10[%179, %c0_53] : memref<64x512xf32, #tpu.memory_space<vmem>>, vector<8x512xf32>
    %181 = arith.truncf %176 : vector<8x128xf32> to vector<8x128xbf16>
    %c0_54 = arith.constant 0 : index
    %c0_55 = arith.constant 0 : index
    %182 = vector.load %arg3[%c0_54, %c0_55] : memref<128x512xbf16, #tpu.memory_space<vmem>>, vector<128x512xbf16>
    %cst_56 = arith.constant dense<0.000000e+00> : vector<8x512xf32>
    %183 = tpu.matmul %181, %182, %cst_56 {dimension_numbers = #tpu.dot_dimension_numbers<[1], [0], [0], [1], [0, 0, 1, 1], [], []>} : vector<8x128xbf16>, vector<128x512xbf16>, vector<8x512xf32> -> vector<8x512xf32>
    %184 = arith.addf %180, %183 : vector<8x512xf32>
    %185 = vector.extract_strided_slice %184 {offsets = [0, 0], sizes = [8, 128], strides = [1, 1]} : vector<8x512xf32> to vector<8x128xf32>
    %186 = arith.negf %185 : vector<8x128xf32>
    %187 = math.exp %186 : vector<8x128xf32>
    %cst_57 = arith.constant 1.000000e+00 : f32
    %188 = vector.broadcast %cst_57 : f32 to vector<8x128xf32>
    %189 = arith.addf %188, %187 : vector<8x128xf32>
    %190 = arith.divf %188, %189 : vector<8x128xf32>
    %191 = vector.extract_strided_slice %184 {offsets = [0, 128], sizes = [8, 128], strides = [1, 1]} : vector<8x512xf32> to vector<8x128xf32>
    %192 = arith.negf %191 : vector<8x128xf32>
    %193 = math.exp %192 : vector<8x128xf32>
    %cst_58 = arith.constant 1.000000e+00 : f32
    %194 = vector.broadcast %cst_58 : f32 to vector<8x128xf32>
    %195 = arith.addf %194, %193 : vector<8x128xf32>
    %196 = arith.divf %194, %195 : vector<8x128xf32>
    %197 = vector.extract_strided_slice %184 {offsets = [0, 256], sizes = [8, 128], strides = [1, 1]} : vector<8x512xf32> to vector<8x128xf32>
    %198 = math.tanh %197 : vector<8x128xf32>
    %199 = vector.extract_strided_slice %184 {offsets = [0, 384], sizes = [8, 128], strides = [1, 1]} : vector<8x512xf32> to vector<8x128xf32>
    %200 = arith.negf %199 : vector<8x128xf32>
    %201 = math.exp %200 : vector<8x128xf32>
    %cst_59 = arith.constant 1.000000e+00 : f32
    %202 = vector.broadcast %cst_59 : f32 to vector<8x128xf32>
    %203 = arith.addf %202, %201 : vector<8x128xf32>
    %204 = arith.divf %202, %203 : vector<8x128xf32>
    %205 = arith.mulf %196, %174 : vector<8x128xf32>
    %206 = arith.mulf %190, %198 : vector<8x128xf32>
    %207 = arith.addf %205, %206 : vector<8x128xf32>
    %208 = math.tanh %207 : vector<8x128xf32>
    %209 = arith.mulf %204, %208 : vector<8x128xf32>
    %c6_i32 = arith.constant 6 : i32
    %c8_i32_60 = arith.constant 8 : i32
    %210 = arith.muli %c6_i32, %c8_i32_60 : i32
    %211 = tpu.assume_multiple %210, 8 : i32
    %212 = arith.index_cast %211 : i32 to index
    %c0_61 = arith.constant 0 : index
    %213 = vector.load %arg10[%212, %c0_61] : memref<64x512xf32, #tpu.memory_space<vmem>>, vector<8x512xf32>
    %214 = arith.truncf %209 : vector<8x128xf32> to vector<8x128xbf16>
    %c0_62 = arith.constant 0 : index
    %c0_63 = arith.constant 0 : index
    %215 = vector.load %arg3[%c0_62, %c0_63] : memref<128x512xbf16, #tpu.memory_space<vmem>>, vector<128x512xbf16>
    %cst_64 = arith.constant dense<0.000000e+00> : vector<8x512xf32>
    %216 = tpu.matmul %214, %215, %cst_64 {dimension_numbers = #tpu.dot_dimension_numbers<[1], [0], [0], [1], [0, 0, 1, 1], [], []>} : vector<8x128xbf16>, vector<128x512xbf16>, vector<8x512xf32> -> vector<8x512xf32>
    %217 = arith.addf %213, %216 : vector<8x512xf32>
    %218 = vector.extract_strided_slice %217 {offsets = [0, 0], sizes = [8, 128], strides = [1, 1]} : vector<8x512xf32> to vector<8x128xf32>
    %219 = arith.negf %218 : vector<8x128xf32>
    %220 = math.exp %219 : vector<8x128xf32>
    %cst_65 = arith.constant 1.000000e+00 : f32
    %221 = vector.broadcast %cst_65 : f32 to vector<8x128xf32>
    %222 = arith.addf %221, %220 : vector<8x128xf32>
    %223 = arith.divf %221, %222 : vector<8x128xf32>
    %224 = vector.extract_strided_slice %217 {offsets = [0, 128], sizes = [8, 128], strides = [1, 1]} : vector<8x512xf32> to vector<8x128xf32>
    %225 = arith.negf %224 : vector<8x128xf32>
    %226 = math.exp %225 : vector<8x128xf32>
    %cst_66 = arith.constant 1.000000e+00 : f32
    %227 = vector.broadcast %cst_66 : f32 to vector<8x128xf32>
    %228 = arith.addf %227, %226 : vector<8x128xf32>
    %229 = arith.divf %227, %228 : vector<8x128xf32>
    %230 = vector.extract_strided_slice %217 {offsets = [0, 256], sizes = [8, 128], strides = [1, 1]} : vector<8x512xf32> to vector<8x128xf32>
    %231 = math.tanh %230 : vector<8x128xf32>
    %232 = vector.extract_strided_slice %217 {offsets = [0, 384], sizes = [8, 128], strides = [1, 1]} : vector<8x512xf32> to vector<8x128xf32>
    %233 = arith.negf %232 : vector<8x128xf32>
    %234 = math.exp %233 : vector<8x128xf32>
    %cst_67 = arith.constant 1.000000e+00 : f32
    %235 = vector.broadcast %cst_67 : f32 to vector<8x128xf32>
    %236 = arith.addf %235, %234 : vector<8x128xf32>
    %237 = arith.divf %235, %236 : vector<8x128xf32>
    %238 = arith.mulf %229, %207 : vector<8x128xf32>
    %239 = arith.mulf %223, %231 : vector<8x128xf32>
    %240 = arith.addf %238, %239 : vector<8x128xf32>
    %241 = math.tanh %240 : vector<8x128xf32>
    %242 = arith.mulf %237, %241 : vector<8x128xf32>
    %c7_i32 = arith.constant 7 : i32
    %c8_i32_68 = arith.constant 8 : i32
    %243 = arith.muli %c7_i32, %c8_i32_68 : i32
    %244 = tpu.assume_multiple %243, 8 : i32
    %245 = arith.index_cast %244 : i32 to index
    %c0_69 = arith.constant 0 : index
    %246 = vector.load %arg10[%245, %c0_69] : memref<64x512xf32, #tpu.memory_space<vmem>>, vector<8x512xf32>
    %247 = arith.truncf %242 : vector<8x128xf32> to vector<8x128xbf16>
    %c0_70 = arith.constant 0 : index
    %c0_71 = arith.constant 0 : index
    %248 = vector.load %arg3[%c0_70, %c0_71] : memref<128x512xbf16, #tpu.memory_space<vmem>>, vector<128x512xbf16>
    %cst_72 = arith.constant dense<0.000000e+00> : vector<8x512xf32>
    %249 = tpu.matmul %247, %248, %cst_72 {dimension_numbers = #tpu.dot_dimension_numbers<[1], [0], [0], [1], [0, 0, 1, 1], [], []>} : vector<8x128xbf16>, vector<128x512xbf16>, vector<8x512xf32> -> vector<8x512xf32>
    %250 = arith.addf %246, %249 : vector<8x512xf32>
    %251 = vector.extract_strided_slice %250 {offsets = [0, 0], sizes = [8, 128], strides = [1, 1]} : vector<8x512xf32> to vector<8x128xf32>
    %252 = arith.negf %251 : vector<8x128xf32>
    %253 = math.exp %252 : vector<8x128xf32>
    %cst_73 = arith.constant 1.000000e+00 : f32
    %254 = vector.broadcast %cst_73 : f32 to vector<8x128xf32>
    %255 = arith.addf %254, %253 : vector<8x128xf32>
    %256 = arith.divf %254, %255 : vector<8x128xf32>
    %257 = vector.extract_strided_slice %250 {offsets = [0, 128], sizes = [8, 128], strides = [1, 1]} : vector<8x512xf32> to vector<8x128xf32>
    %258 = arith.negf %257 : vector<8x128xf32>
    %259 = math.exp %258 : vector<8x128xf32>
    %cst_74 = arith.constant 1.000000e+00 : f32
    %260 = vector.broadcast %cst_74 : f32 to vector<8x128xf32>
    %261 = arith.addf %260, %259 : vector<8x128xf32>
    %262 = arith.divf %260, %261 : vector<8x128xf32>
    %263 = vector.extract_strided_slice %250 {offsets = [0, 256], sizes = [8, 128], strides = [1, 1]} : vector<8x512xf32> to vector<8x128xf32>
    %264 = math.tanh %263 : vector<8x128xf32>
    %265 = vector.extract_strided_slice %250 {offsets = [0, 384], sizes = [8, 128], strides = [1, 1]} : vector<8x512xf32> to vector<8x128xf32>
    %266 = arith.negf %265 : vector<8x128xf32>
    %267 = math.exp %266 : vector<8x128xf32>
    %cst_75 = arith.constant 1.000000e+00 : f32
    %268 = vector.broadcast %cst_75 : f32 to vector<8x128xf32>
    %269 = arith.addf %268, %267 : vector<8x128xf32>
    %270 = arith.divf %268, %269 : vector<8x128xf32>
    %271 = arith.mulf %262, %240 : vector<8x128xf32>
    %272 = arith.mulf %256, %264 : vector<8x128xf32>
    %273 = arith.addf %271, %272 : vector<8x128xf32>
    %274 = math.tanh %273 : vector<8x128xf32>
    %275 = arith.mulf %270, %274 : vector<8x128xf32>
    %c8_i32_76 = arith.constant 8 : i32
    %c0_77 = arith.constant 0 : index
    %c0_78 = arith.constant 0 : index
    %276 = vector.load %arg8[%c0_77, %c0_78] : memref<8x128xf32, #tpu.memory_space<vmem>>, vector<8x128xf32>
    tpu.vector_store %arg8[%c0_77, %c0_78], %275 {strides = array<i32>} : memref<8x128xf32, #tpu.memory_space<vmem>>, vector<8x128xf32>,
    %c0_79 = arith.constant 0 : index
    %c0_80 = arith.constant 0 : index
    %277 = vector.load %arg9[%c0_79, %c0_80] : memref<8x128xf32, #tpu.memory_space<vmem>>, vector<8x128xf32>
    tpu.vector_store %arg9[%c0_79, %c0_80], %273 {strides = array<i32>} : memref<8x128xf32, #tpu.memory_space<vmem>>, vector<8x128xf32>,
    %c0_i32_81 = arith.constant 0 : i32
    %278 = arith.cmpi eq, %arg0, %c0_i32_81 : i32
    %279 = arith.extui %278 : i1 to i32
    %c0_i32_82 = arith.constant 0 : i32
    %280 = arith.cmpi ne, %279, %c0_i32_82 : i32
    scf.if %280 {
      %281 = math.tanh %275 : vector<8x128xf32>
      %c0_83 = arith.constant 0 : index
      %c0_84 = arith.constant 0 : index
      %282 = vector.load %arg5[%c0_83, %c0_84] : memref<128x1xf32, #tpu.memory_space<vmem>>, vector<128x1xf32>
      %cst_85 = arith.constant dense<0.000000e+00> : vector<8x1xf32>
      %283 = tpu.matmul %281, %282, %cst_85 {dimension_numbers = #tpu.dot_dimension_numbers<[1], [0], [0], [1], [0, 0, 1, 1], [], []>} : vector<8x128xf32>, vector<128x1xf32>, vector<8x1xf32> -> vector<8x1xf32>
      %c0_86 = arith.constant 0 : index
      %c0_87 = arith.constant 0 : index
      %284 = vector.load %arg6[%c0_86, %c0_87] : memref<1x1xf32, #tpu.memory_space<vmem>>, vector<1x1xf32>
      %285 = vector.broadcast %284 : vector<1x1xf32> to vector<8x1xf32>
      %286 = arith.addf %283, %285 : vector<8x1xf32>
      %287 = arith.negf %286 : vector<8x1xf32>
      %288 = math.exp %287 : vector<8x1xf32>
      %cst_88 = arith.constant 1.000000e+00 : f32
      %289 = vector.broadcast %cst_88 : f32 to vector<8x1xf32>
      %290 = arith.addf %289, %288 : vector<8x1xf32>
      %291 = arith.divf %289, %290 : vector<8x1xf32>
      %c0_89 = arith.constant 0 : index
      %c0_90 = arith.constant 0 : index
      %292 = vector.load %arg7[%c0_89, %c0_90] : memref<8x1xf32, #tpu.memory_space<vmem>>, vector<8x1xf32>
      tpu.vector_store %arg7[%c0_89, %c0_90], %291 {strides = array<i32>} : memref<8x1xf32, #tpu.memory_space<vmem>>, vector<8x1xf32>,
    } else {
    }
    return
  }
  func.func @transform_0(%arg0: i32) -> (i32, i32) {
    %c0_i32 = arith.constant 0 : i32
    %c0_i32_0 = arith.constant 0 : i32
    return %arg0, %c0_i32 : i32, i32
  }
  func.func @transform_1(%arg0: i32) -> (i32, i32) {
    %c0_i32 = arith.constant 0 : i32
    %c0_i32_0 = arith.constant 0 : i32
    %c0_i32_1 = arith.constant 0 : i32
    return %c0_i32, %c0_i32_0 : i32, i32
  }
  func.func @transform_2(%arg0: i32) -> (i32, i32) {
    %c0_i32 = arith.constant 0 : i32
    %c0_i32_0 = arith.constant 0 : i32
    %c0_i32_1 = arith.constant 0 : i32
    return %c0_i32, %c0_i32_0 : i32, i32
  }
  func.func @transform_3(%arg0: i32) -> (i32, i32) {
    %c0_i32 = arith.constant 0 : i32
    %c0_i32_0 = arith.constant 0 : i32
    %c0_i32_1 = arith.constant 0 : i32
    return %c0_i32, %c0_i32_0 : i32, i32
  }
  func.func @transform_4(%arg0: i32) -> (i32, i32) {
    %c0_i32 = arith.constant 0 : i32
    %c0_i32_0 = arith.constant 0 : i32
    %c0_i32_1 = arith.constant 0 : i32
    return %c0_i32, %c0_i32_0 : i32, i32
  }
  func.func @transform_5(%arg0: i32) -> (i32, i32) {
    %c0_i32 = arith.constant 0 : i32
    %c0_i32_0 = arith.constant 0 : i32
    %c0_i32_1 = arith.constant 0 : i32
    return %c0_i32, %c0_i32_0 : i32, i32
  }
  func.func @transform_6(%arg0: i32) -> (i32, i32) {
    %c0_i32 = arith.constant 0 : i32
    %c0_i32_0 = arith.constant 0 : i32
    %c0_i32_1 = arith.constant 0 : i32
    return %c0_i32, %c0_i32_0 : i32, i32
  }
}

</mosaic_0001>

<bundles_post_ra>
// kernel: _lambda_.3
= control target key start
LH: loop header
LB: loop body
LE: loop exit
PB: predicated region body
PF: predicated region fallthrough
CT: control target
= control target key end

     0   :  { %v3077_v1 = vmov 0   ;;  %vm2154_vm0 = vmmov 0   ;;  %vm1699_vm1 = vcmask 7168   ;;  %s3068_s1 = inlined_call_operand.vmem [shape: bf16[128,512], index: 1, kind: input, shape index: {}]   ;;  %s3069_s0 = inlined_call_operand.vmem [shape: bf16[64,128], index: 0, kind: input, shape index: {}]   ;;  %s3070_s2 = inlined_call_operand.vmem [shape: bf16[128,512], index: 2, kind: input, shape index: {}]   ;;  %s3071_s3 = inlined_call_operand.vmem [shape: f32[1,512], index: 3, kind: input, shape index: {}]   ;;  %s3072_s4 = inlined_call_operand.vmem [shape: f32[128,1], index: 4, kind: input, shape index: {}]   ;;  %s3073_s5 = inlined_call_operand.<no memory space> [shape: f32[1,1], index: 5, kind: input, shape index: {}]   ;;  %s3074_s6 = inlined_call_operand.vmem [shape: f32[8,1], index: 6, kind: output, shape index: {}]  }
   0x1   :  { %v1886_v0 = vld [vmem:[%s3068_s1 + $0x4] ss:$16 sps:$4 sm:$0xff]   ;;  %310 = vmatprep.mubr.bf16.mxu0 %v3077_v1  ;;  %383 = vmatprep.mubr.bf16.mxu1 %v3077_v1  ;;  %v1888_v2 = vld [vmem:[%s3068_s1 + $0xc] ss:$16 sps:$4 sm:$0xff]   ;;  %v1890_v3 = vld [vmem:[%s3068_s1] ss:$16 sps:$4 sm:$0xff]  }
   0x2   :  { %278 = vmatprep.subr.bf16.mxu0 %v1886_v0  ;;  %v1891_v4 = vld [vmem:[%s3068_s1 + $0x8] ss:$16 sps:$4 sm:$0xff]   ;;  %351 = vmatprep.subr.bf16.mxu1 %v1888_v2  ;;  %v1892_v5 = vld [vmem:[%s3068_s1 + $0x24] ss:$16 sps:$4 sm:$0xff]   ;;  %v1894_v6 = vld [vmem:[%s3068_s1 + $0x2c] ss:$16 sps:$4 sm:$0xff]  }
   0x3   :  { %279 = vmatpush1.bf16.msra.mxu0 %v1890_v3  ;;  %352 = vmatpush1.bf16.msra.mxu1 %v1891_v4  ;;  %v1896_v7 = vld [vmem:[%s3068_s1 + $0x20] ss:$16 sps:$4 sm:$0xff]   ;;  %v1897_v8 = vld [vmem:[%s3068_s1 + $0x28] ss:$16 sps:$4 sm:$0xff]   ;;  %v1898_v9 = vld [vmem:[%s3068_s1 + $0x44] ss:$16 sps:$4 sm:$0xff]  }
   0x4   :  { %280 = vmatprep.subr.bf16.mxu0 %v1892_v5  ;;  %353 = vmatprep.subr.bf16.mxu1 %v1894_v6  ;;  %v1900_v10 = vld [vmem:[%s3068_s1 + $0x4c] ss:$16 sps:$4 sm:$0xff]   ;;  %v1902_v11 = vld [vmem:[%s3068_s1 + $0x40] ss:$16 sps:$4 sm:$0xff]   ;;  %v1903_v12 = vld [vmem:[%s3068_s1 + $0x48] ss:$16 sps:$4 sm:$0xff]  }
   0x5   :  { %v1904_v13 = vld [vmem:[%s3068_s1 + $0x64] ss:$16 sps:$4 sm:$0xff]   ;;  %v1906_v14 = vld [vmem:[%s3068_s1 + $0x6c] ss:$16 sps:$4 sm:$0xff]   ;;  %v1908_v15 = vld [vmem:[%s3068_s1 + $0x60] ss:$16 sps:$4 sm:$0xff]  }
   0x6   :  { %v1909_v16 = vld [vmem:[%s3068_s1 + $0x68] ss:$16 sps:$4 sm:$0xff]   ;;  %v1910_v17 = vld [vmem:[%s3068_s1 + $0x84] ss:$16 sps:$4 sm:$0xff]   ;;  %v1912_v18 = vld [vmem:[%s3068_s1 + $0x8c] ss:$16 sps:$4 sm:$0xff]  }
   0x7   :  { %281 = vmatpush1.bf16.msra.mxu0 %v1896_v7  ;;  %354 = vmatpush1.bf16.msra.mxu1 %v1897_v8  ;;  %v1914_v19 = vld [vmem:[%s3068_s1 + $0x80] ss:$16 sps:$4 sm:$0xff]   ;;  %v1915_v20 = vld [vmem:[%s3068_s1 + $0x88] ss:$16 sps:$4 sm:$0xff]   ;;  %v1916_v21 = vld [vmem:[%s3068_s1 + $0xa4] ss:$16 sps:$4 sm:$0xff]   ;;  %v74_v7 = vlaneseq }
   0x8   :  { %282 = vmatprep.subr.bf16.mxu0 %v1898_v9  ;;  %355 = vmatprep.subr.bf16.mxu1 %v1900_v10  ;;  %v1918_v22 = vld [vmem:[%s3068_s1 + $0xac] ss:$16 sps:$4 sm:$0xff]   ;;  %v1920_v23 = vld [vmem:[%s3068_s1 + $0xa0] ss:$16 sps:$4 sm:$0xff]   ;;  %v1921_v24 = vld [vmem:[%s3068_s1 + $0xa8] ss:$16 sps:$4 sm:$0xff]  }
   0x9   :  { %v1922_v25 = vld [vmem:[%s3068_s1 + $0xc4] ss:$16 sps:$4 sm:$0xff]   ;;  %v1924_v26 = vld [vmem:[%s3068_s1 + $0xcc] ss:$16 sps:$4 sm:$0xff]   ;;  %v1926_v27 = vld [vmem:[%s3068_s1 + $0xc0] ss:$16 sps:$4 sm:$0xff]  }
   0xa   :  { %v1927_v28 = vld [vmem:[%s3068_s1 + $0xc8] ss:$16 sps:$4 sm:$0xff]   ;;  %v1928_v29 = vld [vmem:[%s3068_s1 + $0xe4] ss:$16 sps:$4 sm:$0xff]   ;;  %v1930_v30 = vld [vmem:[%s3068_s1 + $0xec] ss:$16 sps:$4 sm:$0xff]  }
   0xb   :  { %283 = vmatpush1.bf16.msra.mxu0 %v1902_v11  ;;  %356 = vmatpush1.bf16.msra.mxu1 %v1903_v12  ;;  %v1932_v31 = vld [vmem:[%s3068_s1 + $0xe0] ss:$16 sps:$4 sm:$0xff]   ;;  %v1933_v32 = vld [vmem:[%s3068_s1 + $0xe8] ss:$16 sps:$4 sm:$0xff]   ;;  %v2292_v33 = vld [vmem:[%s3070_s2 + $0x4] ss:$16 sps:$4 sm:$0xff]  }
   0xc   :  { %284 = vmatprep.subr.bf16.mxu0 %v1904_v13  ;;  %357 = vmatprep.subr.bf16.mxu1 %v1906_v14  ;;  %v2297_v34 = vld [vmem:[%s3070_s2 + $0xc] ss:$16 sps:$4 sm:$0xff]   ;;  %v1934_v35 = vld [vmem:[%s3069_s0] sm:$0xff]   ;;  %v2310_v37 = vld [vmem:[%s3070_s2 + $0x8] ss:$16 sps:$4 sm:$0xff]   ;;  %v3075_v6 = vmov 0.0|0.0  }
   0xd   :  { %v2305_v36 = vld [vmem:[%s3070_s2] ss:$16 sps:$4 sm:$0xff]   ;;  %v2317_v38 = vld [vmem:[%s3070_s2 + $0x24] ss:$16 sps:$4 sm:$0xff]   ;;  %v2322_v39 = vld [vmem:[%s3070_s2 + $0x2c] ss:$16 sps:$4 sm:$0xff]  }
   0xe   :  { %v2327_v40 = vld [vmem:[%s3070_s2 + $0x20] ss:$16 sps:$4 sm:$0xff]   ;;  %v2334_v41 = vld [vmem:[%s3070_s2 + $0x28] ss:$16 sps:$4 sm:$0xff]   ;;  %v2341_v42 = vld [vmem:[%s3070_s2 + $0x44] ss:$16 sps:$4 sm:$0xff]  }
   0xf   :  { %285 = vmatpush1.bf16.msra.mxu0 %v1908_v15  ;;  %358 = vmatpush1.bf16.msra.mxu1 %v1909_v16  ;;  %v2346_v43 = vld [vmem:[%s3070_s2 + $0x4c] ss:$16 sps:$4 sm:$0xff]   ;;  %v2356_v45 = vld [vmem:[%s3070_s2 + $0x40] ss:$16 sps:$4 sm:$0xff]   ;;  %v2361_v46 = vld [vmem:[%s3070_s2 + $0x48] ss:$16 sps:$4 sm:$0xff]  }
  0x10   :  { %286 = vmatprep.subr.bf16.mxu0 %v1910_v17  ;;  %359 = vmatprep.subr.bf16.mxu1 %v1912_v18  ;;  %v1947_v44 = vld [vmem:[%s3069_s0 + $0x8] sm:$0xff]   ;;  %v2368_v47 = vld [vmem:[%s3070_s2 + $0x64] ss:$16 sps:$4 sm:$0xff]   ;;  %v2380_v49 = vld [vmem:[%s3070_s2 + $0x60] ss:$16 sps:$4 sm:$0xff]   ;;  %v75_v8 = vshrl.u32 %v74_v7, 7 }
  0x11   :  { %v2375_v48 = vld [vmem:[%s3070_s2 + $0x6c] ss:$16 sps:$4 sm:$0xff]   ;;  %v2385_v50 = vld [vmem:[%s3070_s2 + $0x68] ss:$16 sps:$4 sm:$0xff]   ;;  %v2392_v51 = vld [vmem:[%s3070_s2 + $0x84] ss:$16 sps:$4 sm:$0xff]  }
  0x12   :  { %v2399_v52 = vld [vmem:[%s3070_s2 + $0x8c] ss:$16 sps:$4 sm:$0xff]   ;;  %v1960_v53 = vld [vmem:[%s3069_s0 + $0x10] sm:$0xff]   ;;  %v2416_v55 = vld [vmem:[%s3070_s2 + $0x88] ss:$16 sps:$4 sm:$0xff]   ;;  %v84_v9 = vsub.s32 2, %v75_v8 }
  0x13   :  { %287 = vmatpush1.bf16.msra.mxu0 %v1914_v19  ;;  %360 = vmatpush1.bf16.msra.mxu1 %v1915_v20  ;;  %v2411_v54 = vld [vmem:[%s3070_s2 + $0x80] ss:$16 sps:$4 sm:$0xff]   ;;  %v2423_v56 = vld [vmem:[%s3070_s2 + $0xa4] ss:$16 sps:$4 sm:$0xff]   ;;  %v2428_v57 = vld [vmem:[%s3070_s2 + $0xac] ss:$16 sps:$4 sm:$0xff]  }
  0x14   :  { %288 = vmatprep.subr.bf16.mxu0 %v1916_v21  ;;  %361 = vmatprep.subr.bf16.mxu1 %v1918_v22  ;;  %v2435_v58 = vld [vmem:[%s3070_s2 + $0xa0] ss:$16 sps:$4 sm:$0xff]   ;;  %v2440_v59 = vld [vmem:[%s3070_s2 + $0xa8] ss:$16 sps:$4 sm:$0xff]   ;;  %v2447_v60 = vld [vmem:[%s3070_s2 + $0xc4] ss:$16 sps:$4 sm:$0xff]  }
  0x15   :  { %v2452_v61 = vld [vmem:[%s3070_s2 + $0xcc] ss:$16 sps:$4 sm:$0xff]   ;;  %v2464_v63 = vld [vmem:[%s3070_s2 + $0xc0] ss:$16 sps:$4 sm:$0xff]   ;;  %v2469_v0 = vld [vmem:[%s3070_s2 + $0xc8] ss:$16 sps:$4 sm:$0xff]  }
  0x16   :  { %v1973_v62 = vld [vmem:[%s3069_s0 + $0x18] sm:$0xff]   ;;  %v2476_v2 = vld [vmem:[%s3070_s2 + $0xe4] ss:$16 sps:$4 sm:$0xff]   ;;  %v2488_v4 = vld [vmem:[%s3070_s2 + $0xe0] ss:$16 sps:$4 sm:$0xff]   ;;  %v88_v10 = vsub.s32 3, %v75_v8 }
  0x17   :  { %289 = vmatpush1.bf16.msra.mxu0 %v1920_v23  ;;  %362 = vmatpush1.bf16.msra.mxu1 %v1921_v24  ;;  %v2481_v3 = vld [vmem:[%s3070_s2 + $0xec] ss:$16 sps:$4 sm:$0xff]   ;;  %v2493_v5 = vld [vmem:[%s3070_s2 + $0xe8] ss:$16 sps:$4 sm:$0xff]   ;;  %v76_v11 = vsub.s32 0, %v75_v8  ;;  %v80_v13 = vsub.s32 1, %v75_v8 }
  0x18   :  { %290 = vmatprep.subr.bf16.mxu0 %v1922_v25  ;;  %363 = vmatprep.subr.bf16.mxu1 %v1924_v26  ;;  %v72_v12 = vld [vmem:[%s3071_s3] sm:$0xf] }
  0x19   :  { %v2542_v14 = vrot.slane %v72_v12, %v84_v9  ;;  %v2548_v17 = vrot.slane %v72_v12, %v88_v10  ;;  %v77_v18 = vrot.slane %v72_v12, %v76_v11  ;;  %v81_v21 = vrot.slane %v72_v12, %v80_v13 }
  0x1b   :  { %291 = vmatpush1.bf16.msra.mxu0 %v1926_v27  ;;  %364 = vmatpush1.bf16.msra.mxu1 %v1927_v28 }
  0x1c   :  { %292 = vmatprep.subr.bf16.mxu0 %v1928_v29  ;;  %365 = vmatprep.subr.bf16.mxu1 %v1930_v30 }
  0x1f   :  { %293 = vmatpush1.bf16.msra.mxu0 %v1932_v31  ;;  %366 = vmatpush1.bf16.msra.mxu1 %v1933_v32 }
  0x20   :  { %658 = vmatprep.subr.bf16.mxu0 %v2292_v33  ;;  %699 = vmatprep.subr.bf16.mxu1 %v2297_v34 }
  0x22   :  { %311 = vmatmul.mubr.bf16.vlgmr.msra.gmra.mrb[0].mxu0 %v1934_v35  ;;  %384 = vmatmul.mubr.bf16.vlgmr.msra.gmra.mrb[0].mxu1 %v1934_v35 }
  0x23   :  { %659 = vmatpush1.bf16.msra.mxu0 %v2305_v36  ;;  %700 = vmatpush1.bf16.msra.mxu1 %v2310_v37 }
  0x24   :  { %660 = vmatprep.subr.bf16.mxu0 %v2317_v38  ;;  %701 = vmatprep.subr.bf16.mxu1 %v2322_v39 }
  0x25   :  { %320 = vmatprep.mubr.bf16.mxu0 %v3077_v1  ;;  %393 = vmatprep.mubr.bf16.mxu1 %v3077_v1 }
  0x27   :  { %661 = vmatpush1.bf16.msra.mxu0 %v2327_v40  ;;  %702 = vmatpush1.bf16.msra.mxu1 %v2334_v41 }
  0x28   :  { %662 = vmatprep.subr.bf16.mxu0 %v2341_v42  ;;  %703 = vmatprep.subr.bf16.mxu1 %v2346_v43 }
  0x2a   :  { %321 = vmatmul.mubr.bf16.gmra.mrb[4].mxu0 %v1947_v44  ;;  %394 = vmatmul.mubr.bf16.gmra.mrb[4].mxu1 %v1947_v44 }
  0x2b   :  { %663 = vmatpush1.bf16.msra.mxu0 %v2356_v45  ;;  %704 = vmatpush1.bf16.msra.mxu1 %v2361_v46 }
  0x2c   :  { %664 = vmatprep.subr.bf16.mxu0 %v2368_v47  ;;  %705 = vmatprep.subr.bf16.mxu1 %v2375_v48 }
  0x2d   :  { %330 = vmatprep.mubr.bf16.mxu0 %v3077_v1  ;;  %403 = vmatprep.mubr.bf16.mxu1 %v3077_v1 }
  0x2f   :  { %665 = vmatpush1.bf16.msra.mxu0 %v2380_v49  ;;  %706 = vmatpush1.bf16.msra.mxu1 %v2385_v50 }
  0x30   :  { %666 = vmatprep.subr.bf16.mxu0 %v2392_v51  ;;  %707 = vmatprep.subr.bf16.mxu1 %v2399_v52 }
  0x32   :  { %331 = vmatmul.mubr.bf16.gmra.mrb[8].mxu0 %v1960_v53  ;;  %404 = vmatmul.mubr.bf16.gmra.mrb[8].mxu1 %v1960_v53 }
  0x33   :  { %667 = vmatpush1.bf16.msra.mxu0 %v2411_v54  ;;  %708 = vmatpush1.bf16.msra.mxu1 %v2416_v55 }
  0x34   :  { %668 = vmatprep.subr.bf16.mxu0 %v2423_v56  ;;  %709 = vmatprep.subr.bf16.mxu1 %v2428_v57 }
  0x35   :  { %340 = vmatprep.mubr.bf16.mxu0 %v3077_v1  ;;  %413 = vmatprep.mubr.bf16.mxu1 %v3077_v1 }
  0x37   :  { %669 = vmatpush1.bf16.msra.mxu0 %v2435_v58  ;;  %710 = vmatpush1.bf16.msra.mxu1 %v2440_v59 }
  0x38   :  { %670 = vmatprep.subr.bf16.mxu0 %v2447_v60  ;;  %711 = vmatprep.subr.bf16.mxu1 %v2452_v61 }
  0x3a   :  { %341 = vmatmul.mubr.bf16.gmra.mrb[12].mxu0 %v1973_v62  ;;  %414 = vmatmul.mubr.bf16.gmra.mrb[12].mxu1 %v1973_v62 }
  0x3b   :  { %671 = vmatpush1.bf16.msra.mxu0 %v2464_v63  ;;  %712 = vmatpush1.bf16.msra.mxu1 %v2469_v0 }
  0x3c   :  { %672 = vmatprep.subr.bf16.mxu0 %v2476_v2  ;;  %713 = vmatprep.subr.bf16.mxu1 %v2481_v3 }
  0x3d   :  { %690 = vmatprep.mubr.bf16.mxu0 %v3077_v1  ;;  %731 = vmatprep.mubr.bf16.mxu1 %v3077_v1 }
  0x3f   :  { %673 = vmatpush1.bf16.msra.mxu0 %v2488_v4  ;;  %714 = vmatpush1.bf16.msra.mxu1 %v2493_v5 }
  0x40   :  { %776 = vmatprep.subr.bf16.mxu0 %v2292_v33  ;;  %817 = vmatprep.subr.bf16.mxu1 %v2297_v34 }
  0x42   :  { %691 = vmatmul.mubr.bf16.vlgmr.msra.gmra.mrb[16].mxu0 %v3075_v6  ;;  %732 = vmatmul.mubr.bf16.vlgmr.msra.gmra.mrb[16].mxu1 %v3075_v6 }
  0x43   :  { %777 = vmatpush1.bf16.msra.mxu0 %v2305_v36  ;;  %818 = vmatpush1.bf16.msra.mxu1 %v2310_v37 }
  0x44   :  { %778 = vmatprep.subr.bf16.mxu0 %v2317_v38  ;;  %819 = vmatprep.subr.bf16.mxu1 %v2322_v39 }
  0x45   :  { %808 = vmatprep.mubr.bf16.mxu0 %v3077_v1  ;;  %849 = vmatprep.mubr.bf16.mxu1 %v3077_v1 }
  0x47   :  { %779 = vmatpush1.bf16.msra.mxu0 %v2327_v40  ;;  %820 = vmatpush1.bf16.msra.mxu1 %v2334_v41 }
  0x48   :  { %780 = vmatprep.subr.bf16.mxu0 %v2341_v42  ;;  %821 = vmatprep.subr.bf16.mxu1 %v2346_v43 }
  0x4b   :  { %781 = vmatpush1.bf16.msra.mxu0 %v2356_v45  ;;  %822 = vmatpush1.bf16.msra.mxu1 %v2361_v46 }
  0x4c   :  { %782 = vmatprep.subr.bf16.mxu0 %v2368_v47  ;;  %823 = vmatprep.subr.bf16.mxu1 %v2375_v48 }
  0x4f   :  { %783 = vmatpush1.bf16.msra.mxu0 %v2380_v49  ;;  %824 = vmatpush1.bf16.msra.mxu1 %v2385_v50 }
  0x50   :  { %784 = vmatprep.subr.bf16.mxu0 %v2392_v51  ;;  %825 = vmatprep.subr.bf16.mxu1 %v2399_v52 }
  0x53   :  { %785 = vmatpush1.bf16.msra.mxu0 %v2411_v54  ;;  %826 = vmatpush1.bf16.msra.mxu1 %v2416_v55 }
  0x54   :  { %786 = vmatprep.subr.bf16.mxu0 %v2423_v56  ;;  %827 = vmatprep.subr.bf16.mxu1 %v2428_v57 }
  0x57   :  { %787 = vmatpush1.bf16.msra.mxu0 %v2435_v58  ;;  %828 = vmatpush1.bf16.msra.mxu1 %v2440_v59 }
  0x58   :  { %788 = vmatprep.subr.bf16.mxu0 %v2447_v60  ;;  %829 = vmatprep.subr.bf16.mxu1 %v2452_v61 }
  0x5b   :  { %789 = vmatpush1.bf16.msra.mxu0 %v2464_v63  ;;  %830 = vmatpush1.bf16.msra.mxu1 %v2469_v0 }
  0x5c   :  { %790 = vmatprep.subr.bf16.mxu0 %v2476_v2  ;;  %831 = vmatprep.subr.bf16.mxu1 %v2481_v3 }
  0x5f   :  { %791 = vmatpush1.bf16.msra.mxu0 %v2488_v4  ;;  %832 = vmatpush1.bf16.msra.mxu1 %v2493_v5 }
  0x60   :  { %894 = vmatprep.subr.bf16.mxu0 %v2292_v33  ;;  %935 = vmatprep.subr.bf16.mxu1 %v2297_v34 }
  0xf5   :  { %v2544_v15 = vpop.f32.mrb[0].mxu0  ;;  %v2546_v16 = vpop.f32.mrb[0].mxu1 }
  0xf6   :  { %v314_v19 = vpop.f32.mrb[1].mxu0  ;;  %v387_v20 = vpop.f32.mrb[1].mxu1 }
  0xf7   :  { %v316_v22 = vpop.f32.mrb[2].mxu0  ;;  %v389_v23 = vpop.f32.mrb[2].mxu1 }
  0xf8   :  { %v2550_v24 = vadd.f32 %v316_v22, %v77_v18  ;;  %v318_v25 = vpop.f32.mrb[3].mxu0  ;;  %v2553_v26 = vadd.f32 %v389_v23, %v2542_v14  ;;  %v391_v27 = vpop.f32.mrb[3].mxu1 }
  0xf9   :  { %v2555_v28 = vadd.f32 %v318_v25, %v81_v21  ;;  %v2558_v29 = vadd.f32 %v391_v27, %v2548_v17 }
  0xfd   :  { %v322_v30 = vpop.f32.mrb[4].mxu0  ;;  %v395_v31 = vpop.f32.mrb[4].mxu1 }
  0xfe   :  { %v2560_v32 = vadd.f32 %v322_v30, %v77_v18  ;;  %v324_v35 = vpop.f32.mrb[5].mxu0  ;;  %v2563_v44 = vadd.f32 %v395_v31, %v2542_v14  ;;  %v397_v53 = vpop.f32.mrb[5].mxu1 }
  0xff   :  { %v2565_v62 = vadd.f32 %v324_v35, %v81_v21  ;;  %v326_v7 = vpop.f32.mrb[6].mxu0  ;;  %v2568_v8 = vadd.f32 %v397_v53, %v2548_v17  ;;  %v399_v9 = vpop.f32.mrb[6].mxu1 }
 0x100   :  { %v2570_v10 = vadd.f32 %v326_v7, %v77_v18  ;;  %v328_v11 = vpop.f32.mrb[7].mxu0  ;;  %v2573_v12 = vadd.f32 %v399_v9, %v2542_v14  ;;  %v401_v13 = vpop.f32.mrb[7].mxu1 }
 0x101   :  { %3079 = vst [vmem:[#allocation6_spill] sm:$0xff] %v2568_v8  ;;  %v2575_v22 = vadd.f32 %v328_v11, %v81_v21  ;;  %v2578_v23 = vadd.f32 %v401_v13, %v2548_v17 }
 0x102   :  { %3080 = vst [vmem:[#allocation7_spill] sm:$0xff] %v2570_v10  ;;  %3081 = vst [vmem:[#allocation8_spill] sm:$0xff] %v2573_v12 }
 0x103   :  { %3082 = vst [vmem:[#allocation9_spill] sm:$0xff] %v2575_v22  ;;  %3083 = vst [vmem:[#allocation10_spill] sm:$0xff] %v2578_v23 }
 0x105   :  { %v332_v25 = vpop.f32.mrb[8].mxu0  ;;  %v405_v27 = vpop.f32.mrb[8].mxu1 }
 0x106   :  { %v2580_v30 = vadd.f32 %v332_v25, %v77_v18  ;;  %v334_v31 = vpop.f32.mrb[9].mxu0  ;;  %v2583_v35 = vadd.f32 %v405_v27, %v2542_v14  ;;  %v407_v53 = vpop.f32.mrb[9].mxu1 }
 0x107   :  { %v2585_v7 = vadd.f32 %v334_v31, %v81_v21  ;;  %v336_v6 = vpop.f32.mrb[10].mxu0  ;;  %v2588_v9 = vadd.f32 %v407_v53, %v2548_v17  ;;  %v409_v11 = vpop.f32.mrb[10].mxu1 }
 0x108   :  { %3084 = vst [vmem:[#allocation11_spill] sm:$0xff] %v2580_v30  ;;  %3085 = vst [vmem:[#allocation12_spill] sm:$0xff] %v2583_v35  ;;  %v2590_v1 = vadd.f32 %v336_v6, %v77_v18  ;;  %v338_v13 = vpop.f32.mrb[11].mxu0  ;;  %v2593_v23 = vadd.f32 %v409_v11, %v2542_v14  ;;  %v411_v25 = vpop.f32.mrb[11].mxu1 }
 0x109   :  { %3086 = vst [vmem:[#allocation13_spill] sm:$0xff] %v2585_v7  ;;  %3087 = vst [vmem:[#allocation14_spill] sm:$0xff] %v2588_v9  ;;  %v2595_v30 = vadd.f32 %v338_v13, %v81_v21  ;;  %v2598_v27 = vadd.f32 %v411_v25, %v2548_v17 }
 0x10a   :  { %3088 = vst [vmem:[#allocation15_spill] sm:$0xff] %v2590_v1  ;;  %3089 = vst [vmem:[#allocation16_spill] sm:$0xff] %v2593_v23 }
 0x10b   :  { %3090 = vst [vmem:[#allocation17_spill] sm:$0xff] %v2595_v30  ;;  %3091 = vst [vmem:[#allocation18_spill] sm:$0xff] %v2598_v27 }
 0x10d   :  { %v342_v35 = vpop.f32.mrb[12].mxu0  ;;  %v415_v31 = vpop.f32.mrb[12].mxu1 }
 0x10e   :  { %v2600_v7 = vadd.f32 %v342_v35, %v77_v18  ;;  %v344_v22 = vpop.f32.mrb[13].mxu0  ;;  %v2603_v53 = vadd.f32 %v415_v31, %v2542_v14  ;;  %v417_v6 = vpop.f32.mrb[13].mxu1 }
 0x10f   :  { %v2605_v1 = vadd.f32 %v344_v22, %v81_v21  ;;  %v346_v9 = vpop.f32.mrb[14].mxu0  ;;  %v2608_v11 = vadd.f32 %v417_v6, %v2548_v17  ;;  %v419_v13 = vpop.f32.mrb[14].mxu1  ;;  %v313_v22 = vadd.f32 %v2544_v15, %v77_v18  ;;  %v315_v6 = vadd.f32 %v314_v19, %v81_v21 }
 0x110   :  { %3092 = vst [vmem:[#allocation19_spill] sm:$0xff] %v2600_v7  ;;  %3093 = vst [vmem:[#allocation20_spill] sm:$0xff] %v2603_v53  ;;  %v2610_v30 = vadd.f32 %v346_v9, %v77_v18  ;;  %v348_v25 = vpop.f32.mrb[15].mxu0  ;;  %v2613_v27 = vadd.f32 %v419_v13, %v2542_v14  ;;  %v421_v35 = vpop.f32.mrb[15].mxu1 }
 0x111   :  { %3094 = vst [vmem:[#allocation21_spill] sm:$0xff] %v2605_v1  ;;  %3095 = vst [vmem:[#allocation22_spill] sm:$0xff] %v2608_v11  ;;  %v2615_v7 = vadd.f32 %v348_v25, %v81_v21  ;;  %v2618_v31 = vadd.f32 %v421_v35, %v2548_v17  ;;  %v386_v1 = vadd.f32 %v2546_v16, %v2542_v14 }
 0x112   :  { %3096 = vst [vmem:[#allocation23_spill] sm:$0xff] %v2610_v30  ;;  %3097 = vst [vmem:[#allocation24_spill] sm:$0xff] %v2613_v27  ;;  %v388_v11 = vadd.f32 %v387_v20, %v2548_v17 }
 0x113   :  { %3098 = vst [vmem:[#allocation25_spill] sm:$0xff] %v2615_v7  ;;  %3099 = vst [vmem:[#allocation26_spill] sm:$0xff] %v2618_v31 }
 0x115   :  { %v692_v9 = vpop.f32.mrb[16].mxu0  ;;  %v733_v30 = vpop.f32.mrb[16].mxu1 }
 0x116   :  { %v740_v53 = vadd.f32 %v692_v9, %v313_v22  ;;  %v742_v23 = vadd.f32 %v733_v30, %v386_v1  ;;  %v694_v13 = vpop.f32.mrb[17].mxu0  ;;  %v735_v27 = vpop.f32.mrb[17].mxu1 }
 0x117   :  { %v741_v12 = vadd.f32 %v694_v13, %v315_v6  ;;  %v743_v25 = vadd.f32 %v735_v27, %v388_v11  ;;  %v696_v7 = vpop.f32.mrb[18].mxu0  ;;  %v737_v10 = vpop.f32.mrb[18].mxu1 }
 0x118   :  { %v1780_v35 = vmul.f32 -1.442695, %v740_v53  ;;  %v697_v31 = vpop.f32.mrb[19].mxu0  ;;  %v738_v8 = vpop.f32.mrb[19].mxu1 }
 0x119   :  { %v1781_v15 = vmul.f32 -1.442695, %v741_v12  ;;  %v1782_v14 = vmul.f32 -1.442695, %v743_v25 }
 0x11a   :  { %1986 = vpow2.f32 %v1780_v35 }
 0x11b   :  { %1988 = vpow2.f32 %v1781_v15 }
 0x11c   :  { %1990 = vpow2.f32 %v1782_v14 }
 0x11d   :  { %1992 = vtanh.f32 %v742_v23  ;;  %v3100_v23 = vmov 0  }
 0x124   :  { %v1987_v16 = vpop.eup %1986 }
 0x125   :  { %v1989_v18 = vpop.eup %1988  ;;  %v747_v17 = vadd.f32 1.0, %v1987_v16 }
 0x126   :  { %v753_v19 = vadd.f32 1.0, %v1989_v18  ;;  %v1991_v1 = vpop.eup %1990 }
 0x127   :  { %1994 = vrcp.f32 %v747_v17  ;;  %v1993_v20 = vpop.eup %1992  ;;  %v760_v7 = vadd.f32 1.0, %v1991_v1 }
 0x128   :  { %1996 = vrcp.f32 %v753_v19 }
 0x129   :  { %1998 = vrcp.f32 %v760_v7 }
 0x131   :  { %v1995_v21 = vpop.eup %1994 }
 0x132   :  { %v1997_v30 = vpop.eup %1996  ;;  %v764_v10 = vmul.f32 %v1995_v21, %v1993_v20 }
 0x133   :  { %v763_v27 = vmul.f32 0.0, %v1997_v30  ;;  %v1999_v12 = vpop.eup %1998 }
 0x135   :  { %v2624_v8 = vadd.f32 %v764_v10, %v763_v27 }
 0x137   :  { %2000 = vtanh.f32 %v2624_v8 }
 0x141   :  { %v2001_v53 = vpop.eup %2000 }
 0x142   :  { %v767_v11 = vmul.f32 %v2001_v53, %v1999_v12 }
 0x144   :  { %v775_v31 = vpack.c.bf16 %v767_v11, %v767_v11 }
 0x146   :  { %809 = vmatmul.mubr.bf16.vlgmr.msra.gmra.mrb[20].mxu0 %v775_v31  ;;  %850 = vmatmul.mubr.bf16.vlgmr.msra.gmra.mrb[20].mxu1 %v775_v31 }
 0x147   :  { %895 = vmatpush1.bf16.msra.mxu0 %v2305_v36  ;;  %936 = vmatpush1.bf16.msra.mxu1 %v2310_v37 }
 0x148   :  { %896 = vmatprep.subr.bf16.mxu0 %v2317_v38  ;;  %937 = vmatprep.subr.bf16.mxu1 %v2322_v39 }
 0x149   :  { %926 = vmatprep.mubr.bf16.mxu0 %v3100_v23  ;;  %967 = vmatprep.mubr.bf16.mxu1 %v3100_v23 }
 0x14b   :  { %897 = vmatpush1.bf16.msra.mxu0 %v2327_v40  ;;  %938 = vmatpush1.bf16.msra.mxu1 %v2334_v41 }
 0x14c   :  { %898 = vmatprep.subr.bf16.mxu0 %v2341_v42  ;;  %939 = vmatprep.subr.bf16.mxu1 %v2346_v43 }
 0x14f   :  { %899 = vmatpush1.bf16.msra.mxu0 %v2356_v45  ;;  %940 = vmatpush1.bf16.msra.mxu1 %v2361_v46 }
 0x150   :  { %900 = vmatprep.subr.bf16.mxu0 %v2368_v47  ;;  %941 = vmatprep.subr.bf16.mxu1 %v2375_v48 }
 0x153   :  { %901 = vmatpush1.bf16.msra.mxu0 %v2380_v49  ;;  %942 = vmatpush1.bf16.msra.mxu1 %v2385_v50 }
 0x154   :  { %902 = vmatprep.subr.bf16.mxu0 %v2392_v51  ;;  %943 = vmatprep.subr.bf16.mxu1 %v2399_v52 }
 0x157   :  { %903 = vmatpush1.bf16.msra.mxu0 %v2411_v54  ;;  %944 = vmatpush1.bf16.msra.mxu1 %v2416_v55 }
 0x158   :  { %904 = vmatprep.subr.bf16.mxu0 %v2423_v56  ;;  %945 = vmatprep.subr.bf16.mxu1 %v2428_v57 }
 0x15b   :  { %905 = vmatpush1.bf16.msra.mxu0 %v2435_v58  ;;  %946 = vmatpush1.bf16.msra.mxu1 %v2440_v59 }
 0x15c   :  { %906 = vmatprep.subr.bf16.mxu0 %v2447_v60  ;;  %947 = vmatprep.subr.bf16.mxu1 %v2452_v61 }
 0x15f   :  { %907 = vmatpush1.bf16.msra.mxu0 %v2464_v63  ;;  %948 = vmatpush1.bf16.msra.mxu1 %v2469_v0 }
 0x160   :  { %908 = vmatprep.subr.bf16.mxu0 %v2476_v2  ;;  %949 = vmatprep.subr.bf16.mxu1 %v2481_v3 }
 0x163   :  { %909 = vmatpush1.bf16.msra.mxu0 %v2488_v4  ;;  %950 = vmatpush1.bf16.msra.mxu1 %v2493_v5 }
 0x164   :  { %1012 = vmatprep.subr.bf16.mxu0 %v2292_v33  ;;  %1053 = vmatprep.subr.bf16.mxu1 %v2297_v34 }
 0x219   :  { %v810_v22 = vpop.f32.mrb[20].mxu0  ;;  %v851_v6 = vpop.f32.mrb[20].mxu1 }
 0x21a   :  { %v858_v9 = vadd.f32 %v810_v22, %v2550_v24  ;;  %v860_v13 = vadd.f32 %v851_v6, %v2553_v26  ;;  %v812_v25 = vpop.f32.mrb[21].mxu0  ;;  %v853_v35 = vpop.f32.mrb[21].mxu1 }
 0x21b   :  { %v859_v15 = vadd.f32 %v812_v25, %v2555_v28  ;;  %v861_v14 = vadd.f32 %v853_v35, %v2558_v29  ;;  %v814_v16 = vpop.f32.mrb[22].mxu0  ;;  %v855_v18 = vpop.f32.mrb[22].mxu1 }
 0x21c   :  { %v1783_v17 = vmul.f32 -1.442695, %v858_v9  ;;  %v815_v19 = vpop.f32.mrb[23].mxu0  ;;  %v856_v1 = vpop.f32.mrb[23].mxu1 }
 0x21d   :  { %v1784_v20 = vmul.f32 -1.442695, %v859_v15  ;;  %v1785_v21 = vmul.f32 -1.442695, %v861_v14 }
 0x21e   :  { %2002 = vpow2.f32 %v1783_v17  ;;  %v3101_v17 = vld [vmem:[#allocation6_spill] sm:$0xff] }
 0x21f   :  { %2004 = vpow2.f32 %v1784_v20 }
 0x220   :  { %2006 = vpow2.f32 %v1785_v21 }
 0x221   :  { %2008 = vtanh.f32 %v860_v13 }
 0x228   :  { %v2003_v30 = vpop.eup %2002 }
 0x229   :  { %v2005_v10 = vpop.eup %2004  ;;  %v865_v24 = vadd.f32 1.0, %v2003_v30 }
 0x22a   :  { %v871_v26 = vadd.f32 1.0, %v2005_v10  ;;  %v2007_v28 = vpop.eup %2006 }
 0x22b   :  { %2010 = vrcp.f32 %v865_v24  ;;  %v2009_v7 = vpop.eup %2008  ;;  %v878_v53 = vadd.f32 1.0, %v2007_v28 }
 0x22c   :  { %2012 = vrcp.f32 %v871_v26 }
 0x22d   :  { %2014 = vrcp.f32 %v878_v53 }
 0x235   :  { %v2011_v29 = vpop.eup %2010 }
 0x236   :  { %v2013_v27 = vpop.eup %2012  ;;  %v882_v12 = vmul.f32 %v2011_v29, %v2009_v7 }
 0x237   :  { %v881_v11 = vmul.f32 %v2013_v27, %v2624_v8  ;;  %v2015_v22 = vpop.eup %2014 }
 0x239   :  { %v2666_v31 = vadd.f32 %v882_v12, %v881_v11 }
 0x23b   :  { %2016 = vtanh.f32 %v2666_v31 }
 0x245   :  { %v2017_v6 = vpop.eup %2016 }
 0x246   :  { %v885_v9 = vmul.f32 %v2017_v6, %v2015_v22 }
 0x248   :  { %v893_v13 = vpack.c.bf16 %v885_v9, %v885_v9 }
 0x24a   :  { %927 = vmatmul.mubr.bf16.vlgmr.msra.gmra.mrb[24].mxu0 %v893_v13  ;;  %968 = vmatmul.mubr.bf16.vlgmr.msra.gmra.mrb[24].mxu1 %v893_v13 }
 0x24b   :  { %1013 = vmatpush1.bf16.msra.mxu0 %v2305_v36  ;;  %1054 = vmatpush1.bf16.msra.mxu1 %v2310_v37 }
 0x24c   :  { %1014 = vmatprep.subr.bf16.mxu0 %v2317_v38  ;;  %1055 = vmatprep.subr.bf16.mxu1 %v2322_v39 }
 0x24d   :  { %1044 = vmatprep.mubr.bf16.mxu0 %v3100_v23  ;;  %1085 = vmatprep.mubr.bf16.mxu1 %v3100_v23 }
 0x24f   :  { %1015 = vmatpush1.bf16.msra.mxu0 %v2327_v40  ;;  %1056 = vmatpush1.bf16.msra.mxu1 %v2334_v41 }
 0x250   :  { %1016 = vmatprep.subr.bf16.mxu0 %v2341_v42  ;;  %1057 = vmatprep.subr.bf16.mxu1 %v2346_v43 }
 0x253   :  { %1017 = vmatpush1.bf16.msra.mxu0 %v2356_v45  ;;  %1058 = vmatpush1.bf16.msra.mxu1 %v2361_v46 }
 0x254   :  { %1018 = vmatprep.subr.bf16.mxu0 %v2368_v47  ;;  %1059 = vmatprep.subr.bf16.mxu1 %v2375_v48 }
 0x257   :  { %1019 = vmatpush1.bf16.msra.mxu0 %v2380_v49  ;;  %1060 = vmatpush1.bf16.msra.mxu1 %v2385_v50 }
 0x258   :  { %1020 = vmatprep.subr.bf16.mxu0 %v2392_v51  ;;  %1061 = vmatprep.subr.bf16.mxu1 %v2399_v52 }
 0x25b   :  { %1021 = vmatpush1.bf16.msra.mxu0 %v2411_v54  ;;  %1062 = vmatpush1.bf16.msra.mxu1 %v2416_v55 }
 0x25c   :  { %1022 = vmatprep.subr.bf16.mxu0 %v2423_v56  ;;  %1063 = vmatprep.subr.bf16.mxu1 %v2428_v57 }
 0x25f   :  { %1023 = vmatpush1.bf16.msra.mxu0 %v2435_v58  ;;  %1064 = vmatpush1.bf16.msra.mxu1 %v2440_v59 }
 0x260   :  { %1024 = vmatprep.subr.bf16.mxu0 %v2447_v60  ;;  %1065 = vmatprep.subr.bf16.mxu1 %v2452_v61 }
 0x263   :  { %1025 = vmatpush1.bf16.msra.mxu0 %v2464_v63  ;;  %1066 = vmatpush1.bf16.msra.mxu1 %v2469_v0 }
 0x264   :  { %1026 = vmatprep.subr.bf16.mxu0 %v2476_v2  ;;  %1067 = vmatprep.subr.bf16.mxu1 %v2481_v3 }
 0x267   :  { %1027 = vmatpush1.bf16.msra.mxu0 %v2488_v4  ;;  %1068 = vmatpush1.bf16.msra.mxu1 %v2493_v5 }
 0x268   :  { %1130 = vmatprep.subr.bf16.mxu0 %v2292_v33  ;;  %1171 = vmatprep.subr.bf16.mxu1 %v2297_v34 }
 0x31d   :  { %v928_v8 = vpop.f32.mrb[24].mxu0  ;;  %v969_v25 = vpop.f32.mrb[24].mxu1 }
 0x31e   :  { %v976_v35 = vadd.f32 %v928_v8, %v2560_v32  ;;  %v978_v15 = vadd.f32 %v969_v25, %v2563_v44  ;;  %v930_v14 = vpop.f32.mrb[25].mxu0  ;;  %v971_v16 = vpop.f32.mrb[25].mxu1 }
 0x31f   :  { %v977_v18 = vadd.f32 %v930_v14, %v2565_v62  ;;  %v979_v19 = vadd.f32 %v971_v16, %v3101_v17  ;;  %v932_v1 = vpop.f32.mrb[26].mxu0  ;;  %v973_v20 = vpop.f32.mrb[26].mxu1  ;;  %v3103_v16 = vld [vmem:[#allocation8_spill] sm:$0xff] }
 0x320   :  { %v1786_v21 = vmul.f32 -1.442695, %v976_v35  ;;  %v933_v30 = vpop.f32.mrb[27].mxu0  ;;  %v974_v10 = vpop.f32.mrb[27].mxu1  ;;  %v3104_v1 = vld [vmem:[#allocation9_spill] sm:$0xff] }
 0x321   :  { %v1787_v24 = vmul.f32 -1.442695, %v977_v18  ;;  %v1788_v26 = vmul.f32 -1.442695, %v979_v19 }
 0x322   :  { %2018 = vpow2.f32 %v1786_v21  ;;  %v3105_v21 = vld [vmem:[#allocation10_spill] sm:$0xff] }
 0x323   :  { %2020 = vpow2.f32 %v1787_v24 }
 0x324   :  { %2022 = vpow2.f32 %v1788_v26 }
 0x325   :  { %2024 = vtanh.f32 %v978_v15  ;;  %v3102_v15 = vld [vmem:[#allocation7_spill] sm:$0xff] }
 0x32c   :  { %v2019_v28 = vpop.eup %2018 }
 0x32d   :  { %v2021_v7 = vpop.eup %2020  ;;  %v983_v32 = vadd.f32 1.0, %v2019_v28 }
 0x32e   :  { %v989_v44 = vadd.f32 1.0, %v2021_v7  ;;  %v2023_v62 = vpop.eup %2022 }
 0x32f   :  { %2026 = vrcp.f32 %v983_v32  ;;  %v2025_v29 = vpop.eup %2024  ;;  %v996_v11 = vadd.f32 1.0, %v2023_v62 }
 0x330   :  { %2028 = vrcp.f32 %v989_v44 }
 0x331   :  { %2030 = vrcp.f32 %v996_v11 }
 0x339   :  { %v2027_v27 = vpop.eup %2026 }
 0x33a   :  { %v2029_v12 = vpop.eup %2028  ;;  %v1000_v53 = vmul.f32 %v2027_v27, %v2025_v29 }
 0x33b   :  { %v999_v22 = vmul.f32 %v2029_v12, %v2666_v31  ;;  %v2031_v9 = vpop.eup %2030 }
 0x33d   :  { %v2708_v6 = vadd.f32 %v1000_v53, %v999_v22 }
 0x33f   :  { %2032 = vtanh.f32 %v2708_v6 }
 0x349   :  { %v2033_v13 = vpop.eup %2032 }
 0x34a   :  { %v1003_v8 = vmul.f32 %v2033_v13, %v2031_v9 }
 0x34c   :  { %v1011_v25 = vpack.c.bf16 %v1003_v8, %v1003_v8 }
 0x34e   :  { %1045 = vmatmul.mubr.bf16.vlgmr.msra.gmra.mrb[28].mxu0 %v1011_v25  ;;  %1086 = vmatmul.mubr.bf16.vlgmr.msra.gmra.mrb[28].mxu1 %v1011_v25 }
 0x34f   :  { %1131 = vmatpush1.bf16.msra.mxu0 %v2305_v36  ;;  %1172 = vmatpush1.bf16.msra.mxu1 %v2310_v37 }
 0x350   :  { %1132 = vmatprep.subr.bf16.mxu0 %v2317_v38  ;;  %1173 = vmatprep.subr.bf16.mxu1 %v2322_v39 }
 0x351   :  { %1162 = vmatprep.mubr.bf16.mxu0 %v3100_v23  ;;  %1203 = vmatprep.mubr.bf16.mxu1 %v3100_v23 }
 0x353   :  { %1133 = vmatpush1.bf16.msra.mxu0 %v2327_v40  ;;  %1174 = vmatpush1.bf16.msra.mxu1 %v2334_v41 }
 0x354   :  { %1134 = vmatprep.subr.bf16.mxu0 %v2341_v42  ;;  %1175 = vmatprep.subr.bf16.mxu1 %v2346_v43 }
 0x357   :  { %1135 = vmatpush1.bf16.msra.mxu0 %v2356_v45  ;;  %1176 = vmatpush1.bf16.msra.mxu1 %v2361_v46 }
 0x358   :  { %1136 = vmatprep.subr.bf16.mxu0 %v2368_v47  ;;  %1177 = vmatprep.subr.bf16.mxu1 %v2375_v48 }
 0x35b   :  { %1137 = vmatpush1.bf16.msra.mxu0 %v2380_v49  ;;  %1178 = vmatpush1.bf16.msra.mxu1 %v2385_v50 }
 0x35c   :  { %1138 = vmatprep.subr.bf16.mxu0 %v2392_v51  ;;  %1179 = vmatprep.subr.bf16.mxu1 %v2399_v52 }
 0x35f   :  { %1139 = vmatpush1.bf16.msra.mxu0 %v2411_v54  ;;  %1180 = vmatpush1.bf16.msra.mxu1 %v2416_v55 }
 0x360   :  { %1140 = vmatprep.subr.bf16.mxu0 %v2423_v56  ;;  %1181 = vmatprep.subr.bf16.mxu1 %v2428_v57 }
 0x363   :  { %1141 = vmatpush1.bf16.msra.mxu0 %v2435_v58  ;;  %1182 = vmatpush1.bf16.msra.mxu1 %v2440_v59 }
 0x364   :  { %1142 = vmatprep.subr.bf16.mxu0 %v2447_v60  ;;  %1183 = vmatprep.subr.bf16.mxu1 %v2452_v61 }
 0x367   :  { %1143 = vmatpush1.bf16.msra.mxu0 %v2464_v63  ;;  %1184 = vmatpush1.bf16.msra.mxu1 %v2469_v0 }
 0x368   :  { %1144 = vmatprep.subr.bf16.mxu0 %v2476_v2  ;;  %1185 = vmatprep.subr.bf16.mxu1 %v2481_v3 }
 0x36b   :  { %1145 = vmatpush1.bf16.msra.mxu0 %v2488_v4  ;;  %1186 = vmatpush1.bf16.msra.mxu1 %v2493_v5 }
 0x36c   :  { %1248 = vmatprep.subr.bf16.mxu0 %v2292_v33  ;;  %1289 = vmatprep.subr.bf16.mxu1 %v2297_v34 }
 0x421   :  { %v1046_v31 = vpop.f32.mrb[28].mxu0  ;;  %v1087_v35 = vpop.f32.mrb[28].mxu1 }
 0x422   :  { %v1094_v14 = vadd.f32 %v1046_v31, %v3102_v15  ;;  %v1096_v18 = vadd.f32 %v1087_v35, %v3103_v16  ;;  %v1048_v17 = vpop.f32.mrb[29].mxu0  ;;  %v1089_v19 = vpop.f32.mrb[29].mxu1 }
 0x423   :  { %v1095_v20 = vadd.f32 %v1048_v17, %v3104_v1  ;;  %v1097_v30 = vadd.f32 %v1089_v19, %v3105_v21  ;;  %v1050_v10 = vpop.f32.mrb[30].mxu0  ;;  %v1091_v24 = vpop.f32.mrb[30].mxu1 }
 0x424   :  { %v1789_v26 = vmul.f32 -1.442695, %v1094_v14  ;;  %v1051_v28 = vpop.f32.mrb[31].mxu0  ;;  %v1092_v7 = vpop.f32.mrb[31].mxu1 }
 0x425   :  { %v1790_v33 = vmul.f32 -1.442695, %v1095_v20  ;;  %v1791_v34 = vmul.f32 -1.442695, %v1097_v30 }
 0x426   :  { %2034 = vpow2.f32 %v1789_v26 }
 0x427   :  { %2036 = vpow2.f32 %v1790_v33 }
 0x428   :  { %2038 = vpow2.f32 %v1791_v34 }
 0x429   :  { %2040 = vtanh.f32 %v1096_v18 }
 0x430   :  { %v2035_v32 = vpop.eup %2034 }
 0x431   :  { %v2037_v44 = vpop.eup %2036  ;;  %v1101_v62 = vadd.f32 1.0, %v2035_v32 }
 0x432   :  { %v1107_v29 = vadd.f32 1.0, %v2037_v44  ;;  %v2039_v27 = vpop.eup %2038 }
 0x433   :  { %2042 = vrcp.f32 %v1101_v62  ;;  %v2041_v12 = vpop.eup %2040  ;;  %v1114_v9 = vadd.f32 1.0, %v2039_v27  ;;  %v2808_v62 = vld [vmem:[%s3070_s2] ss:$16 sps:$4 sm:$0xff]   ;;  %v2820_v27 = vld [vmem:[%s3070_s2 + $0x24] ss:$16 sps:$4 sm:$0xff]  }
 0x434   :  { %2044 = vrcp.f32 %v1107_v29  ;;  %v2814_v29 = vld [vmem:[%s3070_s2 + $0x8] ss:$16 sps:$4 sm:$0xff]  }
 0x435   :  { %2046 = vrcp.f32 %v1114_v9  ;;  %v2852_v9 = vld [vmem:[%s3070_s2 + $0x4c] ss:$16 sps:$4 sm:$0xff]  }
 0x43d   :  { %v2043_v53 = vpop.eup %2042 }
 0x43e   :  { %v2045_v11 = vpop.eup %2044  ;;  %v1118_v22 = vmul.f32 %v2043_v53, %v2041_v12  ;;  %v2826_v12 = vld [vmem:[%s3070_s2 + $0x2c] ss:$16 sps:$4 sm:$0xff]   ;;  %v2834_v53 = vld [vmem:[%s3070_s2 + $0x20] ss:$16 sps:$4 sm:$0xff]  }
 0x43f   :  { %v1117_v13 = vmul.f32 %v2045_v11, %v2708_v6  ;;  %v2047_v25 = vpop.eup %2046  ;;  %v2840_v11 = vld [vmem:[%s3070_s2 + $0x28] ss:$16 sps:$4 sm:$0xff]  }
 0x441   :  { %v2750_v8 = vadd.f32 %v1118_v22, %v1117_v13  ;;  %v2846_v22 = vld [vmem:[%s3070_s2 + $0x44] ss:$16 sps:$4 sm:$0xff]   ;;  %v2858_v13 = vld [vmem:[%s3070_s2 + $0x40] ss:$16 sps:$4 sm:$0xff]  }
 0x443   :  { %2048 = vtanh.f32 %v2750_v8 }
 0x44d   :  { %v2049_v31 = vpop.eup %2048 }
 0x44e   :  { %v1121_v35 = vmul.f32 %v2049_v31, %v2047_v25  ;;  %v2870_v25 = vld [vmem:[%s3070_s2 + $0x64] ss:$16 sps:$4 sm:$0xff]   ;;  %v2876_v31 = vld [vmem:[%s3070_s2 + $0x6c] ss:$16 sps:$4 sm:$0xff]  }
 0x450   :  { %v1129_v15 = vpack.c.bf16 %v1121_v35, %v1121_v35  ;;  %v2882_v35 = vld [vmem:[%s3070_s2 + $0x60] ss:$16 sps:$4 sm:$0xff]  }
 0x452   :  { %1163 = vmatmul.mubr.bf16.vlgmr.msra.gmra.mrb[32].mxu0 %v1129_v15  ;;  %1204 = vmatmul.mubr.bf16.vlgmr.msra.gmra.mrb[32].mxu1 %v1129_v15  ;;  %v2888_v15 = vld [vmem:[%s3070_s2 + $0x68] ss:$16 sps:$4 sm:$0xff]  }
 0x453   :  { %1249 = vmatpush1.bf16.msra.mxu0 %v2305_v36  ;;  %1290 = vmatpush1.bf16.msra.mxu1 %v2310_v37  ;;  %v2788_v36 = vld [vmem:[%s3070_s2 + $0x4] ss:$16 sps:$4 sm:$0xff]   ;;  %v2794_v37 = vld [vmem:[%s3070_s2 + $0xc] ss:$16 sps:$4 sm:$0xff]  }
 0x454   :  { %1250 = vmatprep.subr.bf16.mxu0 %v2317_v38  ;;  %1291 = vmatprep.subr.bf16.mxu1 %v2322_v39 }
 0x455   :  { %1280 = vmatprep.mubr.bf16.mxu0 %v3100_v23  ;;  %1321 = vmatprep.mubr.bf16.mxu1 %v3100_v23 }
 0x457   :  { %1251 = vmatpush1.bf16.msra.mxu0 %v2327_v40  ;;  %1292 = vmatpush1.bf16.msra.mxu1 %v2334_v41  ;;  %v3106_v40 = vld [vmem:[#allocation11_spill] sm:$0xff] }
 0x458   :  { %1252 = vmatprep.subr.bf16.mxu0 %v2341_v42  ;;  %1293 = vmatprep.subr.bf16.mxu1 %v2346_v43  ;;  %v3107_v42 = vld [vmem:[#allocation12_spill] sm:$0xff] }
 0x45b   :  { %1253 = vmatpush1.bf16.msra.mxu0 %v2356_v45  ;;  %1294 = vmatpush1.bf16.msra.mxu1 %v2361_v46 }
 0x45c   :  { %1254 = vmatprep.subr.bf16.mxu0 %v2368_v47  ;;  %1295 = vmatprep.subr.bf16.mxu1 %v2375_v48  ;;  %v3108_v47 = vld [vmem:[#allocation13_spill] sm:$0xff] }
 0x45f   :  { %1255 = vmatpush1.bf16.msra.mxu0 %v2380_v49  ;;  %1296 = vmatpush1.bf16.msra.mxu1 %v2385_v50  ;;  %v3109_v49 = vld [vmem:[#allocation14_spill] sm:$0xff] }
 0x460   :  { %1256 = vmatprep.subr.bf16.mxu0 %v2392_v51  ;;  %1297 = vmatprep.subr.bf16.mxu1 %v2399_v52 }
 0x463   :  { %1257 = vmatpush1.bf16.msra.mxu0 %v2411_v54  ;;  %1298 = vmatpush1.bf16.msra.mxu1 %v2416_v55 }
 0x464   :  { %1258 = vmatprep.subr.bf16.mxu0 %v2423_v56  ;;  %1299 = vmatprep.subr.bf16.mxu1 %v2428_v57 }
 0x467   :  { %1259 = vmatpush1.bf16.msra.mxu0 %v2435_v58  ;;  %1300 = vmatpush1.bf16.msra.mxu1 %v2440_v59 }
 0x468   :  { %1260 = vmatprep.subr.bf16.mxu0 %v2447_v60  ;;  %1301 = vmatprep.subr.bf16.mxu1 %v2452_v61 }
 0x46b   :  { %1261 = vmatpush1.bf16.msra.mxu0 %v2464_v63  ;;  %1302 = vmatpush1.bf16.msra.mxu1 %v2469_v0 }
 0x46c   :  { %1262 = vmatprep.subr.bf16.mxu0 %v2476_v2  ;;  %1303 = vmatprep.subr.bf16.mxu1 %v2481_v3 }
 0x46f   :  { %1263 = vmatpush1.bf16.msra.mxu0 %v2488_v4  ;;  %1304 = vmatpush1.bf16.msra.mxu1 %v2493_v5 }
 0x470   :  { %1366 = vmatprep.subr.bf16.mxu0 %v2788_v36  ;;  %1407 = vmatprep.subr.bf16.mxu1 %v2794_v37 }
 0x525   :  { %v1164_v38 = vpop.f32.mrb[32].mxu0  ;;  %v1205_v39 = vpop.f32.mrb[32].mxu1 }
 0x526   :  { %v1212_v41 = vadd.f32 %v1164_v38, %v3106_v40  ;;  %v1214_v43 = vadd.f32 %v1205_v39, %v3107_v42  ;;  %v1166_v45 = vpop.f32.mrb[33].mxu0  ;;  %v1207_v46 = vpop.f32.mrb[33].mxu1  ;;  %v2894_v38 = vld [vmem:[%s3070_s2 + $0x84] ss:$16 sps:$4 sm:$0xff]   ;;  %v2900_v39 = vld [vmem:[%s3070_s2 + $0x8c] ss:$16 sps:$4 sm:$0xff]  }
 0x527   :  { %v1213_v48 = vadd.f32 %v1166_v45, %v3108_v47  ;;  %v1215_v50 = vadd.f32 %v1207_v46, %v3109_v49  ;;  %v1168_v51 = vpop.f32.mrb[34].mxu0  ;;  %v1209_v52 = vpop.f32.mrb[34].mxu1  ;;  %v2906_v40 = vld [vmem:[%s3070_s2 + $0x80] ss:$16 sps:$4 sm:$0xff]  }
 0x528   :  { %v1792_v54 = vmul.f32 -1.442695, %v1212_v41  ;;  %v1169_v55 = vpop.f32.mrb[35].mxu0  ;;  %v1210_v6 = vpop.f32.mrb[35].mxu1  ;;  %v2912_v41 = vld [vmem:[%s3070_s2 + $0x88] ss:$16 sps:$4 sm:$0xff]  }
 0x529   :  { %v1793_v14 = vmul.f32 -1.442695, %v1213_v48  ;;  %v1794_v16 = vmul.f32 -1.442695, %v1215_v50  ;;  %v3112_v42 = vld [vmem:[#allocation17_spill] sm:$0xff] }
 0x52a   :  { %2050 = vpow2.f32 %v1792_v54 }
 0x52b   :  { %2052 = vpow2.f32 %v1793_v14 }
 0x52c   :  { %2054 = vpow2.f32 %v1794_v16 }
 0x52d   :  { %2056 = vtanh.f32 %v1214_v43  ;;  %v3113_v43 = vld [vmem:[#allocation18_spill] sm:$0xff] }
 0x534   :  { %v2051_v18 = vpop.eup %2050 }
 0x535   :  { %v2053_v17 = vpop.eup %2052  ;;  %v1219_v19 = vadd.f32 1.0, %v2051_v18 }
 0x536   :  { %v1225_v1 = vadd.f32 1.0, %v2053_v17  ;;  %v2055_v20 = vpop.eup %2054 }
 0x537   :  { %2058 = vrcp.f32 %v1219_v19  ;;  %v2057_v21 = vpop.eup %2056  ;;  %v1232_v26 = vadd.f32 1.0, %v2055_v20 }
 0x538   :  { %2060 = vrcp.f32 %v1225_v1 }
 0x539   :  { %2062 = vrcp.f32 %v1232_v26  ;;  %v2144_v26 = vld [vmem:[%s3070_s2 + $0xc4] ss:$16 sps:$4 sm:$0xff]  }
 0x541   :  { %v2059_v30 = vpop.eup %2058 }
 0x542   :  { %v2061_v10 = vpop.eup %2060  ;;  %v1236_v24 = vmul.f32 %v2059_v30, %v2057_v21  ;;  %v2141_v30 = vld [vmem:[%s3070_s2 + $0xac] ss:$16 sps:$4 sm:$0xff]  }
 0x543   :  { %v1235_v28 = vmul.f32 %v2061_v10, %v2750_v8  ;;  %v2063_v33 = vpop.eup %2062  ;;  %v2864_v8 = vld [vmem:[%s3070_s2 + $0x48] ss:$16 sps:$4 sm:$0xff]   ;;  %v2142_v10 = vld [vmem:[%s3070_s2 + $0xa0] ss:$16 sps:$4 sm:$0xff]  }
 0x545   :  { %v2802_v7 = vadd.f32 %v1236_v24, %v1235_v28  ;;  %v2143_v24 = vld [vmem:[%s3070_s2 + $0xa8] ss:$16 sps:$4 sm:$0xff]   ;;  %v2145_v28 = vld [vmem:[%s3070_s2 + $0xcc] ss:$16 sps:$4 sm:$0xff]  }
 0x547   :  { %2064 = vtanh.f32 %v2802_v7 }
 0x551   :  { %v2065_v34 = vpop.eup %2064 }
 0x552   :  { %v1239_v32 = vmul.f32 %v2065_v34, %v2063_v33  ;;  %v2147_v33 = vld [vmem:[%s3070_s2 + $0xc8] ss:$16 sps:$4 sm:$0xff]   ;;  %v2148_v34 = vld [vmem:[%s3070_s2 + $0xe4] ss:$16 sps:$4 sm:$0xff]  }
 0x554   :  { %v1247_v44 = vpack.c.bf16 %v1239_v32, %v1239_v32  ;;  %v2149_v32 = vld [vmem:[%s3070_s2 + $0xec] ss:$16 sps:$4 sm:$0xff]  }
 0x556   :  { %1281 = vmatmul.mubr.bf16.vlgmr.msra.gmra.mrb[36].mxu0 %v1247_v44  ;;  %1322 = vmatmul.mubr.bf16.vlgmr.msra.gmra.mrb[36].mxu1 %v1247_v44  ;;  %v2150_v44 = vld [vmem:[%s3070_s2 + $0xe0] ss:$16 sps:$4 sm:$0xff]  }
 0x557   :  { %1367 = vmatpush1.bf16.msra.mxu0 %v2808_v62  ;;  %1408 = vmatpush1.bf16.msra.mxu1 %v2814_v29 }
 0x558   :  { %1368 = vmatprep.subr.bf16.mxu0 %v2820_v27  ;;  %1409 = vmatprep.subr.bf16.mxu1 %v2826_v12 }
 0x559   :  { %1398 = vmatprep.mubr.bf16.mxu0 %v3100_v23  ;;  %1439 = vmatprep.mubr.bf16.mxu1 %v3100_v23 }
 0x55b   :  { %1369 = vmatpush1.bf16.msra.mxu0 %v2834_v53  ;;  %1410 = vmatpush1.bf16.msra.mxu1 %v2840_v11 }
 0x55c   :  { %1370 = vmatprep.subr.bf16.mxu0 %v2846_v22  ;;  %1411 = vmatprep.subr.bf16.mxu1 %v2852_v9 }
 0x55f   :  { %1371 = vmatpush1.bf16.msra.mxu0 %v2858_v13  ;;  %1412 = vmatpush1.bf16.msra.mxu1 %v2864_v8 }
 0x560   :  { %1372 = vmatprep.subr.bf16.mxu0 %v2870_v25  ;;  %1413 = vmatprep.subr.bf16.mxu1 %v2876_v31 }
 0x563   :  { %1373 = vmatpush1.bf16.msra.mxu0 %v2882_v35  ;;  %1414 = vmatpush1.bf16.msra.mxu1 %v2888_v15 }
 0x564   :  { %1374 = vmatprep.subr.bf16.mxu0 %v2894_v38  ;;  %1415 = vmatprep.subr.bf16.mxu1 %v2900_v39 }
 0x567   :  { %1375 = vmatpush1.bf16.msra.mxu0 %v2906_v40  ;;  %1416 = vmatpush1.bf16.msra.mxu1 %v2912_v41 }
 0x568   :  { %1376 = vmatprep.subr.bf16.mxu0 %v2423_v56  ;;  %1417 = vmatprep.subr.bf16.mxu1 %v2428_v57 }
 0x56b   :  { %1377 = vmatpush1.bf16.msra.mxu0 %v2435_v58  ;;  %1418 = vmatpush1.bf16.msra.mxu1 %v2440_v59  ;;  %v3110_v58 = vld [vmem:[#allocation15_spill] sm:$0xff] }
 0x56c   :  { %1378 = vmatprep.subr.bf16.mxu0 %v2447_v60  ;;  %1419 = vmatprep.subr.bf16.mxu1 %v2452_v61  ;;  %v3111_v60 = vld [vmem:[#allocation16_spill] sm:$0xff] }
 0x56f   :  { %1379 = vmatpush1.bf16.msra.mxu0 %v2464_v63  ;;  %1420 = vmatpush1.bf16.msra.mxu1 %v2469_v0 }
 0x570   :  { %1380 = vmatprep.subr.bf16.mxu0 %v2476_v2  ;;  %1421 = vmatprep.subr.bf16.mxu1 %v2481_v3 }
 0x573   :  { %1381 = vmatpush1.bf16.msra.mxu0 %v2488_v4  ;;  %1422 = vmatpush1.bf16.msra.mxu1 %v2493_v5 }
 0x574   :  { %1484 = vmatprep.subr.bf16.mxu0 %v2788_v36  ;;  %1525 = vmatprep.subr.bf16.mxu1 %v2794_v37 }
 0x629   :  { %v1282_v56 = vpop.f32.mrb[36].mxu0  ;;  %v1323_v57 = vpop.f32.mrb[36].mxu1 }
 0x62a   :  { %v1330_v59 = vadd.f32 %v1282_v56, %v3110_v58  ;;  %v1332_v61 = vadd.f32 %v1323_v57, %v3111_v60  ;;  %v1284_v63 = vpop.f32.mrb[37].mxu0  ;;  %v1325_v0 = vpop.f32.mrb[37].mxu1 }
 0x62b   :  { %v1331_v2 = vadd.f32 %v1284_v63, %v3112_v42  ;;  %v1333_v3 = vadd.f32 %v1325_v0, %v3113_v43  ;;  %v1286_v45 = vpop.f32.mrb[38].mxu0  ;;  %v1327_v4 = vpop.f32.mrb[38].mxu1 }
 0x62c   :  { %v1795_v46 = vmul.f32 -1.442695, %v1330_v59  ;;  %v1287_v5 = vpop.f32.mrb[39].mxu0  ;;  %v1328_v47 = vpop.f32.mrb[39].mxu1 }
 0x62d   :  { %v1796_v36 = vmul.f32 -1.442695, %v1331_v2  ;;  %v1797_v37 = vmul.f32 -1.442695, %v1333_v3 }
 0x62e   :  { %2066 = vpow2.f32 %v1795_v46 }
 0x62f   :  { %2068 = vpow2.f32 %v1796_v36 }
 0x630   :  { %2070 = vpow2.f32 %v1797_v37 }
 0x631   :  { %2072 = vtanh.f32 %v1332_v61 }
 0x638   :  { %v2067_v48 = vpop.eup %2066 }
 0x639   :  { %v2069_v49 = vpop.eup %2068  ;;  %v1337_v50 = vadd.f32 1.0, %v2067_v48  ;;  %v1600_v48 = vld [vmem:[%s3072_s4] sm:$0xff] }
 0x63a   :  { %v1343_v51 = vadd.f32 1.0, %v2069_v49  ;;  %v2071_v52 = vpop.eup %2070  ;;  %v1601_v49 = vld [vmem:[%s3072_s4 + $0x8] sm:$0xff] }
 0x63b   :  { %2074 = vrcp.f32 %v1337_v50  ;;  %v2073_v54 = vpop.eup %2072  ;;  %v1350_v16 = vadd.f32 1.0, %v2071_v52  ;;  %v1859_v50 = vpack.c.bf16 %v1601_v49, %v1600_v48  ;;  %v1603_v52 = vld [vmem:[%s3072_s4 + $0x18] sm:$0xff] }
 0x63c   :  { %2076 = vrcp.f32 %v1343_v51  ;;  %v1602_v51 = vld [vmem:[%s3072_s4 + $0x10] sm:$0xff] }
 0x63d   :  { %2078 = vrcp.f32 %v1350_v16  ;;  %v1606_v16 = vld [vmem:[%s3072_s4 + $0x30] sm:$0xff] }
 0x645   :  { %v2075_v55 = vpop.eup %2074 }
 0x646   :  { %v2077_v6 = vpop.eup %2076  ;;  %v1354_v14 = vmul.f32 %v2075_v55, %v2073_v54  ;;  %v1862_v54 = vpack.c.bf16 %v1603_v52, %v1602_v51  ;;  %v1604_v55 = vld [vmem:[%s3072_s4 + $0x20] sm:$0xff] }
 0x647   :  { %v1353_v18 = vmul.f32 %v2077_v6, %v2802_v7  ;;  %v2079_v19 = vpop.eup %2078  ;;  %v2146_v7 = vld [vmem:[%s3070_s2 + $0xc0] ss:$16 sps:$4 sm:$0xff]   ;;  %v1605_v6 = vld [vmem:[%s3072_s4 + $0x28] sm:$0xff] }
 0x649   :  { %v2934_v17 = vadd.f32 %v1354_v14, %v1353_v18  ;;  %v1865_v14 = vpack.c.bf16 %v1605_v6, %v1604_v55  ;;  %v1607_v18 = vld [vmem:[%s3072_s4 + $0x38] sm:$0xff] }
 0x64b   :  { %2080 = vtanh.f32 %v2934_v17 }
 0x655   :  { %v2081_v1 = vpop.eup %2080 }
 0x656   :  { %v1357_v20 = vmul.f32 %v2081_v1, %v2079_v19  ;;  %v1608_v19 = vld [vmem:[%s3072_s4 + $0x40] sm:$0xff]  ;;  %v1609_v1 = vld [vmem:[%s3072_s4 + $0x48] sm:$0xff] }
 0x658   :  { %v1365_v21 = vpack.c.bf16 %v1357_v20, %v1357_v20  ;;  %v1871_v20 = vpack.c.bf16 %v1609_v1, %v1608_v19 }
 0x65a   :  { %1399 = vmatmul.mubr.bf16.vlgmr.msra.gmra.mrb[40].mxu0 %v1365_v21  ;;  %1440 = vmatmul.mubr.bf16.vlgmr.msra.gmra.mrb[40].mxu1 %v1365_v21  ;;  %v1610_v21 = vld [vmem:[%s3072_s4 + $0x50] sm:$0xff] }
 0x65b   :  { %1485 = vmatpush1.bf16.msra.mxu0 %v2808_v62  ;;  %1526 = vmatpush1.bf16.msra.mxu1 %v2814_v29  ;;  %v2151_v62 = vld [vmem:[%s3070_s2 + $0xe8] ss:$16 sps:$4 sm:$0xff]   ;;  %v3114_v29 = vmov 0.0|0.0  }
 0x65c   :  { %1486 = vmatprep.subr.bf16.mxu0 %v2820_v27  ;;  %1527 = vmatprep.subr.bf16.mxu1 %v2826_v12 }
 0x65d   :  { %1516 = vmatprep.mubr.bf16.mxu0 %v3100_v23  ;;  %1557 = vmatprep.mubr.bf16.mxu1 %v3100_v23  ;;  %v2140_v23 = vld [vmem:[%s3070_s2 + $0xa4] ss:$16 sps:$4 sm:$0xff]  }
 0x65f   :  { %1487 = vmatpush1.bf16.msra.mxu0 %v2834_v53  ;;  %1528 = vmatpush1.bf16.msra.mxu1 %v2840_v11  ;;  %v3115_v53 = vld [vmem:[#allocation19_spill] sm:$0xff] }
 0x660   :  { %1488 = vmatprep.subr.bf16.mxu0 %v2846_v22  ;;  %1529 = vmatprep.subr.bf16.mxu1 %v2852_v9  ;;  %v3116_v22 = vld [vmem:[#allocation20_spill] sm:$0xff] }
 0x663   :  { %1489 = vmatpush1.bf16.msra.mxu0 %v2858_v13  ;;  %1530 = vmatpush1.bf16.msra.mxu1 %v2864_v8 }
 0x664   :  { %1490 = vmatprep.subr.bf16.mxu0 %v2870_v25  ;;  %1531 = vmatprep.subr.bf16.mxu1 %v2876_v31  ;;  %v3117_v25 = vld [vmem:[#allocation21_spill] sm:$0xff] }
 0x667   :  { %1491 = vmatpush1.bf16.msra.mxu0 %v2882_v35  ;;  %1532 = vmatpush1.bf16.msra.mxu1 %v2888_v15  ;;  %v3118_v35 = vld [vmem:[#allocation22_spill] sm:$0xff] }
 0x668   :  { %1492 = vmatprep.subr.bf16.mxu0 %v2894_v38  ;;  %1533 = vmatprep.subr.bf16.mxu1 %v2900_v39 }
 0x66b   :  { %1493 = vmatpush1.bf16.msra.mxu0 %v2906_v40  ;;  %1534 = vmatpush1.bf16.msra.mxu1 %v2912_v41 }
 0x66c   :  { %1494 = vmatprep.subr.bf16.mxu0 %v2140_v23  ;;  %1535 = vmatprep.subr.bf16.mxu1 %v2141_v30  ;;  %v1611_v23 = vld [vmem:[%s3072_s4 + $0x58] sm:$0xff] }
 0x66d   :  { %v1874_v30 = vpack.c.bf16 %v1611_v23, %v1610_v21 }
 0x66f   :  { %1495 = vmatpush1.bf16.msra.mxu0 %v2142_v10  ;;  %1536 = vmatpush1.bf16.msra.mxu1 %v2143_v24  ;;  %v1612_v10 = vld [vmem:[%s3072_s4 + $0x60] sm:$0xff]  ;;  %v1613_v24 = vld [vmem:[%s3072_s4 + $0x68] sm:$0xff] }
 0x670   :  { %1496 = vmatprep.subr.bf16.mxu0 %v2144_v26  ;;  %1537 = vmatprep.subr.bf16.mxu1 %v2145_v28  ;;  %v1877_v26 = vpack.c.bf16 %v1613_v24, %v1612_v10  ;;  %v2155_v28 = vmov 0.0  }
 0x673   :  { %1497 = vmatpush1.bf16.msra.mxu0 %v2146_v7  ;;  %1538 = vmatpush1.bf16.msra.mxu1 %v2147_v33  ;;  %v1614_v7 = vld [vmem:[%s3072_s4 + $0x70] sm:$0xff]  ;;  %v1615_v33 = vld [vmem:[%s3072_s4 + $0x78] sm:$0xff] }
 0x674   :  { %1498 = vmatprep.subr.bf16.mxu0 %v2148_v34  ;;  %1539 = vmatprep.subr.bf16.mxu1 %v2149_v32  ;;  %v1880_v34 = vpack.c.bf16 %v1615_v33, %v1614_v7  ;;  %v11_v32 = vstv %s3073_s5 }
 0x675   :  { %12 = vst [vmem:[#allocation5] sm:$0x1] %v11_v32 }
 0x677   :  { %1499 = vmatpush1.bf16.msra.mxu0 %v2150_v44  ;;  %1540 = vmatpush1.bf16.msra.mxu1 %v2151_v62 }
 0x678   :  { %1858 = vmatprep.subr.bf16.mxu0 %v3114_v29 }
 0x72d   :  { %v1400_v27 = vpop.f32.mrb[40].mxu0  ;;  %v1441_v12 = vpop.f32.mrb[40].mxu1 }
 0x72e   :  { %v1448_v11 = vadd.f32 %v1400_v27, %v3115_v53  ;;  %v1450_v9 = vadd.f32 %v1441_v12, %v3116_v22  ;;  %v1402_v13 = vpop.f32.mrb[41].mxu0  ;;  %v1443_v8 = vpop.f32.mrb[41].mxu1  ;;  %v3119_v27 = vld [vmem:[#allocation23_spill] sm:$0xff]  ;;  %v3120_v53 = vld [vmem:[#allocation24_spill] sm:$0xff] }
 0x72f   :  { %v1449_v31 = vadd.f32 %v1402_v13, %v3117_v25  ;;  %v1451_v15 = vadd.f32 %v1443_v8, %v3118_v35  ;;  %v1404_v38 = vpop.f32.mrb[42].mxu0  ;;  %v1445_v39 = vpop.f32.mrb[42].mxu1  ;;  %v3121_v13 = vld [vmem:[#allocation25_spill] sm:$0xff]  ;;  %v3122_v25 = vld [vmem:[#allocation26_spill] sm:$0xff] }
 0x730   :  { %v1798_v40 = vmul.f32 -1.442695, %v1448_v11  ;;  %v1405_v41 = vpop.f32.mrb[43].mxu0  ;;  %v1446_v56 = vpop.f32.mrb[43].mxu1 }
 0x731   :  { %v1799_v57 = vmul.f32 -1.442695, %v1449_v31  ;;  %v1800_v58 = vmul.f32 -1.442695, %v1451_v15 }
 0x732   :  { %2082 = vpow2.f32 %v1798_v40 }
 0x733   :  { %2084 = vpow2.f32 %v1799_v57 }
 0x734   :  { %2086 = vpow2.f32 %v1800_v58 }
 0x735   :  { %2088 = vtanh.f32 %v1450_v9 }
 0x73c   :  { %v2083_v59 = vpop.eup %2082 }
 0x73d   :  { %v2085_v60 = vpop.eup %2084  ;;  %v1455_v61 = vadd.f32 1.0, %v2083_v59 }
 0x73e   :  { %v1461_v63 = vadd.f32 1.0, %v2085_v60  ;;  %v2087_v0 = vpop.eup %2086 }
 0x73f   :  { %2090 = vrcp.f32 %v1455_v61  ;;  %v2089_v42 = vpop.eup %2088  ;;  %v1468_v45 = vadd.f32 1.0, %v2087_v0 }
 0x740   :  { %2092 = vrcp.f32 %v1461_v63 }
 0x741   :  { %2094 = vrcp.f32 %v1468_v45 }
 0x749   :  { %v2091_v2 = vpop.eup %2090 }
 0x74a   :  { %v2093_v43 = vpop.eup %2092  ;;  %v1472_v3 = vmul.f32 %v2091_v2, %v2089_v42 }
 0x74b   :  { %v1471_v4 = vmul.f32 %v2093_v43, %v2934_v17  ;;  %v2095_v5 = vpop.eup %2094  ;;  %v1868_v17 = vpack.c.bf16 %v1607_v18, %v1606_v16 }
 0x74d   :  { %v2999_v46 = vadd.f32 %v1472_v3, %v1471_v4 }
 0x74f   :  { %2096 = vtanh.f32 %v2999_v46 }
 0x759   :  { %v2097_v47 = vpop.eup %2096 }
 0x75a   :  { %v1475_v36 = vmul.f32 %v2097_v47, %v2095_v5 }
 0x75c   :  { %v1483_v37 = vpack.c.bf16 %v1475_v36, %v1475_v36  ;;  %v1804_v36 = vld [vmem:[#allocation5] ss:$0 sm:$0xff] }
 0x75e   :  { %1517 = vmatmul.mubr.bf16.vlgmr.msra.gmra.mrb[44].mxu0 %v1483_v37  ;;  %1558 = vmatmul.mubr.bf16.vlgmr.msra.gmra.mrb[44].mxu1 %v1483_v37 }
 0x75f   :  { %1860 = vmatpush3.bf16.msra.mxu0 %v1859_v50  ;;  %1855 = vmatprep.mubr.msk.f32.mxu0 %vm2154_vm0, %v2155_v28 }
 0x760   :  { %1861 = vmatprep.subr.bf16.mxu0 %v3114_v29 }
 0x763   :  { %1863 = vmatpush3.bf16.msra.mxu0 %v1862_v54 }
 0x764   :  { %1864 = vmatprep.subr.bf16.mxu0 %v3114_v29 }
 0x767   :  { %1866 = vmatpush3.bf16.msra.mxu0 %v1865_v14 }
 0x768   :  { %1867 = vmatprep.subr.bf16.mxu0 %v3114_v29 }
 0x76b   :  { %1869 = vmatpush3.bf16.msra.mxu0 %v1868_v17 }
 0x76c   :  { %1870 = vmatprep.subr.bf16.mxu0 %v3114_v29 }
 0x76f   :  { %1872 = vmatpush3.bf16.msra.mxu0 %v1871_v20 }
 0x770   :  { %1873 = vmatprep.subr.bf16.mxu0 %v3114_v29 }
 0x773   :  { %1875 = vmatpush3.bf16.msra.mxu0 %v1874_v30 }
 0x774   :  { %1876 = vmatprep.subr.bf16.mxu0 %v3114_v29 }
 0x777   :  { %1878 = vmatpush3.bf16.msra.mxu0 %v1877_v26 }
 0x778   :  { %1879 = vmatprep.subr.bf16.mxu0 %v3114_v29 }
 0x77b   :  { %1881 = vmatpush3.bf16.msra.mxu0 %v1880_v34 }
 0x831   :  { %v1518_v44 = vpop.f32.mrb[44].mxu0  ;;  %v1559_v62 = vpop.f32.mrb[44].mxu1 }
 0x832   :  { %v1566_v12 = vadd.f32 %v1518_v44, %v3119_v27  ;;  %v1568_v11 = vadd.f32 %v1559_v62, %v3120_v53  ;;  %v1520_v22 = vpop.f32.mrb[45].mxu0  ;;  %v1561_v9 = vpop.f32.mrb[45].mxu1 }
 0x833   :  { %v1567_v8 = vadd.f32 %v1520_v22, %v3121_v13  ;;  %v1569_v31 = vadd.f32 %v1561_v9, %v3122_v25  ;;  %v1522_v35 = vpop.f32.mrb[46].mxu0  ;;  %v1563_v29 = vpop.f32.mrb[46].mxu1 }
 0x834   :  { %v1801_v15 = vmul.f32 -1.442695, %v1566_v12  ;;  %v1523_v38 = vpop.f32.mrb[47].mxu0  ;;  %v1564_v39 = vpop.f32.mrb[47].mxu1 }
 0x835   :  { %v1802_v40 = vmul.f32 -1.442695, %v1567_v8  ;;  %v1803_v41 = vmul.f32 -1.442695, %v1569_v31 }
 0x836   :  { %2098 = vpow2.f32 %v1801_v15 }
 0x837   :  { %2100 = vpow2.f32 %v1802_v40 }
 0x838   :  { %2102 = vpow2.f32 %v1803_v41 }
 0x839   :  { %2104 = vtanh.f32 %v1568_v11 }
 0x840   :  { %v2099_v56 = vpop.eup %2098 }
 0x841   :  { %v2101_v57 = vpop.eup %2100  ;;  %v1573_v58 = vadd.f32 1.0, %v2099_v56 }
 0x842   :  { %v1579_v59 = vadd.f32 1.0, %v2101_v57  ;;  %v2103_v60 = vpop.eup %2102 }
 0x843   :  { %2106 = vrcp.f32 %v1573_v58  ;;  %v2105_v61 = vpop.eup %2104  ;;  %v1586_v2 = vadd.f32 1.0, %v2103_v60 }
 0x844   :  { %2108 = vrcp.f32 %v1579_v59 }
 0x845   :  { %2110 = vrcp.f32 %v1586_v2 }
 0x84d   :  { %v2107_v63 = vpop.eup %2106 }
 0x84e   :  { %v2109_v0 = vpop.eup %2108  ;;  %v1590_v42 = vmul.f32 %v2107_v63, %v2105_v61 }
 0x84f   :  { %v1589_v43 = vmul.f32 %v2109_v0, %v2999_v46  ;;  %v2111_v45 = vpop.eup %2110 }
 0x851   :  { %v1591_v3 = vadd.f32 %v1590_v42, %v1589_v43 }
 0x853   :  { %2112 = vtanh.f32 %v1591_v3 }
 0x85d   :  { %v2113_v4 = vpop.eup %2112 }
 0x85e   :  { %v1593_v5 = vmul.f32 %v2113_v4, %v2111_v45 }
 0x860   :  { %2114 = vtanh.f32 %v1593_v5 }
 0x86a   :  { %v2115_v47 = vpop.eup %2114 }
 0x86b   :  { %1856 = vmatmul.mubr.f32.vlgmr.msra.gmra.mrb[48].mxu0 %v2115_v47 }
 0x93e   :  { %v1689_v37 = vpop.f32.mrb[48].mxu0 }
 0x93f   :  { %v1690_v48 = vadd.f32 %v1804_v36, %v1689_v37  ;;  %v1857_v49 = vpop.f32.mrb[49].mxu0 }
 0x941   :  { %v1805_v50 = vmul.f32 -1.442695, %v1690_v48 }
 0x943   :  { %2116 = vpow2.f32 %v1805_v50 }
 0x94d   :  { %v2117_v51 = vpop.eup %2116 }
 0x94e   :  { %v1696_v52 = vadd.f32 1.0, %v2117_v51 }
 0x950   :  { %2118 = vrcp.f32 %v1696_v52 }
 0x95a   :  { %v2119_v46 = vpop.eup %2118 }
 0x95b   :  { %1700 = vst.msk [vmem:[%s3074_s6] sm:$0xff] %vm1699_vm1, %v2119_v46 }

// kernel: _lambda_.2
= control target key start
LH: loop header
LB: loop body
LE: loop exit
PB: predicated region body
PF: predicated region fallthrough
CT: control target
= control target key end

     0   :  { %v4326_v1 = vmov 0   ;;  %vm98_vm0 = vcmask 130048   ;;  %v3478_v41 = vmov 0.0|0.0   ;;  %v38_v42 = vlaneseq  ;;  %s4321_s1 = inlined_call_operand.vmem [shape: bf16[16,512], index: 1, kind: input, shape index: {}]   ;;  %s4322_s0 = inlined_call_operand.vmem [shape: bf16[64,16], index: 0, kind: input, shape index: {}]   ;;  %s4323_s2 = inlined_call_operand.vmem [shape: bf16[128,512], index: 2, kind: input, shape index: {}]   ;;  %s4324_s3 = inlined_call_operand.vmem [shape: f32[1,512], index: 3, kind: input, shape index: {}]   ;;  %s4325_s4 = inlined_call_operand.vmem [shape: bf16[64,128], index: 4, kind: output, shape index: {}]  }
   0x1   :  { %v3227_v0 = vld [vmem:[%s4321_s1 + $0x4] ss:$16 sps:$4 sm:$0xff]   ;;  %143 = vmatprep.mubr.bf16.mxu0 %v4326_v1  ;;  %216 = vmatprep.mubr.bf16.mxu1 %v4326_v1  ;;  %v3229_v2 = vld [vmem:[%s4321_s1 + $0xc] ss:$16 sps:$4 sm:$0xff]   ;;  %v3231_v3 = vld [vmem:[%s4321_s1] ss:$16 sps:$4 sm:$0xff]  }
   0x2   :  { %111 = vmatprep.subr.bf16.mxu0 %v3227_v0  ;;  %v3232_v4 = vld [vmem:[%s4321_s1 + $0x8] ss:$16 sps:$4 sm:$0xff]   ;;  %184 = vmatprep.subr.bf16.mxu1 %v3229_v2  ;;  %v3233_v5 = vld [vmem:[%s4322_s0] sm:$0xff]   ;;  %v3540_v9 = vld [vmem:[%s4323_s2 + $0xc] ss:$16 sps:$4 sm:$0xff]   ;;  %v39_v43 = vshrl.u32 %v38_v42, 7 }
   0x3   :  { %112 = vmatpush1.bf16.msra.mxu0 %v3231_v3  ;;  %185 = vmatpush1.bf16.msra.mxu1 %v3232_v4  ;;  %v3524_v6 = vld [vmem:[%s4323_s2] ss:$16 sps:$4 sm:$0xff]   ;;  %v3529_v7 = vld [vmem:[%s4323_s2 + $0x4] ss:$16 sps:$4 sm:$0xff]   ;;  %v3534_v8 = vld [vmem:[%s4323_s2 + $0x8] ss:$16 sps:$4 sm:$0xff]  }
   0x4   :  { %491 = vmatprep.subr.bf16.mxu0 %v3529_v7  ;;  %v3547_v10 = vld [vmem:[%s4323_s2 + $0x24] ss:$16 sps:$4 sm:$0xff]   ;;  %532 = vmatprep.subr.bf16.mxu1 %v3540_v9  ;;  %v3554_v11 = vld [vmem:[%s4323_s2 + $0x20] ss:$16 sps:$4 sm:$0xff]   ;;  %v3559_v12 = vld [vmem:[%s4323_s2 + $0x2c] ss:$16 sps:$4 sm:$0xff]  }
   0x5   :  { %v3566_v13 = vld [vmem:[%s4323_s2 + $0x28] ss:$16 sps:$4 sm:$0xff]   ;;  %v3577_v15 = vld [vmem:[%s4323_s2 + $0x44] ss:$16 sps:$4 sm:$0xff]   ;;  %v3583_v16 = vld [vmem:[%s4323_s2 + $0x40] ss:$16 sps:$4 sm:$0xff]  }
   0x6   :  { %2872 = vmatmul.mubr.msk.bf16.vlgmr.msra.gmra.mrb[0].mxu0 %vm98_vm0, %v3233_v5  ;;  %2876 = vmatmul.mubr.msk.bf16.vlgmr.msra.gmra.mrb[0].mxu1 %vm98_vm0, %v3233_v5  ;;  %v3246_v14 = vld [vmem:[%s4322_s0 + $0x8] sm:$0xff]   ;;  %v3600_v19 = vld [vmem:[%s4323_s2 + $0x64] ss:$16 sps:$4 sm:$0xff]   ;;  %v3614_v21 = vld [vmem:[%s4323_s2 + $0x60] ss:$16 sps:$4 sm:$0xff]   ;;  %v48_v44 = vsub.s32 2, %v39_v43 }
   0x7   :  { %492 = vmatpush1.bf16.msra.mxu0 %v3524_v6  ;;  %533 = vmatpush1.bf16.msra.mxu1 %v3534_v8  ;;  %v3588_v17 = vld [vmem:[%s4323_s2 + $0x4c] ss:$16 sps:$4 sm:$0xff]   ;;  %v3595_v18 = vld [vmem:[%s4323_s2 + $0x48] ss:$16 sps:$4 sm:$0xff]   ;;  %v3627_v23 = vld [vmem:[%s4323_s2 + $0x84] ss:$16 sps:$4 sm:$0xff]  }
   0x8   :  { %493 = vmatprep.subr.bf16.mxu0 %v3547_v10  ;;  %534 = vmatprep.subr.bf16.mxu1 %v3559_v12  ;;  %v3608_v20 = vld [vmem:[%s4323_s2 + $0x6c] ss:$16 sps:$4 sm:$0xff]   ;;  %v3622_v22 = vld [vmem:[%s4323_s2 + $0x68] ss:$16 sps:$4 sm:$0xff]   ;;  %v3259_v25 = vld [vmem:[%s4322_s0 + $0x10] sm:$0xff]   ;;  %v52_v45 = vsub.s32 3, %v39_v43 }
   0x9   :  { %153 = vmatprep.mubr.bf16.mxu0 %v4326_v1  ;;  %226 = vmatprep.mubr.bf16.mxu1 %v4326_v1  ;;  %v3634_v24 = vld [vmem:[%s4323_s2 + $0x8c] ss:$16 sps:$4 sm:$0xff]   ;;  %v3643_v26 = vld [vmem:[%s4323_s2 + $0x80] ss:$16 sps:$4 sm:$0xff]   ;;  %v3650_v27 = vld [vmem:[%s4323_s2 + $0x88] ss:$16 sps:$4 sm:$0xff]  }
   0xa   :  { %v3655_v28 = vld [vmem:[%s4323_s2 + $0xa4] ss:$16 sps:$4 sm:$0xff]   ;;  %v3661_v29 = vld [vmem:[%s4323_s2 + $0xac] ss:$16 sps:$4 sm:$0xff]   ;;  %v3668_v30 = vld [vmem:[%s4323_s2 + $0xa0] ss:$16 sps:$4 sm:$0xff]  }
   0xb   :  { %494 = vmatpush1.bf16.msra.mxu0 %v3554_v11  ;;  %535 = vmatpush1.bf16.msra.mxu1 %v3566_v13  ;;  %v3674_v31 = vld [vmem:[%s4323_s2 + $0xa8] ss:$16 sps:$4 sm:$0xff]   ;;  %v3685_v33 = vld [vmem:[%s4323_s2 + $0xc4] ss:$16 sps:$4 sm:$0xff]   ;;  %v3692_v34 = vld [vmem:[%s4323_s2 + $0xc0] ss:$16 sps:$4 sm:$0xff]  }
   0xc   :  { %495 = vmatprep.subr.bf16.mxu0 %v3577_v15  ;;  %536 = vmatprep.subr.bf16.mxu1 %v3588_v17  ;;  %v3272_v32 = vld [vmem:[%s4322_s0 + $0x18] sm:$0xff]   ;;  %v3707_v37 = vld [vmem:[%s4323_s2 + $0xe4] ss:$16 sps:$4 sm:$0xff]   ;;  %v3721_v39 = vld [vmem:[%s4323_s2 + $0xe0] ss:$16 sps:$4 sm:$0xff]   ;;  %v40_v46 = vsub.s32 0, %v39_v43 }
   0xd   :  { %v3697_v35 = vld [vmem:[%s4323_s2 + $0xcc] ss:$16 sps:$4 sm:$0xff]   ;;  %v3702_v36 = vld [vmem:[%s4323_s2 + $0xc8] ss:$16 sps:$4 sm:$0xff]   ;;  %v36_v47 = vld [vmem:[%s4324_s3] sm:$0xf] }
   0xe   :  { %2873 = vmatmul.mubr.msk.bf16.gmra.mrb[4].mxu0 %vm98_vm0, %v3246_v14  ;;  %2877 = vmatmul.mubr.msk.bf16.gmra.mrb[4].mxu1 %vm98_vm0, %v3246_v14  ;;  %v3713_v38 = vld [vmem:[%s4323_s2 + $0xec] ss:$16 sps:$4 sm:$0xff]   ;;  %v3728_v40 = vld [vmem:[%s4323_s2 + $0xe8] ss:$16 sps:$4 sm:$0xff]   ;;  %v44_v48 = vsub.s32 1, %v39_v43  ;;  %v3777_v49 = vrot.slane %v36_v47, %v48_v44  ;;  %v3783_v52 = vrot.slane %v36_v47, %v52_v45  ;;  %v41_v53 = vrot.slane %v36_v47, %v40_v46 }
   0xf   :  { %496 = vmatpush1.bf16.msra.mxu0 %v3583_v16  ;;  %163 = vmatprep.mubr.bf16.mxu0 %v4326_v1 }
  0x10   :  { %537 = vmatpush1.bf16.msra.mxu1 %v3595_v18  ;;  %497 = vmatprep.subr.bf16.mxu0 %v3600_v19  ;;  %v45_v56 = vrot.slane %v36_v47, %v44_v48 }
  0x11   :  { %538 = vmatprep.subr.bf16.mxu1 %v3608_v20  ;;  %236 = vmatprep.mubr.bf16.mxu1 %v4326_v1 }
  0x13   :  { %498 = vmatpush1.bf16.msra.mxu0 %v3614_v21 }
  0x14   :  { %539 = vmatpush1.bf16.msra.mxu1 %v3622_v22  ;;  %499 = vmatprep.subr.bf16.mxu0 %v3627_v23 }
  0x15   :  { %540 = vmatprep.subr.bf16.mxu1 %v3634_v24 }
  0x16   :  { %2874 = vmatmul.mubr.msk.bf16.gmra.mrb[8].mxu0 %vm98_vm0, %v3259_v25  ;;  %2878 = vmatmul.mubr.msk.bf16.gmra.mrb[8].mxu1 %vm98_vm0, %v3259_v25 }
  0x17   :  { %500 = vmatpush1.bf16.msra.mxu0 %v3643_v26  ;;  %173 = vmatprep.mubr.bf16.mxu0 %v4326_v1 }
  0x18   :  { %541 = vmatpush1.bf16.msra.mxu1 %v3650_v27  ;;  %501 = vmatprep.subr.bf16.mxu0 %v3655_v28 }
  0x19   :  { %542 = vmatprep.subr.bf16.mxu1 %v3661_v29  ;;  %246 = vmatprep.mubr.bf16.mxu1 %v4326_v1 }
  0x1b   :  { %502 = vmatpush1.bf16.msra.mxu0 %v3668_v30 }
  0x1c   :  { %543 = vmatpush1.bf16.msra.mxu1 %v3674_v31  ;;  %503 = vmatprep.subr.bf16.mxu0 %v3685_v33 }
  0x1d   :  { %544 = vmatprep.subr.bf16.mxu1 %v3697_v35 }
  0x1e   :  { %2875 = vmatmul.mubr.msk.bf16.gmra.mrb[12].mxu0 %vm98_vm0, %v3272_v32  ;;  %2879 = vmatmul.mubr.msk.bf16.gmra.mrb[12].mxu1 %vm98_vm0, %v3272_v32 }
  0x1f   :  { %504 = vmatpush1.bf16.msra.mxu0 %v3692_v34  ;;  %523 = vmatprep.mubr.bf16.mxu0 %v4326_v1 }
  0x20   :  { %545 = vmatpush1.bf16.msra.mxu1 %v3702_v36  ;;  %505 = vmatprep.subr.bf16.mxu0 %v3707_v37 }
  0x21   :  { %546 = vmatprep.subr.bf16.mxu1 %v3713_v38  ;;  %564 = vmatprep.mubr.bf16.mxu1 %v4326_v1 }
  0x23   :  { %506 = vmatpush1.bf16.msra.mxu0 %v3721_v39 }
  0x24   :  { %547 = vmatpush1.bf16.msra.mxu1 %v3728_v40  ;;  %802 = vmatprep.subr.bf16.mxu0 %v3529_v7 }
  0x25   :  { %843 = vmatprep.subr.bf16.mxu1 %v3540_v9 }
  0x26   :  { %524 = vmatmul.mubr.bf16.vlgmr.msra.gmra.mrb[16].mxu0 %v3478_v41 }
  0x27   :  { %565 = vmatmul.mubr.bf16.vlgmr.msra.gmra.mrb[16].mxu1 %v3478_v41  ;;  %803 = vmatpush1.bf16.msra.mxu0 %v3524_v6 }
  0x28   :  { %844 = vmatpush1.bf16.msra.mxu1 %v3534_v8  ;;  %804 = vmatprep.subr.bf16.mxu0 %v3547_v10 }
  0x29   :  { %845 = vmatprep.subr.bf16.mxu1 %v3559_v12  ;;  %834 = vmatprep.mubr.bf16.mxu0 %v4326_v1 }
  0x2a   :  { %875 = vmatprep.mubr.bf16.mxu1 %v4326_v1 }
  0x2b   :  { %805 = vmatpush1.bf16.msra.mxu0 %v3554_v11 }
  0x2c   :  { %846 = vmatpush1.bf16.msra.mxu1 %v3566_v13  ;;  %806 = vmatprep.subr.bf16.mxu0 %v3577_v15 }
  0x2d   :  { %847 = vmatprep.subr.bf16.mxu1 %v3588_v17 }
  0x2f   :  { %807 = vmatpush1.bf16.msra.mxu0 %v3583_v16 }
  0x30   :  { %848 = vmatpush1.bf16.msra.mxu1 %v3595_v18  ;;  %808 = vmatprep.subr.bf16.mxu0 %v3600_v19 }
  0x31   :  { %849 = vmatprep.subr.bf16.mxu1 %v3608_v20 }
  0x33   :  { %809 = vmatpush1.bf16.msra.mxu0 %v3614_v21 }
  0x34   :  { %850 = vmatpush1.bf16.msra.mxu1 %v3622_v22  ;;  %810 = vmatprep.subr.bf16.mxu0 %v3627_v23 }
  0x35   :  { %851 = vmatprep.subr.bf16.mxu1 %v3634_v24 }
  0x37   :  { %811 = vmatpush1.bf16.msra.mxu0 %v3643_v26 }
  0x38   :  { %852 = vmatpush1.bf16.msra.mxu1 %v3650_v27  ;;  %812 = vmatprep.subr.bf16.mxu0 %v3655_v28 }
  0x39   :  { %853 = vmatprep.subr.bf16.mxu1 %v3661_v29 }
  0x3b   :  { %813 = vmatpush1.bf16.msra.mxu0 %v3668_v30 }
  0x3c   :  { %854 = vmatpush1.bf16.msra.mxu1 %v3674_v31  ;;  %814 = vmatprep.subr.bf16.mxu0 %v3685_v33 }
  0x3d   :  { %855 = vmatprep.subr.bf16.mxu1 %v3697_v35 }
  0x3f   :  { %815 = vmatpush1.bf16.msra.mxu0 %v3692_v34 }
  0x40   :  { %856 = vmatpush1.bf16.msra.mxu1 %v3702_v36  ;;  %816 = vmatprep.subr.bf16.mxu0 %v3707_v37 }
  0x41   :  { %857 = vmatprep.subr.bf16.mxu1 %v3713_v38 }
  0x43   :  { %817 = vmatpush1.bf16.msra.mxu0 %v3721_v39 }
  0x44   :  { %858 = vmatpush1.bf16.msra.mxu1 %v3728_v40  ;;  %1114 = vmatprep.subr.bf16.mxu0 %v3529_v7 }
  0x45   :  { %1155 = vmatprep.subr.bf16.mxu1 %v3540_v9 }
  0xd9   :  { %v3779_v50 = vpop.f32.mrb[0].mxu0  ;;  %v3781_v51 = vpop.f32.mrb[0].mxu1 }
  0xda   :  { %v147_v54 = vpop.f32.mrb[1].mxu0  ;;  %v220_v55 = vpop.f32.mrb[1].mxu1 }
  0xdb   :  { %v149_v57 = vpop.f32.mrb[2].mxu0  ;;  %v222_v58 = vpop.f32.mrb[2].mxu1 }
  0xdc   :  { %v3785_v59 = vadd.f32 %v149_v57, %v41_v53  ;;  %v151_v60 = vpop.f32.mrb[3].mxu0  ;;  %v3788_v61 = vadd.f32 %v222_v58, %v3777_v49  ;;  %v224_v62 = vpop.f32.mrb[3].mxu1 }
  0xdd   :  { %v3790_v63 = vadd.f32 %v151_v60, %v45_v56  ;;  %v3793_v0 = vadd.f32 %v224_v62, %v3783_v52 }
  0xe1   :  { %v155_v2 = vpop.f32.mrb[4].mxu0  ;;  %v228_v3 = vpop.f32.mrb[4].mxu1 }
  0xe2   :  { %v3795_v4 = vadd.f32 %v155_v2, %v41_v53  ;;  %v157_v5 = vpop.f32.mrb[5].mxu0  ;;  %v3798_v14 = vadd.f32 %v228_v3, %v3777_v49  ;;  %v230_v25 = vpop.f32.mrb[5].mxu1 }
  0xe3   :  { %v3800_v32 = vadd.f32 %v157_v5, %v45_v56  ;;  %v159_v41 = vpop.f32.mrb[6].mxu0  ;;  %v3803_v42 = vadd.f32 %v230_v25, %v3783_v52  ;;  %v232_v43 = vpop.f32.mrb[6].mxu1 }
  0xe4   :  { %v3805_v44 = vadd.f32 %v159_v41, %v41_v53  ;;  %v161_v45 = vpop.f32.mrb[7].mxu0  ;;  %v3808_v46 = vadd.f32 %v232_v43, %v3777_v49  ;;  %v234_v47 = vpop.f32.mrb[7].mxu1 }
  0xe5   :  { %4328 = vst [vmem:[#allocation5_spill] sm:$0xff] %v3803_v42  ;;  %v3810_v48 = vadd.f32 %v161_v45, %v45_v56  ;;  %v3813_v57 = vadd.f32 %v234_v47, %v3783_v52 }
  0xe6   :  { %4329 = vst [vmem:[#allocation6_spill] sm:$0xff] %v3805_v44  ;;  %4330 = vst [vmem:[#allocation7_spill] sm:$0xff] %v3808_v46 }
  0xe7   :  { %4331 = vst [vmem:[#allocation8_spill] sm:$0xff] %v3810_v48  ;;  %4332 = vst [vmem:[#allocation9_spill] sm:$0xff] %v3813_v57 }
  0xe9   :  { %v165_v58 = vpop.f32.mrb[8].mxu0  ;;  %v238_v60 = vpop.f32.mrb[8].mxu1 }
  0xea   :  { %v3815_v62 = vadd.f32 %v165_v58, %v41_v53  ;;  %v167_v2 = vpop.f32.mrb[9].mxu0  ;;  %v3818_v3 = vadd.f32 %v238_v60, %v3777_v49  ;;  %v240_v5 = vpop.f32.mrb[9].mxu1 }
  0xeb   :  { %v3820_v25 = vadd.f32 %v167_v2, %v45_v56  ;;  %v169_v41 = vpop.f32.mrb[10].mxu0  ;;  %v3823_v43 = vadd.f32 %v240_v5, %v3783_v52  ;;  %v242_v45 = vpop.f32.mrb[10].mxu1 }
  0xec   :  { %4333 = vst [vmem:[#allocation10_spill] sm:$0xff] %v3815_v62  ;;  %4334 = vst [vmem:[#allocation11_spill] sm:$0xff] %v3818_v3  ;;  %v3825_v1 = vadd.f32 %v169_v41, %v41_v53  ;;  %v171_v47 = vpop.f32.mrb[11].mxu0  ;;  %v3828_v57 = vadd.f32 %v242_v45, %v3777_v49  ;;  %v244_v58 = vpop.f32.mrb[11].mxu1 }
  0xed   :  { %4335 = vst [vmem:[#allocation12_spill] sm:$0xff] %v3820_v25  ;;  %4336 = vst [vmem:[#allocation13_spill] sm:$0xff] %v3823_v43  ;;  %v3830_v62 = vadd.f32 %v171_v47, %v45_v56  ;;  %v3833_v60 = vadd.f32 %v244_v58, %v3783_v52 }
  0xee   :  { %4337 = vst [vmem:[#allocation14_spill] sm:$0xff] %v3825_v1  ;;  %4338 = vst [vmem:[#allocation15_spill] sm:$0xff] %v3828_v57 }
  0xef   :  { %4339 = vst [vmem:[#allocation16_spill] sm:$0xff] %v3830_v62  ;;  %4340 = vst [vmem:[#allocation17_spill] sm:$0xff] %v3833_v60 }
  0xf1   :  { %v175_v3 = vpop.f32.mrb[12].mxu0  ;;  %v248_v2 = vpop.f32.mrb[12].mxu1 }
  0xf2   :  { %v3835_v25 = vadd.f32 %v175_v3, %v41_v53  ;;  %v177_v48 = vpop.f32.mrb[13].mxu0  ;;  %v3838_v5 = vadd.f32 %v248_v2, %v3777_v49  ;;  %v250_v41 = vpop.f32.mrb[13].mxu1 }
  0xf3   :  { %v3840_v1 = vadd.f32 %v177_v48, %v45_v56  ;;  %v179_v43 = vpop.f32.mrb[14].mxu0  ;;  %v3843_v45 = vadd.f32 %v250_v41, %v3783_v52  ;;  %v252_v47 = vpop.f32.mrb[14].mxu1  ;;  %v146_v48 = vadd.f32 %v3779_v50, %v41_v53  ;;  %v219_v41 = vadd.f32 %v3781_v51, %v3777_v49 }
  0xf4   :  { %4341 = vst [vmem:[#allocation18_spill] sm:$0xff] %v3835_v25  ;;  %4342 = vst [vmem:[#allocation19_spill] sm:$0xff] %v3838_v5  ;;  %v3845_v62 = vadd.f32 %v179_v43, %v41_v53  ;;  %v181_v58 = vpop.f32.mrb[15].mxu0  ;;  %v3848_v60 = vadd.f32 %v252_v47, %v3777_v49  ;;  %v254_v3 = vpop.f32.mrb[15].mxu1  ;;  %v221_v43 = vadd.f32 %v220_v55, %v3783_v52 }
  0xf5   :  { %4343 = vst [vmem:[#allocation20_spill] sm:$0xff] %v3840_v1  ;;  %4344 = vst [vmem:[#allocation21_spill] sm:$0xff] %v3843_v45  ;;  %v3850_v25 = vadd.f32 %v181_v58, %v45_v56  ;;  %v3853_v2 = vadd.f32 %v254_v3, %v3783_v52  ;;  %v148_v1 = vadd.f32 %v147_v54, %v45_v56 }
  0xf6   :  { %4345 = vst [vmem:[#allocation22_spill] sm:$0xff] %v3845_v62  ;;  %4346 = vst [vmem:[#allocation23_spill] sm:$0xff] %v3848_v60 }
  0xf7   :  { %4347 = vst [vmem:[#allocation24_spill] sm:$0xff] %v3850_v25  ;;  %4348 = vst [vmem:[#allocation25_spill] sm:$0xff] %v3853_v2 }
  0xf9   :  { %v525_v45 = vpop.f32.mrb[16].mxu0 }
  0xfa   :  { %v573_v62 = vadd.f32 %v525_v45, %v146_v48  ;;  %v566_v5 = vpop.f32.mrb[16].mxu1  ;;  %v527_v57 = vpop.f32.mrb[17].mxu0 }
  0xfb   :  { %v575_v47 = vadd.f32 %v566_v5, %v219_v41  ;;  %v574_v60 = vadd.f32 %v527_v57, %v148_v1  ;;  %v568_v46 = vpop.f32.mrb[17].mxu1  ;;  %v529_v58 = vpop.f32.mrb[18].mxu0 }
  0xfc   :  { %v2912_v25 = vmul.f32 -1.442695, %v573_v62  ;;  %v576_v44 = vadd.f32 %v568_v46, %v221_v43  ;;  %v530_v3 = vpop.f32.mrb[19].mxu0  ;;  %v570_v2 = vpop.f32.mrb[18].mxu1 }
  0xfd   :  { %v2913_v42 = vmul.f32 -1.442695, %v574_v60  ;;  %v571_v50 = vpop.f32.mrb[19].mxu1  ;;  %v4349_v2 = vmov 0  }
  0xfe   :  { %3333 = vpow2.f32 %v2912_v25  ;;  %v2914_v53 = vmul.f32 -1.442695, %v576_v44 }
  0xff   :  { %3335 = vpow2.f32 %v2913_v42 }
 0x100   :  { %3337 = vpow2.f32 %v2914_v53 }
 0x101   :  { %3339 = vtanh.f32 %v575_v47 }
 0x108   :  { %v3334_v49 = vpop.eup %3333 }
 0x109   :  { %v3336_v51 = vpop.eup %3335  ;;  %v580_v54 = vadd.f32 1.0, %v3334_v49 }
 0x10a   :  { %v586_v52 = vadd.f32 1.0, %v3336_v51  ;;  %v3338_v1 = vpop.eup %3337 }
 0x10b   :  { %3341 = vrcp.f32 %v580_v54  ;;  %v3340_v55 = vpop.eup %3339  ;;  %v593_v62 = vadd.f32 1.0, %v3338_v1 }
 0x10c   :  { %3343 = vrcp.f32 %v586_v52 }
 0x10d   :  { %3345 = vrcp.f32 %v593_v62 }
 0x115   :  { %v3342_v56 = vpop.eup %3341 }
 0x116   :  { %v3344_v57 = vpop.eup %3343  ;;  %v597_v46 = vmul.f32 %v3342_v56, %v3340_v55 }
 0x117   :  { %v596_v5 = vmul.f32 0.0, %v3344_v57  ;;  %v3346_v42 = vpop.eup %3345 }
 0x119   :  { %v3859_v60 = vadd.f32 %v597_v46, %v596_v5 }
 0x11b   :  { %3347 = vtanh.f32 %v3859_v60 }
 0x125   :  { %v3348_v44 = vpop.eup %3347 }
 0x126   :  { %v600_v25 = vmul.f32 %v3348_v44, %v3346_v42 }
 0x128   :  { %v601_v45 = vpack.c.bf16 %v600_v25, %v600_v25 }
 0x12a   :  { %602 = vst [vmem:[%s4325_s4] sm:$0xf] %v601_v45  ;;  %835 = vmatmul.mubr.bf16.vlgmr.msra.gmra.mrb[20].mxu0 %v601_v45  ;;  %876 = vmatmul.mubr.bf16.vlgmr.msra.gmra.mrb[20].mxu1 %v601_v45 }
 0x12b   :  { %1115 = vmatpush1.bf16.msra.mxu0 %v3524_v6  ;;  %1156 = vmatpush1.bf16.msra.mxu1 %v3534_v8 }
 0x12c   :  { %1116 = vmatprep.subr.bf16.mxu0 %v3547_v10  ;;  %1157 = vmatprep.subr.bf16.mxu1 %v3559_v12 }
 0x12d   :  { %1146 = vmatprep.mubr.bf16.mxu0 %v4349_v2  ;;  %1187 = vmatprep.mubr.bf16.mxu1 %v4349_v2 }
 0x12f   :  { %1117 = vmatpush1.bf16.msra.mxu0 %v3554_v11  ;;  %1158 = vmatpush1.bf16.msra.mxu1 %v3566_v13 }
 0x130   :  { %1118 = vmatprep.subr.bf16.mxu0 %v3577_v15  ;;  %1159 = vmatprep.subr.bf16.mxu1 %v3588_v17 }
 0x133   :  { %1119 = vmatpush1.bf16.msra.mxu0 %v3583_v16  ;;  %1160 = vmatpush1.bf16.msra.mxu1 %v3595_v18 }
 0x134   :  { %1120 = vmatprep.subr.bf16.mxu0 %v3600_v19  ;;  %1161 = vmatprep.subr.bf16.mxu1 %v3608_v20 }
 0x137   :  { %1121 = vmatpush1.bf16.msra.mxu0 %v3614_v21  ;;  %1162 = vmatpush1.bf16.msra.mxu1 %v3622_v22 }
 0x138   :  { %1122 = vmatprep.subr.bf16.mxu0 %v3627_v23  ;;  %1163 = vmatprep.subr.bf16.mxu1 %v3634_v24 }
 0x13b   :  { %1123 = vmatpush1.bf16.msra.mxu0 %v3643_v26  ;;  %1164 = vmatpush1.bf16.msra.mxu1 %v3650_v27 }
 0x13c   :  { %1124 = vmatprep.subr.bf16.mxu0 %v3655_v28  ;;  %1165 = vmatprep.subr.bf16.mxu1 %v3661_v29 }
 0x13f   :  { %1125 = vmatpush1.bf16.msra.mxu0 %v3668_v30  ;;  %1166 = vmatpush1.bf16.msra.mxu1 %v3674_v31 }
 0x140   :  { %1126 = vmatprep.subr.bf16.mxu0 %v3685_v33  ;;  %1167 = vmatprep.subr.bf16.mxu1 %v3697_v35 }
 0x143   :  { %1127 = vmatpush1.bf16.msra.mxu0 %v3692_v34  ;;  %1168 = vmatpush1.bf16.msra.mxu1 %v3702_v36 }
 0x144   :  { %1128 = vmatprep.subr.bf16.mxu0 %v3707_v37  ;;  %1169 = vmatprep.subr.bf16.mxu1 %v3713_v38 }
 0x147   :  { %1129 = vmatpush1.bf16.msra.mxu0 %v3721_v39  ;;  %1170 = vmatpush1.bf16.msra.mxu1 %v3728_v40 }
 0x148   :  { %1426 = vmatprep.subr.bf16.mxu0 %v3529_v7  ;;  %1467 = vmatprep.subr.bf16.mxu1 %v3540_v9 }
 0x1fd   :  { %v836_v48 = vpop.f32.mrb[20].mxu0  ;;  %v877_v41 = vpop.f32.mrb[20].mxu1 }
 0x1fe   :  { %v884_v43 = vadd.f32 %v836_v48, %v3785_v59  ;;  %v886_v47 = vadd.f32 %v877_v41, %v3788_v61  ;;  %v838_v58 = vpop.f32.mrb[21].mxu0  ;;  %v879_v3 = vpop.f32.mrb[21].mxu1 }
 0x1ff   :  { %v885_v50 = vadd.f32 %v838_v58, %v3790_v63  ;;  %v887_v53 = vadd.f32 %v879_v3, %v3793_v0  ;;  %v840_v49 = vpop.f32.mrb[22].mxu0  ;;  %v881_v51 = vpop.f32.mrb[22].mxu1 }
 0x200   :  { %v2947_v54 = vmul.f32 -1.442695, %v884_v43  ;;  %v841_v52 = vpop.f32.mrb[23].mxu0  ;;  %v882_v1 = vpop.f32.mrb[23].mxu1  ;;  %v3974_v49 = vld [vmem:[%s4323_s2] ss:$16 sps:$4 sm:$0xff]  }
 0x201   :  { %v2948_v7 = vmul.f32 -1.442695, %v885_v50  ;;  %v2949_v9 = vmul.f32 -1.442695, %v887_v53  ;;  %v3964_v50 = vld [vmem:[%s4323_s2 + $0x4] ss:$16 sps:$4 sm:$0xff]  }
 0x202   :  { %3349 = vpow2.f32 %v2947_v54  ;;  %v3969_v53 = vld [vmem:[%s4323_s2 + $0xc] ss:$16 sps:$4 sm:$0xff]   ;;  %v3979_v51 = vld [vmem:[%s4323_s2 + $0x8] ss:$16 sps:$4 sm:$0xff]   ;;  %v3988_v54 = vld [vmem:[%s4323_s2 + $0x24] ss:$16 sps:$4 sm:$0xff]  }
 0x203   :  { %3351 = vpow2.f32 %v2948_v7  ;;  %v3993_v52 = vld [vmem:[%s4323_s2 + $0x2c] ss:$16 sps:$4 sm:$0xff]   ;;  %v3998_v1 = vld [vmem:[%s4323_s2 + $0x20] ss:$16 sps:$4 sm:$0xff]   ;;  %v4003_v7 = vld [vmem:[%s4323_s2 + $0x28] ss:$16 sps:$4 sm:$0xff]  }
 0x204   :  { %3353 = vpow2.f32 %v2949_v9  ;;  %v4012_v9 = vld [vmem:[%s4323_s2 + $0x44] ss:$16 sps:$4 sm:$0xff]  }
 0x205   :  { %3355 = vtanh.f32 %v886_v47 }
 0x20c   :  { %v3350_v55 = vpop.eup %3349 }
 0x20d   :  { %v3352_v56 = vpop.eup %3351  ;;  %v891_v59 = vadd.f32 1.0, %v3350_v55  ;;  %v4017_v55 = vld [vmem:[%s4323_s2 + $0x4c] ss:$16 sps:$4 sm:$0xff]  }
 0x20e   :  { %v897_v61 = vadd.f32 1.0, %v3352_v56  ;;  %v3354_v63 = vpop.eup %3353  ;;  %v4022_v56 = vld [vmem:[%s4323_s2 + $0x40] ss:$16 sps:$4 sm:$0xff]  }
 0x20f   :  { %3357 = vrcp.f32 %v891_v59  ;;  %v3356_v57 = vpop.eup %3355  ;;  %v904_v5 = vadd.f32 1.0, %v3354_v63  ;;  %v4027_v59 = vld [vmem:[%s4323_s2 + $0x48] ss:$16 sps:$4 sm:$0xff]   ;;  %v4041_v63 = vld [vmem:[%s4323_s2 + $0x6c] ss:$16 sps:$4 sm:$0xff]  }
 0x210   :  { %3359 = vrcp.f32 %v897_v61  ;;  %v4036_v61 = vld [vmem:[%s4323_s2 + $0x64] ss:$16 sps:$4 sm:$0xff]  }
 0x211   :  { %3361 = vrcp.f32 %v904_v5  ;;  %v4070_v5 = vld [vmem:[%s4323_s2 + $0x88] ss:$16 sps:$4 sm:$0xff]  }
 0x219   :  { %v3358_v0 = vpop.eup %3357 }
 0x21a   :  { %v3360_v46 = vpop.eup %3359  ;;  %v908_v62 = vmul.f32 %v3358_v0, %v3356_v57  ;;  %v4046_v57 = vld [vmem:[%s4323_s2 + $0x60] ss:$16 sps:$4 sm:$0xff]   ;;  %v4051_v0 = vld [vmem:[%s4323_s2 + $0x68] ss:$16 sps:$4 sm:$0xff]  }
 0x21b   :  { %v907_v42 = vmul.f32 %v3360_v46, %v3859_v60  ;;  %v3362_v25 = vpop.eup %3361  ;;  %v4060_v46 = vld [vmem:[%s4323_s2 + $0x80] ss:$16 sps:$4 sm:$0xff]  }
 0x21d   :  { %v3904_v44 = vadd.f32 %v908_v62, %v907_v42  ;;  %v4065_v62 = vld [vmem:[%s4323_s2 + $0x84] ss:$16 sps:$4 sm:$0xff]   ;;  %v4075_v42 = vld [vmem:[%s4323_s2 + $0x8c] ss:$16 sps:$4 sm:$0xff]  }
 0x21f   :  { %3363 = vtanh.f32 %v3904_v44 }
 0x229   :  { %v3364_v45 = vpop.eup %3363 }
 0x22a   :  { %v911_v48 = vmul.f32 %v3364_v45, %v3362_v25  ;;  %v4086_v25 = vld [vmem:[%s4323_s2 + $0xac] ss:$16 sps:$4 sm:$0xff]   ;;  %v4093_v45 = vld [vmem:[%s4323_s2 + $0xa0] ss:$16 sps:$4 sm:$0xff]  }
 0x22c   :  { %v912_v41 = vpack.c.bf16 %v911_v48, %v911_v48  ;;  %v4100_v48 = vld [vmem:[%s4323_s2 + $0xa8] ss:$16 sps:$4 sm:$0xff]  }
 0x22e   :  { %2950 = vst [vmem:[%s4325_s4 + $0x4] sm:$0xf] %v912_v41  ;;  %1147 = vmatmul.mubr.bf16.vlgmr.msra.gmra.mrb[24].mxu0 %v912_v41  ;;  %1188 = vmatmul.mubr.bf16.vlgmr.msra.gmra.mrb[24].mxu1 %v912_v41  ;;  %v4105_v41 = vld [vmem:[%s4323_s2 + $0xc4] ss:$16 sps:$4 sm:$0xff]  }
 0x22f   :  { %1427 = vmatpush1.bf16.msra.mxu0 %v3524_v6  ;;  %1468 = vmatpush1.bf16.msra.mxu1 %v3534_v8 }
 0x230   :  { %1428 = vmatprep.subr.bf16.mxu0 %v3547_v10  ;;  %1469 = vmatprep.subr.bf16.mxu1 %v3559_v12 }
 0x231   :  { %1458 = vmatprep.mubr.bf16.mxu0 %v4349_v2  ;;  %1499 = vmatprep.mubr.bf16.mxu1 %v4349_v2 }
 0x233   :  { %1429 = vmatpush1.bf16.msra.mxu0 %v3554_v11  ;;  %1470 = vmatpush1.bf16.msra.mxu1 %v3566_v13 }
 0x234   :  { %1430 = vmatprep.subr.bf16.mxu0 %v3577_v15  ;;  %1471 = vmatprep.subr.bf16.mxu1 %v3588_v17 }
 0x235   :  { %v3184_v6 = vld [vmem:[%s4325_s4] sm:$0xff]  }
 0x236   :  { %v3185_v8 = vunpack.c.l.bf16 %v3184_v6  ;;  %v3186_v10 = vunpack.c.h.bf16 %v3184_v6  ;;  %v4111_v6 = vld [vmem:[%s4323_s2 + $0xcc] ss:$16 sps:$4 sm:$0xff]  }
 0x237   :  { %1431 = vmatpush1.bf16.msra.mxu0 %v3583_v16  ;;  %1472 = vmatpush1.bf16.msra.mxu1 %v3595_v18 }
 0x238   :  { %3365 = vtanh.f32 %v3185_v8  ;;  %1432 = vmatprep.subr.bf16.mxu0 %v3600_v19  ;;  %1473 = vmatprep.subr.bf16.mxu1 %v3608_v20  ;;  %v4117_v8 = vld [vmem:[%s4323_s2 + $0xc0] ss:$16 sps:$4 sm:$0xff]  }
 0x239   :  { %3367 = vtanh.f32 %v3186_v10  ;;  %v4124_v10 = vld [vmem:[%s4323_s2 + $0xc8] ss:$16 sps:$4 sm:$0xff]  }
 0x23b   :  { %1433 = vmatpush1.bf16.msra.mxu0 %v3614_v21  ;;  %1474 = vmatpush1.bf16.msra.mxu1 %v3622_v22  ;;  %v4350_v22 = vld [vmem:[#allocation5_spill] sm:$0xff] }
 0x23c   :  { %1434 = vmatprep.subr.bf16.mxu0 %v3627_v23  ;;  %1475 = vmatprep.subr.bf16.mxu1 %v3634_v24 }
 0x23f   :  { %1435 = vmatpush1.bf16.msra.mxu0 %v3643_v26  ;;  %1476 = vmatpush1.bf16.msra.mxu1 %v3650_v27 }
 0x240   :  { %1436 = vmatprep.subr.bf16.mxu0 %v3655_v28  ;;  %1477 = vmatprep.subr.bf16.mxu1 %v3661_v29 }
 0x242   :  { %v3366_v11 = vpop.eup %3365 }
 0x243   :  { %v3368_v12 = vpop.eup %3367  ;;  %1437 = vmatpush1.bf16.msra.mxu0 %v3668_v30  ;;  %1478 = vmatpush1.bf16.msra.mxu1 %v3674_v31 }
 0x244   :  { %v3202_v13 = vpack.c.bf16 %v3368_v12, %v3366_v11  ;;  %1438 = vmatprep.subr.bf16.mxu0 %v3685_v33  ;;  %1479 = vmatprep.subr.bf16.mxu1 %v3697_v35  ;;  %v4129_v11 = vld [vmem:[%s4323_s2 + $0xe4] ss:$16 sps:$4 sm:$0xff]   ;;  %v4135_v12 = vld [vmem:[%s4323_s2 + $0xec] ss:$16 sps:$4 sm:$0xff]  }
 0x246   :  { %3203 = vst [vmem:[%s4325_s4] sm:$0xff] %v3202_v13   ;;  %v4141_v13 = vld [vmem:[%s4323_s2 + $0xe0] ss:$16 sps:$4 sm:$0xff]  }
 0x247   :  { %1439 = vmatpush1.bf16.msra.mxu0 %v3692_v34  ;;  %1480 = vmatpush1.bf16.msra.mxu1 %v3702_v36 }
 0x248   :  { %1440 = vmatprep.subr.bf16.mxu0 %v3707_v37  ;;  %1481 = vmatprep.subr.bf16.mxu1 %v3713_v38 }
 0x24b   :  { %1441 = vmatpush1.bf16.msra.mxu0 %v3721_v39  ;;  %1482 = vmatpush1.bf16.msra.mxu1 %v3728_v40 }
 0x24c   :  { %1738 = vmatprep.subr.bf16.mxu0 %v3964_v50  ;;  %1779 = vmatprep.subr.bf16.mxu1 %v3969_v53 }
 0x301   :  { %v1148_v15 = vpop.f32.mrb[24].mxu0  ;;  %v1189_v16 = vpop.f32.mrb[24].mxu1 }
 0x302   :  { %v1196_v17 = vadd.f32 %v1148_v15, %v3795_v4  ;;  %v1198_v18 = vadd.f32 %v1189_v16, %v3798_v14  ;;  %v1150_v19 = vpop.f32.mrb[25].mxu0  ;;  %v1191_v20 = vpop.f32.mrb[25].mxu1  ;;  %v4148_v15 = vld [vmem:[%s4323_s2 + $0xe8] ss:$16 sps:$4 sm:$0xff]  }
 0x303   :  { %v1197_v21 = vadd.f32 %v1150_v19, %v3800_v32  ;;  %v1199_v23 = vadd.f32 %v1191_v20, %v4350_v22  ;;  %v1152_v24 = vpop.f32.mrb[26].mxu0  ;;  %v1193_v26 = vpop.f32.mrb[26].mxu1  ;;  %v4352_v20 = vld [vmem:[#allocation7_spill] sm:$0xff] }
 0x304   :  { %v2983_v27 = vmul.f32 -1.442695, %v1196_v17  ;;  %v1153_v28 = vpop.f32.mrb[27].mxu0  ;;  %v1194_v29 = vpop.f32.mrb[27].mxu1  ;;  %v4353_v24 = vld [vmem:[#allocation8_spill] sm:$0xff] }
 0x305   :  { %v2984_v30 = vmul.f32 -1.442695, %v1197_v21  ;;  %v2985_v31 = vmul.f32 -1.442695, %v1199_v23 }
 0x306   :  { %3369 = vpow2.f32 %v2983_v27  ;;  %v4354_v27 = vld [vmem:[#allocation9_spill] sm:$0xff] }
 0x307   :  { %3371 = vpow2.f32 %v2984_v30 }
 0x308   :  { %3373 = vpow2.f32 %v2985_v31 }
 0x309   :  { %3375 = vtanh.f32 %v1198_v18  ;;  %v4351_v18 = vld [vmem:[#allocation6_spill] sm:$0xff] }
 0x310   :  { %v3370_v33 = vpop.eup %3369 }
 0x311   :  { %v3372_v34 = vpop.eup %3371  ;;  %v1203_v35 = vadd.f32 1.0, %v3370_v33 }
 0x312   :  { %v1209_v36 = vadd.f32 1.0, %v3372_v34  ;;  %v3374_v37 = vpop.eup %3373 }
 0x313   :  { %3377 = vrcp.f32 %v1203_v35  ;;  %v3376_v38 = vpop.eup %3375  ;;  %v1216_v14 = vadd.f32 1.0, %v3374_v37 }
 0x314   :  { %3379 = vrcp.f32 %v1209_v36 }
 0x315   :  { %3381 = vrcp.f32 %v1216_v14 }
 0x31d   :  { %v3378_v39 = vpop.eup %3377 }
 0x31e   :  { %v3380_v40 = vpop.eup %3379  ;;  %v1220_v4 = vmul.f32 %v3378_v39, %v3376_v38 }
 0x31f   :  { %v1219_v32 = vmul.f32 %v3380_v40, %v3904_v44  ;;  %v3382_v43 = vpop.eup %3381  ;;  %v4080_v44 = vld [vmem:[%s4323_s2 + $0xa4] ss:$16 sps:$4 sm:$0xff]  }
 0x321   :  { %v3953_v60 = vadd.f32 %v1220_v4, %v1219_v32 }
 0x323   :  { %3383 = vtanh.f32 %v3953_v60 }
 0x32d   :  { %v3384_v47 = vpop.eup %3383 }
 0x32e   :  { %v1223_v58 = vmul.f32 %v3384_v47, %v3382_v43 }
 0x330   :  { %v1224_v3 = vpack.c.bf16 %v1223_v58, %v1223_v58 }
 0x332   :  { %2986 = vst [vmem:[%s4325_s4 + $0x8] sm:$0xf] %v1224_v3  ;;  %1459 = vmatmul.mubr.bf16.vlgmr.msra.gmra.mrb[28].mxu0 %v1224_v3  ;;  %1500 = vmatmul.mubr.bf16.vlgmr.msra.gmra.mrb[28].mxu1 %v1224_v3 }
 0x333   :  { %1770 = vmatprep.mubr.bf16.mxu0 %v4349_v2  ;;  %1811 = vmatprep.mubr.bf16.mxu1 %v4349_v2 }
 0x334   :  { %1739 = vmatpush1.bf16.msra.mxu0 %v3974_v49  ;;  %1780 = vmatpush1.bf16.msra.mxu1 %v3979_v51 }
 0x335   :  { %1740 = vmatprep.subr.bf16.mxu0 %v3988_v54  ;;  %1781 = vmatprep.subr.bf16.mxu1 %v3993_v52 }
 0x338   :  { %1741 = vmatpush1.bf16.msra.mxu0 %v3998_v1  ;;  %1782 = vmatpush1.bf16.msra.mxu1 %v4003_v7 }
 0x339   :  { %1742 = vmatprep.subr.bf16.mxu0 %v4012_v9  ;;  %1783 = vmatprep.subr.bf16.mxu1 %v4017_v55 }
 0x33c   :  { %1743 = vmatpush1.bf16.msra.mxu0 %v4022_v56  ;;  %1784 = vmatpush1.bf16.msra.mxu1 %v4027_v59 }
 0x33d   :  { %1744 = vmatprep.subr.bf16.mxu0 %v4036_v61  ;;  %1785 = vmatprep.subr.bf16.mxu1 %v4041_v63 }
 0x340   :  { %1745 = vmatpush1.bf16.msra.mxu0 %v4046_v57  ;;  %1786 = vmatpush1.bf16.msra.mxu1 %v4051_v0 }
 0x341   :  { %1746 = vmatprep.subr.bf16.mxu0 %v4065_v62  ;;  %1787 = vmatprep.subr.bf16.mxu1 %v4075_v42 }
 0x344   :  { %1747 = vmatpush1.bf16.msra.mxu0 %v4060_v46  ;;  %1788 = vmatpush1.bf16.msra.mxu1 %v4070_v5 }
 0x345   :  { %1748 = vmatprep.subr.bf16.mxu0 %v4080_v44  ;;  %1789 = vmatprep.subr.bf16.mxu1 %v4086_v25 }
 0x348   :  { %1749 = vmatpush1.bf16.msra.mxu0 %v4093_v45  ;;  %1790 = vmatpush1.bf16.msra.mxu1 %v4100_v48 }
 0x349   :  { %1750 = vmatprep.subr.bf16.mxu0 %v4105_v41  ;;  %1791 = vmatprep.subr.bf16.mxu1 %v4111_v6 }
 0x34c   :  { %1751 = vmatpush1.bf16.msra.mxu0 %v4117_v8  ;;  %1792 = vmatpush1.bf16.msra.mxu1 %v4124_v10 }
 0x34d   :  { %1752 = vmatprep.subr.bf16.mxu0 %v4129_v11  ;;  %1793 = vmatprep.subr.bf16.mxu1 %v4135_v12 }
 0x350   :  { %1753 = vmatpush1.bf16.msra.mxu0 %v4141_v13  ;;  %1794 = vmatpush1.bf16.msra.mxu1 %v4148_v15 }
 0x351   :  { %2050 = vmatprep.subr.bf16.mxu0 %v3964_v50  ;;  %2091 = vmatprep.subr.bf16.mxu1 %v3969_v53 }
 0x405   :  { %v1460_v16 = vpop.f32.mrb[28].mxu0  ;;  %v1501_v17 = vpop.f32.mrb[28].mxu1 }
 0x406   :  { %v1508_v19 = vadd.f32 %v1460_v16, %v4351_v18  ;;  %v1510_v21 = vadd.f32 %v1501_v17, %v4352_v20  ;;  %v1462_v22 = vpop.f32.mrb[29].mxu0  ;;  %v1503_v23 = vpop.f32.mrb[29].mxu1 }
 0x407   :  { %v1509_v26 = vadd.f32 %v1462_v22, %v4353_v24  ;;  %v1511_v28 = vadd.f32 %v1503_v23, %v4354_v27  ;;  %v1464_v29 = vpop.f32.mrb[30].mxu0  ;;  %v1505_v30 = vpop.f32.mrb[30].mxu1 }
 0x408   :  { %v3019_v31 = vmul.f32 -1.442695, %v1508_v19  ;;  %v1465_v33 = vpop.f32.mrb[31].mxu0  ;;  %v1506_v34 = vpop.f32.mrb[31].mxu1  ;;  %v4355_v29 = vld [vmem:[#allocation10_spill] sm:$0xff] }
 0x409   :  { %v3020_v35 = vmul.f32 -1.442695, %v1509_v26  ;;  %v3021_v36 = vmul.f32 -1.442695, %v1511_v28 }
 0x40a   :  { %3385 = vpow2.f32 %v3019_v31  ;;  %v4356_v31 = vld [vmem:[#allocation11_spill] sm:$0xff] }
 0x40b   :  { %3387 = vpow2.f32 %v3020_v35 }
 0x40c   :  { %3389 = vpow2.f32 %v3021_v36  ;;  %v4357_v36 = vld [vmem:[#allocation12_spill] sm:$0xff] }
 0x40d   :  { %3391 = vtanh.f32 %v1510_v21 }
 0x414   :  { %v3386_v37 = vpop.eup %3385 }
 0x415   :  { %v3388_v38 = vpop.eup %3387  ;;  %v1515_v39 = vadd.f32 1.0, %v3386_v37 }
 0x416   :  { %v1521_v40 = vadd.f32 1.0, %v3388_v38  ;;  %v3390_v4 = vpop.eup %3389  ;;  %v4358_v38 = vld [vmem:[#allocation13_spill] sm:$0xff] }
 0x417   :  { %3393 = vrcp.f32 %v1515_v39  ;;  %v3392_v14 = vpop.eup %3391  ;;  %v1528_v58 = vadd.f32 1.0, %v3390_v4 }
 0x418   :  { %3395 = vrcp.f32 %v1521_v40 }
 0x419   :  { %3397 = vrcp.f32 %v1528_v58 }
 0x421   :  { %v3394_v32 = vpop.eup %3393 }
 0x422   :  { %v3396_v43 = vpop.eup %3395  ;;  %v1532_v47 = vmul.f32 %v3394_v32, %v3392_v14 }
 0x423   :  { %v1531_v3 = vmul.f32 %v3396_v43, %v3953_v60  ;;  %v3398_v17 = vpop.eup %3397 }
 0x425   :  { %v4160_v16 = vadd.f32 %v1532_v47, %v1531_v3 }
 0x427   :  { %3399 = vtanh.f32 %v4160_v16 }
 0x431   :  { %v3400_v18 = vpop.eup %3399 }
 0x432   :  { %v1535_v19 = vmul.f32 %v3400_v18, %v3398_v17 }
 0x434   :  { %v1536_v20 = vpack.c.bf16 %v1535_v19, %v1535_v19 }
 0x436   :  { %3022 = vst [vmem:[%s4325_s4 + $0xc] sm:$0xf] %v1536_v20  ;;  %1771 = vmatmul.mubr.bf16.vlgmr.msra.gmra.mrb[32].mxu0 %v1536_v20  ;;  %1812 = vmatmul.mubr.bf16.vlgmr.msra.gmra.mrb[32].mxu1 %v1536_v20 }
 0x437   :  { %2051 = vmatpush1.bf16.msra.mxu0 %v3974_v49  ;;  %2092 = vmatpush1.bf16.msra.mxu1 %v3979_v51 }
 0x438   :  { %2052 = vmatprep.subr.bf16.mxu0 %v3988_v54  ;;  %2093 = vmatprep.subr.bf16.mxu1 %v3993_v52 }
 0x439   :  { %2082 = vmatprep.mubr.bf16.mxu0 %v4349_v2  ;;  %2123 = vmatprep.mubr.bf16.mxu1 %v4349_v2 }
 0x43b   :  { %2053 = vmatpush1.bf16.msra.mxu0 %v3998_v1  ;;  %2094 = vmatpush1.bf16.msra.mxu1 %v4003_v7 }
 0x43c   :  { %2054 = vmatprep.subr.bf16.mxu0 %v4012_v9  ;;  %2095 = vmatprep.subr.bf16.mxu1 %v4017_v55 }
 0x43d   :  { %v3219_v60 = vld [vmem:[%s4325_s4 + $0x8] sm:$0xff]  }
 0x43e   :  { %v3189_v21 = vunpack.c.l.bf16 %v3219_v60  ;;  %v3190_v22 = vunpack.c.h.bf16 %v3219_v60 }
 0x43f   :  { %2055 = vmatpush1.bf16.msra.mxu0 %v4022_v56  ;;  %2096 = vmatpush1.bf16.msra.mxu1 %v4027_v59 }
 0x440   :  { %3401 = vtanh.f32 %v3189_v21  ;;  %2056 = vmatprep.subr.bf16.mxu0 %v4036_v61  ;;  %2097 = vmatprep.subr.bf16.mxu1 %v4041_v63 }
 0x441   :  { %3403 = vtanh.f32 %v3190_v22 }
 0x443   :  { %2057 = vmatpush1.bf16.msra.mxu0 %v4046_v57  ;;  %2098 = vmatpush1.bf16.msra.mxu1 %v4051_v0 }
 0x444   :  { %2058 = vmatprep.subr.bf16.mxu0 %v4065_v62  ;;  %2099 = vmatprep.subr.bf16.mxu1 %v4075_v42 }
 0x447   :  { %2059 = vmatpush1.bf16.msra.mxu0 %v4060_v46  ;;  %2100 = vmatpush1.bf16.msra.mxu1 %v4070_v5 }
 0x448   :  { %2060 = vmatprep.subr.bf16.mxu0 %v4080_v44  ;;  %2101 = vmatprep.subr.bf16.mxu1 %v4086_v25 }
 0x44a   :  { %v3402_v23 = vpop.eup %3401 }
 0x44b   :  { %v3404_v24 = vpop.eup %3403  ;;  %2061 = vmatpush1.bf16.msra.mxu0 %v4093_v45  ;;  %2102 = vmatpush1.bf16.msra.mxu1 %v4100_v48 }
 0x44c   :  { %v3207_v26 = vpack.c.bf16 %v3404_v24, %v3402_v23  ;;  %2062 = vmatprep.subr.bf16.mxu0 %v4105_v41  ;;  %2103 = vmatprep.subr.bf16.mxu1 %v4111_v6 }
 0x44e   :  { %3222 = vst [vmem:[%s4325_s4 + $0x8] sm:$0xff] %v3207_v26  }
 0x44f   :  { %2063 = vmatpush1.bf16.msra.mxu0 %v4117_v8  ;;  %2104 = vmatpush1.bf16.msra.mxu1 %v4124_v10 }
 0x450   :  { %2064 = vmatprep.subr.bf16.mxu0 %v4129_v11  ;;  %2105 = vmatprep.subr.bf16.mxu1 %v4135_v12 }
 0x453   :  { %2065 = vmatpush1.bf16.msra.mxu0 %v4141_v13  ;;  %2106 = vmatpush1.bf16.msra.mxu1 %v4148_v15 }
 0x454   :  { %2362 = vmatprep.subr.bf16.mxu0 %v3964_v50  ;;  %2403 = vmatprep.subr.bf16.mxu1 %v3969_v53 }
 0x509   :  { %v1772_v27 = vpop.f32.mrb[32].mxu0  ;;  %v1813_v28 = vpop.f32.mrb[32].mxu1 }
 0x50a   :  { %v1820_v30 = vadd.f32 %v1772_v27, %v4355_v29  ;;  %v1822_v33 = vadd.f32 %v1813_v28, %v4356_v31  ;;  %v1774_v34 = vpop.f32.mrb[33].mxu0  ;;  %v1815_v35 = vpop.f32.mrb[33].mxu1 }
 0x50b   :  { %v1821_v37 = vadd.f32 %v1774_v34, %v4357_v36  ;;  %v1823_v39 = vadd.f32 %v1815_v35, %v4358_v38  ;;  %v1776_v40 = vpop.f32.mrb[34].mxu0  ;;  %v1817_v4 = vpop.f32.mrb[34].mxu1  ;;  %v4359_v34 = vld [vmem:[#allocation14_spill] sm:$0xff]  ;;  %v4360_v36 = vld [vmem:[#allocation15_spill] sm:$0xff] }
 0x50c   :  { %v3055_v14 = vmul.f32 -1.442695, %v1820_v30  ;;  %v1777_v32 = vpop.f32.mrb[35].mxu0  ;;  %v1818_v43 = vpop.f32.mrb[35].mxu1  ;;  %v4361_v40 = vld [vmem:[#allocation16_spill] sm:$0xff] }
 0x50d   :  { %v3056_v47 = vmul.f32 -1.442695, %v1821_v37  ;;  %v3057_v58 = vmul.f32 -1.442695, %v1823_v39 }
 0x50e   :  { %3405 = vpow2.f32 %v3055_v14  ;;  %v4362_v14 = vld [vmem:[#allocation17_spill] sm:$0xff] }
 0x50f   :  { %3407 = vpow2.f32 %v3056_v47 }
 0x510   :  { %3409 = vpow2.f32 %v3057_v58 }
 0x511   :  { %3411 = vtanh.f32 %v1822_v33 }
 0x518   :  { %v3406_v3 = vpop.eup %3405 }
 0x519   :  { %v3408_v17 = vpop.eup %3407  ;;  %v1827_v18 = vadd.f32 1.0, %v3406_v3 }
 0x51a   :  { %v1833_v19 = vadd.f32 1.0, %v3408_v17  ;;  %v3410_v20 = vpop.eup %3409 }
 0x51b   :  { %3413 = vrcp.f32 %v1827_v18  ;;  %v3412_v60 = vpop.eup %3411  ;;  %v1840_v24 = vadd.f32 1.0, %v3410_v20 }
 0x51c   :  { %3415 = vrcp.f32 %v1833_v19 }
 0x51d   :  { %3417 = vrcp.f32 %v1840_v24 }
 0x525   :  { %v3414_v21 = vpop.eup %3413 }
 0x526   :  { %v3416_v22 = vpop.eup %3415  ;;  %v1844_v23 = vmul.f32 %v3414_v21, %v3412_v60 }
 0x527   :  { %v1843_v26 = vmul.f32 %v3416_v22, %v4160_v16  ;;  %v3418_v28 = vpop.eup %3417 }
 0x529   :  { %v4211_v27 = vadd.f32 %v1844_v23, %v1843_v26 }
 0x52b   :  { %3419 = vtanh.f32 %v4211_v27 }
 0x535   :  { %v3420_v29 = vpop.eup %3419 }
 0x536   :  { %v1847_v30 = vmul.f32 %v3420_v29, %v3418_v28 }
 0x538   :  { %v1848_v31 = vpack.c.bf16 %v1847_v30, %v1847_v30 }
 0x53a   :  { %3058 = vst [vmem:[%s4325_s4 + $0x10] sm:$0xf] %v1848_v31  ;;  %2083 = vmatmul.mubr.bf16.vlgmr.msra.gmra.mrb[36].mxu0 %v1848_v31  ;;  %2124 = vmatmul.mubr.bf16.vlgmr.msra.gmra.mrb[36].mxu1 %v1848_v31 }
 0x53b   :  { %2363 = vmatpush1.bf16.msra.mxu0 %v3974_v49  ;;  %2404 = vmatpush1.bf16.msra.mxu1 %v3979_v51 }
 0x53c   :  { %2364 = vmatprep.subr.bf16.mxu0 %v3988_v54  ;;  %2405 = vmatprep.subr.bf16.mxu1 %v3993_v52 }
 0x53d   :  { %2394 = vmatprep.mubr.bf16.mxu0 %v4349_v2  ;;  %2435 = vmatprep.mubr.bf16.mxu1 %v4349_v2 }
 0x53f   :  { %2365 = vmatpush1.bf16.msra.mxu0 %v3998_v1  ;;  %2406 = vmatpush1.bf16.msra.mxu1 %v4003_v7 }
 0x540   :  { %2366 = vmatprep.subr.bf16.mxu0 %v4012_v9  ;;  %2407 = vmatprep.subr.bf16.mxu1 %v4017_v55 }
 0x543   :  { %2367 = vmatpush1.bf16.msra.mxu0 %v4022_v56  ;;  %2408 = vmatpush1.bf16.msra.mxu1 %v4027_v59 }
 0x544   :  { %2368 = vmatprep.subr.bf16.mxu0 %v4036_v61  ;;  %2409 = vmatprep.subr.bf16.mxu1 %v4041_v63 }
 0x547   :  { %2369 = vmatpush1.bf16.msra.mxu0 %v4046_v57  ;;  %2410 = vmatpush1.bf16.msra.mxu1 %v4051_v0 }
 0x548   :  { %2370 = vmatprep.subr.bf16.mxu0 %v4065_v62  ;;  %2411 = vmatprep.subr.bf16.mxu1 %v4075_v42 }
 0x54b   :  { %2371 = vmatpush1.bf16.msra.mxu0 %v4060_v46  ;;  %2412 = vmatpush1.bf16.msra.mxu1 %v4070_v5 }
 0x54c   :  { %2372 = vmatprep.subr.bf16.mxu0 %v4080_v44  ;;  %2413 = vmatprep.subr.bf16.mxu1 %v4086_v25 }
 0x54f   :  { %2373 = vmatpush1.bf16.msra.mxu0 %v4093_v45  ;;  %2414 = vmatpush1.bf16.msra.mxu1 %v4100_v48 }
 0x550   :  { %2374 = vmatprep.subr.bf16.mxu0 %v4105_v41  ;;  %2415 = vmatprep.subr.bf16.mxu1 %v4111_v6 }
 0x553   :  { %2375 = vmatpush1.bf16.msra.mxu0 %v4117_v8  ;;  %2416 = vmatpush1.bf16.msra.mxu1 %v4124_v10 }
 0x554   :  { %2376 = vmatprep.subr.bf16.mxu0 %v4129_v11  ;;  %2417 = vmatprep.subr.bf16.mxu1 %v4135_v12 }
 0x557   :  { %2377 = vmatpush1.bf16.msra.mxu0 %v4141_v13  ;;  %2418 = vmatpush1.bf16.msra.mxu1 %v4148_v15 }
 0x558   :  { %2674 = vmatprep.subr.bf16.mxu0 %v3964_v50  ;;  %2715 = vmatprep.subr.bf16.mxu1 %v3969_v53 }
 0x60d   :  { %v2084_v16 = vpop.f32.mrb[36].mxu0  ;;  %v2125_v33 = vpop.f32.mrb[36].mxu1 }
 0x60e   :  { %v2132_v35 = vadd.f32 %v2084_v16, %v4359_v34  ;;  %v2134_v37 = vadd.f32 %v2125_v33, %v4360_v36  ;;  %v2086_v38 = vpop.f32.mrb[37].mxu0  ;;  %v2127_v39 = vpop.f32.mrb[37].mxu1 }
 0x60f   :  { %v2133_v4 = vadd.f32 %v2086_v38, %v4361_v40  ;;  %v2135_v32 = vadd.f32 %v2127_v39, %v4362_v14  ;;  %v2088_v43 = vpop.f32.mrb[38].mxu0  ;;  %v2129_v47 = vpop.f32.mrb[38].mxu1 }
 0x610   :  { %v3091_v58 = vmul.f32 -1.442695, %v2132_v35  ;;  %v2089_v3 = vpop.f32.mrb[39].mxu0  ;;  %v2130_v17 = vpop.f32.mrb[39].mxu1 }
 0x611   :  { %v3092_v50 = vmul.f32 -1.442695, %v2133_v4  ;;  %v3093_v53 = vmul.f32 -1.442695, %v2135_v32  ;;  %v4368_v17 = vld [vmem:[#allocation23_spill] sm:$0xff] }
 0x612   :  { %3421 = vpow2.f32 %v3091_v58  ;;  %v4367_v58 = vld [vmem:[#allocation22_spill] sm:$0xff] }
 0x613   :  { %3423 = vpow2.f32 %v3092_v50 }
 0x614   :  { %3425 = vpow2.f32 %v3093_v53 }
 0x615   :  { %3427 = vtanh.f32 %v2134_v37 }
 0x61c   :  { %v3422_v18 = vpop.eup %3421 }
 0x61d   :  { %v3424_v19 = vpop.eup %3423  ;;  %v2139_v20 = vadd.f32 1.0, %v3422_v18 }
 0x61e   :  { %v2145_v60 = vadd.f32 1.0, %v3424_v19  ;;  %v3426_v21 = vpop.eup %3425  ;;  %v4369_v19 = vld [vmem:[#allocation24_spill] sm:$0xff] }
 0x61f   :  { %3429 = vrcp.f32 %v2139_v20  ;;  %v3428_v22 = vpop.eup %3427  ;;  %v2152_v28 = vadd.f32 1.0, %v3426_v21 }
 0x620   :  { %3431 = vrcp.f32 %v2145_v60  ;;  %v4370_v60 = vld [vmem:[#allocation25_spill] sm:$0xff] }
 0x621   :  { %3433 = vrcp.f32 %v2152_v28 }
 0x629   :  { %v3430_v23 = vpop.eup %3429 }
 0x62a   :  { %v3432_v24 = vpop.eup %3431  ;;  %v2156_v26 = vmul.f32 %v3430_v23, %v3428_v22 }
 0x62b   :  { %v2155_v29 = vmul.f32 %v3432_v24, %v4211_v27  ;;  %v3434_v31 = vpop.eup %3433 }
 0x62d   :  { %v4256_v30 = vadd.f32 %v2156_v26, %v2155_v29 }
 0x62f   :  { %3435 = vtanh.f32 %v4256_v30 }
 0x639   :  { %v3436_v16 = vpop.eup %3435 }
 0x63a   :  { %v2159_v33 = vmul.f32 %v3436_v16, %v3434_v31 }
 0x63c   :  { %v2160_v34 = vpack.c.bf16 %v2159_v33, %v2159_v33 }
 0x63e   :  { %3094 = vst [vmem:[%s4325_s4 + $0x14] sm:$0xf] %v2160_v34  ;;  %2395 = vmatmul.mubr.bf16.vlgmr.msra.gmra.mrb[40].mxu0 %v2160_v34  ;;  %2436 = vmatmul.mubr.bf16.vlgmr.msra.gmra.mrb[40].mxu1 %v2160_v34 }
 0x63f   :  { %2675 = vmatpush1.bf16.msra.mxu0 %v3974_v49  ;;  %2716 = vmatpush1.bf16.msra.mxu1 %v3979_v51 }
 0x640   :  { %2676 = vmatprep.subr.bf16.mxu0 %v3988_v54  ;;  %2717 = vmatprep.subr.bf16.mxu1 %v3993_v52 }
 0x641   :  { %2706 = vmatprep.mubr.bf16.mxu0 %v4349_v2  ;;  %2747 = vmatprep.mubr.bf16.mxu1 %v4349_v2 }
 0x643   :  { %2677 = vmatpush1.bf16.msra.mxu0 %v3998_v1  ;;  %2718 = vmatpush1.bf16.msra.mxu1 %v4003_v7 }
 0x644   :  { %2678 = vmatprep.subr.bf16.mxu0 %v4012_v9  ;;  %2719 = vmatprep.subr.bf16.mxu1 %v4017_v55  ;;  %v4363_v55 = vld [vmem:[#allocation18_spill] sm:$0xff] }
 0x645   :  { %v3220_v49 = vld [vmem:[%s4325_s4 + $0x10] sm:$0xff]  }
 0x646   :  { %v3193_v51 = vunpack.c.l.bf16 %v3220_v49  ;;  %v3194_v54 = vunpack.c.h.bf16 %v3220_v49 }
 0x647   :  { %2679 = vmatpush1.bf16.msra.mxu0 %v4022_v56  ;;  %2720 = vmatpush1.bf16.msra.mxu1 %v4027_v59  ;;  %v4364_v59 = vld [vmem:[#allocation19_spill] sm:$0xff] }
 0x648   :  { %3437 = vtanh.f32 %v3193_v51  ;;  %2680 = vmatprep.subr.bf16.mxu0 %v4036_v61  ;;  %2721 = vmatprep.subr.bf16.mxu1 %v4041_v63 }
 0x649   :  { %3439 = vtanh.f32 %v3194_v54 }
 0x64b   :  { %2681 = vmatpush1.bf16.msra.mxu0 %v4046_v57  ;;  %2722 = vmatpush1.bf16.msra.mxu1 %v4051_v0  ;;  %v4365_v0 = vld [vmem:[#allocation20_spill] sm:$0xff] }
 0x64c   :  { %2682 = vmatprep.subr.bf16.mxu0 %v4065_v62  ;;  %2723 = vmatprep.subr.bf16.mxu1 %v4075_v42  ;;  %v4366_v62 = vld [vmem:[#allocation21_spill] sm:$0xff] }
 0x64f   :  { %2683 = vmatpush1.bf16.msra.mxu0 %v4060_v46  ;;  %2724 = vmatpush1.bf16.msra.mxu1 %v4070_v5 }
 0x650   :  { %2684 = vmatprep.subr.bf16.mxu0 %v4080_v44  ;;  %2725 = vmatprep.subr.bf16.mxu1 %v4086_v25 }
 0x652   :  { %v3438_v2 = vpop.eup %3437 }
 0x653   :  { %v3440_v52 = vpop.eup %3439  ;;  %2685 = vmatpush1.bf16.msra.mxu0 %v4093_v45  ;;  %2726 = vmatpush1.bf16.msra.mxu1 %v4100_v48 }
 0x654   :  { %v3212_v1 = vpack.c.bf16 %v3440_v52, %v3438_v2  ;;  %2686 = vmatprep.subr.bf16.mxu0 %v4105_v41  ;;  %2727 = vmatprep.subr.bf16.mxu1 %v4111_v6 }
 0x656   :  { %3223 = vst [vmem:[%s4325_s4 + $0x10] sm:$0xff] %v3212_v1  }
 0x657   :  { %2687 = vmatpush1.bf16.msra.mxu0 %v4117_v8  ;;  %2728 = vmatpush1.bf16.msra.mxu1 %v4124_v10 }
 0x658   :  { %2688 = vmatprep.subr.bf16.mxu0 %v4129_v11  ;;  %2729 = vmatprep.subr.bf16.mxu1 %v4135_v12 }
 0x65b   :  { %2689 = vmatpush1.bf16.msra.mxu0 %v4141_v13  ;;  %2730 = vmatpush1.bf16.msra.mxu1 %v4148_v15 }
 0x711   :  { %v2396_v7 = vpop.f32.mrb[40].mxu0  ;;  %v2437_v9 = vpop.f32.mrb[40].mxu1 }
 0x712   :  { %v2444_v56 = vadd.f32 %v2396_v7, %v4363_v55  ;;  %v2446_v61 = vadd.f32 %v2437_v9, %v4364_v59  ;;  %v2398_v63 = vpop.f32.mrb[41].mxu0  ;;  %v2439_v57 = vpop.f32.mrb[41].mxu1 }
 0x713   :  { %v2445_v46 = vadd.f32 %v2398_v63, %v4365_v0  ;;  %v2447_v5 = vadd.f32 %v2439_v57, %v4366_v62  ;;  %v2400_v42 = vpop.f32.mrb[42].mxu0  ;;  %v2441_v44 = vpop.f32.mrb[42].mxu1 }
 0x714   :  { %v3127_v25 = vmul.f32 -1.442695, %v2444_v56  ;;  %v2401_v45 = vpop.f32.mrb[43].mxu0  ;;  %v2442_v48 = vpop.f32.mrb[43].mxu1 }
 0x715   :  { %v3128_v41 = vmul.f32 -1.442695, %v2445_v46  ;;  %v3129_v6 = vmul.f32 -1.442695, %v2447_v5 }
 0x716   :  { %3441 = vpow2.f32 %v3127_v25 }
 0x717   :  { %3443 = vpow2.f32 %v3128_v41 }
 0x718   :  { %3445 = vpow2.f32 %v3129_v6 }
 0x719   :  { %3447 = vtanh.f32 %v2446_v61 }
 0x720   :  { %v3442_v8 = vpop.eup %3441 }
 0x721   :  { %v3444_v10 = vpop.eup %3443  ;;  %v2451_v11 = vadd.f32 1.0, %v3442_v8 }
 0x722   :  { %v2457_v12 = vadd.f32 1.0, %v3444_v10  ;;  %v3446_v13 = vpop.eup %3445 }
 0x723   :  { %3449 = vrcp.f32 %v2451_v11  ;;  %v3448_v15 = vpop.eup %3447  ;;  %v2464_v37 = vadd.f32 1.0, %v3446_v13 }
 0x724   :  { %3451 = vrcp.f32 %v2457_v12 }
 0x725   :  { %3453 = vrcp.f32 %v2464_v37 }
 0x72d   :  { %v3450_v27 = vpop.eup %3449 }
 0x72e   :  { %v3452_v35 = vpop.eup %3451  ;;  %v2468_v36 = vmul.f32 %v3450_v27, %v3448_v15 }
 0x72f   :  { %v2467_v38 = vmul.f32 %v3452_v35, %v4256_v30  ;;  %v3454_v40 = vpop.eup %3453 }
 0x731   :  { %v2469_v39 = vadd.f32 %v2468_v36, %v2467_v38 }
 0x733   :  { %3455 = vtanh.f32 %v2469_v39 }
 0x73d   :  { %v3456_v4 = vpop.eup %3455 }
 0x73e   :  { %v2471_v14 = vmul.f32 %v3456_v4, %v3454_v40 }
 0x740   :  { %v2472_v32 = vpack.c.bf16 %v2471_v14, %v2471_v14 }
 0x742   :  { %3130 = vst [vmem:[%s4325_s4 + $0x18] sm:$0xf] %v2472_v32  ;;  %2707 = vmatmul.mubr.bf16.vlgmr.msra.gmra.mrb[44].mxu0 %v2472_v32  ;;  %2748 = vmatmul.mubr.bf16.vlgmr.msra.gmra.mrb[44].mxu1 %v2472_v32 }
 0x815   :  { %v2708_v43 = vpop.f32.mrb[44].mxu0  ;;  %v2749_v47 = vpop.f32.mrb[44].mxu1 }
 0x816   :  { %v2756_v3 = vadd.f32 %v2708_v43, %v4367_v58  ;;  %v2758_v50 = vadd.f32 %v2749_v47, %v4368_v17  ;;  %v2710_v53 = vpop.f32.mrb[45].mxu0  ;;  %v2751_v18 = vpop.f32.mrb[45].mxu1 }
 0x817   :  { %v2757_v20 = vadd.f32 %v2710_v53, %v4369_v19  ;;  %v2759_v21 = vadd.f32 %v2751_v18, %v4370_v60  ;;  %v2712_v22 = vpop.f32.mrb[46].mxu0  ;;  %v2753_v23 = vpop.f32.mrb[46].mxu1 }
 0x818   :  { %v3163_v24 = vmul.f32 -1.442695, %v2756_v3  ;;  %v2713_v26 = vpop.f32.mrb[47].mxu0  ;;  %v2754_v28 = vpop.f32.mrb[47].mxu1 }
 0x819   :  { %v3164_v29 = vmul.f32 -1.442695, %v2757_v20  ;;  %v3165_v30 = vmul.f32 -1.442695, %v2759_v21 }
 0x81a   :  { %3457 = vpow2.f32 %v3163_v24 }
 0x81b   :  { %3459 = vpow2.f32 %v3164_v29 }
 0x81c   :  { %3461 = vpow2.f32 %v3165_v30 }
 0x81d   :  { %3463 = vtanh.f32 %v2758_v50 }
 0x824   :  { %v3458_v31 = vpop.eup %3457 }
 0x825   :  { %v3460_v16 = vpop.eup %3459  ;;  %v2763_v33 = vadd.f32 1.0, %v3458_v31 }
 0x826   :  { %v2769_v34 = vadd.f32 1.0, %v3460_v16  ;;  %v3462_v49 = vpop.eup %3461 }
 0x827   :  { %3465 = vrcp.f32 %v2763_v33  ;;  %v3464_v51 = vpop.eup %3463  ;;  %v2776_v1 = vadd.f32 1.0, %v3462_v49 }
 0x828   :  { %3467 = vrcp.f32 %v2769_v34 }
 0x829   :  { %3469 = vrcp.f32 %v2776_v1 }
 0x831   :  { %v3466_v54 = vpop.eup %3465 }
 0x832   :  { %v3468_v2 = vpop.eup %3467  ;;  %v2780_v52 = vmul.f32 %v3466_v54, %v3464_v51 }
 0x833   :  { %v2779_v7 = vmul.f32 %v3468_v2, %v2469_v39  ;;  %v3470_v55 = vpop.eup %3469 }
 0x835   :  { %v2781_v9 = vadd.f32 %v2780_v52, %v2779_v7 }
 0x837   :  { %3471 = vtanh.f32 %v2781_v9 }
 0x841   :  { %v3472_v56 = vpop.eup %3471 }
 0x842   :  { %v2783_v59 = vmul.f32 %v3472_v56, %v3470_v55 }
 0x844   :  { %v2784_v61 = vpack.c.bf16 %v2783_v59, %v2783_v59 }
 0x846   :  { %3166 = vst [vmem:[%s4325_s4 + $0x1c] sm:$0xf] %v2784_v61 }
 0x84d   :  { %v3221_v63 = vld [vmem:[%s4325_s4 + $0x18] sm:$0xff]  }
 0x84e   :  { %v3197_v57 = vunpack.c.l.bf16 %v3221_v63  ;;  %v3198_v0 = vunpack.c.h.bf16 %v3221_v63 }
 0x850   :  { %3473 = vtanh.f32 %v3197_v57 }
 0x851   :  { %3475 = vtanh.f32 %v3198_v0 }
 0x85a   :  { %v3474_v46 = vpop.eup %3473 }
 0x85b   :  { %v3476_v62 = vpop.eup %3475 }
 0x85c   :  { %v3217_v5 = vpack.c.bf16 %v3476_v62, %v3474_v46 }
 0x85e   :  { %3224 = vst [vmem:[%s4325_s4 + $0x18] sm:$0xff] %v3217_v5  }

</bundles_post_ra>
